<compile_context>
chip_gen: v7x
topology: tpu7x:2x2x1
jax: 0.10.0
libtpu: 0.0.40
codegen_flags: <defaults>
</compile_context>

<pallas_src>
import jax
import jax.numpy as jnp
from jax.experimental import pallas as pl
from jax.experimental.pallas import tpu as pltpu


def _round_up(n, m):
    return ((n + m - 1) // m) * m


def _cdiv(a, b):
    return -(-a // b)


def _choose_tiling(B):
    """Pick (TM, B_pad, n_tiles) for the batch grid.

    - B <= 128: single tile, rounded up to the 8-row sublane granule
      (tiny-batch inference path).
    - B > 128: even tile count (>=2) so both v7x TensorCores get equal work,
      tile rows capped at 1024 (amortizes per-step overhead, comfortably fits
      VMEM), tile chosen to minimize zero-row padding waste.
    """
    if B <= 128:
        tm = _round_up(max(B, 1), 8)
        return tm, tm, 1
    n_lo = max(2, _round_up(_cdiv(B, 1024), 2))
    best = None
    for n in range(n_lo, n_lo + 16, 2):
        tm = _round_up(_cdiv(B, n), 8)
        waste = tm * n - B
        if best is None or waste < best[0]:
            best = (waste, tm, n)
    _, tm, n = best
    return tm, tm * n, n


def _actor_kernel(x_ref,
                  w1_ref, b1_ref,
                  w2_ref, b2_ref,
                  w3_ref, b3_ref,
                  w4_ref, b4_ref,
                  o_ref):
    # Cast x to bf16 in-kernel (input stays f32 in HBM; no wrapper cast pass).
    h = x_ref[...].astype(jnp.bfloat16)
    # fc1 + relu  (bf16 operands, f32 accumulation on the MXU)
    h = jnp.dot(h, w1_ref[...], preferred_element_type=jnp.float32)
    h = jnp.maximum(h + b1_ref[...], 0.0).astype(jnp.bfloat16)
    # fc2 + relu
    h = jnp.dot(h, w2_ref[...], preferred_element_type=jnp.float32)
    h = jnp.maximum(h + b2_ref[...], 0.0).astype(jnp.bfloat16)
    # fc3 + relu
    h = jnp.dot(h, w3_ref[...], preferred_element_type=jnp.float32)
    h = jnp.maximum(h + b3_ref[...], 0.0).astype(jnp.bfloat16)
    # fc4 + tanh (out_fcn = nn.Tanh())
    h = jnp.dot(h, w4_ref[...], preferred_element_type=jnp.float32)
    o_ref[...] = jnp.tanh(h + b4_ref[...]).astype(o_ref.dtype)


def actor_forward(x, kparams, action_space):
    """x: (B, state_space) f32. kparams: padded/bf16 params from
    prepare_kernel_params. Returns (B, action_space) f32."""
    B, S = x.shape
    w1, b1 = kparams["w1"], kparams["b1"]
    w2, b2 = kparams["w2"], kparams["b2"]
    w3, b3 = kparams["w3"], kparams["b3"]
    w4, b4 = kparams["w4"], kparams["b4"]
    A_pad = w4.shape[1]

    TM, B_pad, n_tiles = _choose_tiling(B)
    x_p = x if B_pad == B else jnp.pad(x, ((0, B_pad - B), (0, 0)))

    args = (x_p, w1, b1, w2, b2, w3, b3, w4, b4)

    # Advisory cost estimate (now includes x bytes and bf16 output writeback).
    flops = 2 * B_pad * (S * w1.shape[1]
                         + w1.shape[1] * w2.shape[1]
                         + w2.shape[1] * w3.shape[1]
                         + w3.shape[1] * A_pad)
    bytes_accessed = sum(int(a.size) * a.dtype.itemsize for a in args) \
        + B_pad * A_pad * 2
    cost = pl.CostEstimate(flops=flops,
                           transcendentals=B_pad * A_pad,
                           bytes_accessed=bytes_accessed)

    def build(single_buffer_weights):
        def resident(a):
            # Constant block index -> fetched once, stays VMEM-resident.
            nd = a.ndim
            if single_buffer_weights:
                return pl.BlockSpec(a.shape, lambda i: (0,) * nd,
                                    pipeline_mode=pl.Buffered(1))
            return pl.BlockSpec(a.shape, lambda i: (0,) * nd)

        in_specs = [pl.BlockSpec((TM, S), lambda i: (i, 0))] + \
                   [resident(a) for a in args[1:]]
        out_specs = pl.BlockSpec((TM, A_pad), lambda i: (i, 0))

        return pl.pallas_call(
            _actor_kernel,
            out_shape=jax.ShapeDtypeStruct((B_pad, A_pad), jnp.bfloat16),
            grid_spec=pl.GridSpec(
                grid=(n_tiles,),
                in_specs=in_specs,
                out_specs=out_specs,
            ),
            compiler_params=pltpu.CompilerParams(
                dimension_semantics=("parallel",)),
            cost_estimate=cost,
        )

    try:
        out = build(True)(*args)
    except Exception:
        # Fallback if Buffered(1) single-buffering is rejected by this jax
        # version: default double-buffering (only costs ~1.3 MB extra VMEM).
        out = build(False)(*args)

    return out[:B, :action_space].astype(jnp.float32)


def init_actor_params(key, state_space, action_space,
                      fc1_units=800, fc2_units=400, fc3_units=200):
    """Deterministic synthetic init mirroring the PyTorch module's shapes.

    PyTorch's reset_parameters draws uniform(-1/sqrt(fan), 1/sqrt(fan));
    weights are stored transposed, i.e. (in_features, out_features)."""
    dims = [(state_space, fc1_units),
            (fc1_units, fc2_units),
            (fc2_units, fc3_units),
            (fc3_units, action_space)]
    params = {}
    for idx, (fan_in, fan_out) in enumerate(dims, start=1):
        key, kw, kb = jax.random.split(key, 3)
        lim = 1.0 / float(fan_in) ** 0.5
        params[f"w{idx}"] = jax.random.uniform(
            kw, (fan_in, fan_out), jnp.float32, minval=-lim, maxval=lim)
        params[f"b{idx}"] = jax.random.uniform(
            kb, (1, fan_out), jnp.float32, minval=-lim, maxval=lim)
    return params


def prepare_kernel_params(params):
    """Zero-pad every layer's output width to a multiple of 128 lanes and cast
    weights to bf16 (biases stay f32). Exact: padded columns are zero, so
    relu(0)=0 and they contribute nothing to the next matmul."""
    prepared = {}
    prev_pad = 0  # rows to pad on the input side of the current layer
    for idx in range(1, 5):
        w = params[f"w{idx}"]
        b = params[f"b{idx}"]
        fan_in, fan_out = w.shape
        out_pad = _round_up(fan_out, 128) - fan_out
        w = jnp.pad(w, ((0, prev_pad), (0, out_pad)))
        b = jnp.pad(b, ((0, 0), (0, out_pad)))
        prepared[f"w{idx}"] = w.astype(jnp.bfloat16)
        prepared[f"b{idx}"] = b  # keep f32
        prev_pad = out_pad
    return prepared


def actor_reference(x, prepared, action_space):
    """Pure-JAX reference with the same bf16-operand / f32-accumulate math
    and a bf16 final store (matching the kernel)."""
    h = x.astype(jnp.bfloat16)
    for idx in range(1, 4):
        h = jnp.dot(h, prepared[f"w{idx}"],
                    preferred_element_type=jnp.float32)
        h = jnp.maximum(h + prepared[f"b{idx}"], 0.0).astype(jnp.bfloat16)
    h = jnp.dot(h, prepared["w4"], preferred_element_type=jnp.float32)
    out = jnp.tanh(h + prepared["b4"]).astype(jnp.bfloat16)
    return out[:, :action_space].astype(jnp.float32)


if __name__ == "__main__":
    key = jax.random.PRNGKey(0)
    state_space = 16
    action_space = 4
    batch = 2

    kx, kp = jax.random.split(key)
    x = jax.random.normal(kx, (batch, state_space), jnp.float32)
    params = init_actor_params(kp, state_space, action_space)
    kparams = prepare_kernel_params(params)

    out = actor_forward(x, kparams, action_space)
    out = jax.block_until_ready(out)

    ref = actor_reference(x, kparams, action_space)
    assert out.shape == (batch, action_space)
    assert jnp.allclose(out, ref, atol=1e-2, rtol=1e-2), "mismatch vs reference"

    print("KERNEL_OK")
</pallas_src>

<mosaic_0001>
module attributes {stable_mosaic.version = 11 : i64} {
  func.func @_actor_kernel(%arg0: i32, %arg1: memref<8x16xf32, #tpu.memory_space<vmem>>, %arg2: memref<16x896xbf16, #tpu.memory_space<vmem>>, %arg3: memref<1x896xf32, #tpu.memory_space<vmem>>, %arg4: memref<896x512xbf16, #tpu.memory_space<vmem>>, %arg5: memref<1x512xf32, #tpu.memory_space<vmem>>, %arg6: memref<512x256xbf16, #tpu.memory_space<vmem>>, %arg7: memref<1x256xf32, #tpu.memory_space<vmem>>, %arg8: memref<256x128xbf16, #tpu.memory_space<vmem>>, %arg9: memref<1x128xf32, #tpu.memory_space<vmem>>, %arg10: memref<8x128xbf16, #tpu.memory_space<vmem>>) attributes {dimension_semantics = [#tpu.dimension_semantics<parallel>], iteration_bounds = array<i64: 1>, scalar_prefetch = 0 : i64, scratch_operands = 0 : i64, tpu.core_type = #tpu.core_type<tc>, window_params = [{transform_indices = @transform_0, window_bounds = array<i64: 8, 16>}, {pipeline_mode = #tpu.pipeline_mode<synchronous>, transform_indices = @transform_1, window_bounds = array<i64: 16, 896>}, {pipeline_mode = #tpu.pipeline_mode<synchronous>, transform_indices = @transform_2, window_bounds = array<i64: 1, 896>}, {pipeline_mode = #tpu.pipeline_mode<synchronous>, transform_indices = @transform_3, window_bounds = array<i64: 896, 512>}, {pipeline_mode = #tpu.pipeline_mode<synchronous>, transform_indices = @transform_4, window_bounds = array<i64: 1, 512>}, {pipeline_mode = #tpu.pipeline_mode<synchronous>, transform_indices = @transform_5, window_bounds = array<i64: 512, 256>}, {pipeline_mode = #tpu.pipeline_mode<synchronous>, transform_indices = @transform_6, window_bounds = array<i64: 1, 256>}, {pipeline_mode = #tpu.pipeline_mode<synchronous>, transform_indices = @transform_7, window_bounds = array<i64: 256, 128>}, {pipeline_mode = #tpu.pipeline_mode<synchronous>, transform_indices = @transform_8, window_bounds = array<i64: 1, 128>}, {transform_indices = @transform_9, window_bounds = array<i64: 8, 128>}]} {
    %c0 = arith.constant 0 : index
    %c0_0 = arith.constant 0 : index
    %0 = vector.load %arg1[%c0, %c0_0] : memref<8x16xf32, #tpu.memory_space<vmem>>, vector<8x16xf32>
    %1 = arith.truncf %0 : vector<8x16xf32> to vector<8x16xbf16>
    %c0_1 = arith.constant 0 : index
    %c0_2 = arith.constant 0 : index
    %2 = vector.load %arg2[%c0_1, %c0_2] : memref<16x896xbf16, #tpu.memory_space<vmem>>, vector<16x896xbf16>
    %cst = arith.constant dense<0.000000e+00> : vector<8x896xf32>
    %3 = tpu.matmul %1, %2, %cst {dimension_numbers = #tpu.dot_dimension_numbers<[1], [0], [0], [1], [0, 0, 1, 1], [], []>} : vector<8x16xbf16>, vector<16x896xbf16>, vector<8x896xf32> -> vector<8x896xf32>
    %c0_3 = arith.constant 0 : index
    %c0_4 = arith.constant 0 : index
    %4 = vector.load %arg3[%c0_3, %c0_4] : memref<1x896xf32, #tpu.memory_space<vmem>>, vector<1x896xf32>
    %5 = vector.broadcast %4 : vector<1x896xf32> to vector<8x896xf32>
    %6 = arith.addf %3, %5 : vector<8x896xf32>
    %cst_5 = arith.constant 0.000000e+00 : f32
    %7 = vector.broadcast %cst_5 : f32 to vector<8x896xf32>
    %8 = arith.maximumf %6, %7 : vector<8x896xf32>
    %9 = arith.truncf %8 : vector<8x896xf32> to vector<8x896xbf16>
    %c0_6 = arith.constant 0 : index
    %c0_7 = arith.constant 0 : index
    %10 = vector.load %arg4[%c0_6, %c0_7] : memref<896x512xbf16, #tpu.memory_space<vmem>>, vector<896x512xbf16>
    %cst_8 = arith.constant dense<0.000000e+00> : vector<8x512xf32>
    %11 = tpu.matmul %9, %10, %cst_8 {dimension_numbers = #tpu.dot_dimension_numbers<[1], [0], [0], [1], [0, 0, 1, 1], [], []>} : vector<8x896xbf16>, vector<896x512xbf16>, vector<8x512xf32> -> vector<8x512xf32>
    %c0_9 = arith.constant 0 : index
    %c0_10 = arith.constant 0 : index
    %12 = vector.load %arg5[%c0_9, %c0_10] : memref<1x512xf32, #tpu.memory_space<vmem>>, vector<1x512xf32>
    %13 = vector.broadcast %12 : vector<1x512xf32> to vector<8x512xf32>
    %14 = arith.addf %11, %13 : vector<8x512xf32>
    %cst_11 = arith.constant 0.000000e+00 : f32
    %15 = vector.broadcast %cst_11 : f32 to vector<8x512xf32>
    %16 = arith.maximumf %14, %15 : vector<8x512xf32>
    %17 = arith.truncf %16 : vector<8x512xf32> to vector<8x512xbf16>
    %c0_12 = arith.constant 0 : index
    %c0_13 = arith.constant 0 : index
    %18 = vector.load %arg6[%c0_12, %c0_13] : memref<512x256xbf16, #tpu.memory_space<vmem>>, vector<512x256xbf16>
    %cst_14 = arith.constant dense<0.000000e+00> : vector<8x256xf32>
    %19 = tpu.matmul %17, %18, %cst_14 {dimension_numbers = #tpu.dot_dimension_numbers<[1], [0], [0], [1], [0, 0, 1, 1], [], []>} : vector<8x512xbf16>, vector<512x256xbf16>, vector<8x256xf32> -> vector<8x256xf32>
    %c0_15 = arith.constant 0 : index
    %c0_16 = arith.constant 0 : index
    %20 = vector.load %arg7[%c0_15, %c0_16] : memref<1x256xf32, #tpu.memory_space<vmem>>, vector<1x256xf32>
    %21 = vector.broadcast %20 : vector<1x256xf32> to vector<8x256xf32>
    %22 = arith.addf %19, %21 : vector<8x256xf32>
    %cst_17 = arith.constant 0.000000e+00 : f32
    %23 = vector.broadcast %cst_17 : f32 to vector<8x256xf32>
    %24 = arith.maximumf %22, %23 : vector<8x256xf32>
    %25 = arith.truncf %24 : vector<8x256xf32> to vector<8x256xbf16>
    %c0_18 = arith.constant 0 : index
    %c0_19 = arith.constant 0 : index
    %26 = vector.load %arg8[%c0_18, %c0_19] : memref<256x128xbf16, #tpu.memory_space<vmem>>, vector<256x128xbf16>
    %cst_20 = arith.constant dense<0.000000e+00> : vector<8x128xf32>
    %27 = tpu.matmul %25, %26, %cst_20 {dimension_numbers = #tpu.dot_dimension_numbers<[1], [0], [0], [1], [0, 0, 1, 1], [], []>} : vector<8x256xbf16>, vector<256x128xbf16>, vector<8x128xf32> -> vector<8x128xf32>
    %c0_21 = arith.constant 0 : index
    %c0_22 = arith.constant 0 : index
    %28 = vector.load %arg9[%c0_21, %c0_22] : memref<1x128xf32, #tpu.memory_space<vmem>>, vector<1x128xf32>
    %29 = vector.broadcast %28 : vector<1x128xf32> to vector<8x128xf32>
    %30 = arith.addf %27, %29 : vector<8x128xf32>
    %31 = math.tanh %30 : vector<8x128xf32>
    %32 = arith.truncf %31 : vector<8x128xf32> to vector<8x128xbf16>
    %c0_23 = arith.constant 0 : index
    %c0_24 = arith.constant 0 : index
    %33 = vector.load %arg10[%c0_23, %c0_24] : memref<8x128xbf16, #tpu.memory_space<vmem>>, vector<8x128xbf16>
    tpu.vector_store %arg10[%c0_23, %c0_24], %32 {strides = array<i32>} : memref<8x128xbf16, #tpu.memory_space<vmem>>, vector<8x128xbf16>,
    return
  }
  func.func @transform_0(%arg0: i32) -> (i32, i32) {
    %c0_i32 = arith.constant 0 : i32
    %c0_i32_0 = arith.constant 0 : i32
    return %arg0, %c0_i32 : i32, i32
  }
  func.func @transform_1(%arg0: i32) -> (i32, i32) {
    %c0_i32 = arith.constant 0 : i32
    %c0_i32_0 = arith.constant 0 : i32
    %c0_i32_1 = arith.constant 0 : i32
    return %c0_i32, %c0_i32_0 : i32, i32
  }
  func.func @transform_2(%arg0: i32) -> (i32, i32) {
    %c0_i32 = arith.constant 0 : i32
    %c0_i32_0 = arith.constant 0 : i32
    %c0_i32_1 = arith.constant 0 : i32
    return %c0_i32, %c0_i32_0 : i32, i32
  }
  func.func @transform_3(%arg0: i32) -> (i32, i32) {
    %c0_i32 = arith.constant 0 : i32
    %c0_i32_0 = arith.constant 0 : i32
    %c0_i32_1 = arith.constant 0 : i32
    return %c0_i32, %c0_i32_0 : i32, i32
  }
  func.func @transform_4(%arg0: i32) -> (i32, i32) {
    %c0_i32 = arith.constant 0 : i32
    %c0_i32_0 = arith.constant 0 : i32
    %c0_i32_1 = arith.constant 0 : i32
    return %c0_i32, %c0_i32_0 : i32, i32
  }
  func.func @transform_5(%arg0: i32) -> (i32, i32) {
    %c0_i32 = arith.constant 0 : i32
    %c0_i32_0 = arith.constant 0 : i32
    %c0_i32_1 = arith.constant 0 : i32
    return %c0_i32, %c0_i32_0 : i32, i32
  }
  func.func @transform_6(%arg0: i32) -> (i32, i32) {
    %c0_i32 = arith.constant 0 : i32
    %c0_i32_0 = arith.constant 0 : i32
    %c0_i32_1 = arith.constant 0 : i32
    return %c0_i32, %c0_i32_0 : i32, i32
  }
  func.func @transform_7(%arg0: i32) -> (i32, i32) {
    %c0_i32 = arith.constant 0 : i32
    %c0_i32_0 = arith.constant 0 : i32
    %c0_i32_1 = arith.constant 0 : i32
    return %c0_i32, %c0_i32_0 : i32, i32
  }
  func.func @transform_8(%arg0: i32) -> (i32, i32) {
    %c0_i32 = arith.constant 0 : i32
    %c0_i32_0 = arith.constant 0 : i32
    %c0_i32_1 = arith.constant 0 : i32
    return %c0_i32, %c0_i32_0 : i32, i32
  }
  func.func @transform_9(%arg0: i32) -> (i32, i32) {
    %c0_i32 = arith.constant 0 : i32
    %c0_i32_0 = arith.constant 0 : i32
    return %arg0, %c0_i32 : i32, i32
  }
}

module attributes {stable_mosaic.version = 11 : i64} {
  func.func @_actor_kernel(%arg0: i32, %arg1: memref<8x16xf32, #tpu.memory_space<vmem>>, %arg2: memref<16x896xbf16, #tpu.memory_space<vmem>>, %arg3: memref<1x896xf32, #tpu.memory_space<vmem>>, %arg4: memref<896x512xbf16, #tpu.memory_space<vmem>>, %arg5: memref<1x512xf32, #tpu.memory_space<vmem>>, %arg6: memref<512x256xbf16, #tpu.memory_space<vmem>>, %arg7: memref<1x256xf32, #tpu.memory_space<vmem>>, %arg8: memref<256x128xbf16, #tpu.memory_space<vmem>>, %arg9: memref<1x128xf32, #tpu.memory_space<vmem>>, %arg10: memref<8x128xbf16, #tpu.memory_space<vmem>>) attributes {dimension_semantics = [#tpu.dimension_semantics<parallel>], iteration_bounds = array<i64: 1>, scalar_prefetch = 0 : i64, scratch_operands = 0 : i64, tpu.core_type = #tpu.core_type<tc>, window_params = [{transform_indices = @transform_0, window_bounds = array<i64: 8, 16>}, {pipeline_mode = #tpu.pipeline_mode<synchronous>, transform_indices = @transform_1, window_bounds = array<i64: 16, 896>}, {pipeline_mode = #tpu.pipeline_mode<synchronous>, transform_indices = @transform_2, window_bounds = array<i64: 1, 896>}, {pipeline_mode = #tpu.pipeline_mode<synchronous>, transform_indices = @transform_3, window_bounds = array<i64: 896, 512>}, {pipeline_mode = #tpu.pipeline_mode<synchronous>, transform_indices = @transform_4, window_bounds = array<i64: 1, 512>}, {pipeline_mode = #tpu.pipeline_mode<synchronous>, transform_indices = @transform_5, window_bounds = array<i64: 512, 256>}, {pipeline_mode = #tpu.pipeline_mode<synchronous>, transform_indices = @transform_6, window_bounds = array<i64: 1, 256>}, {pipeline_mode = #tpu.pipeline_mode<synchronous>, transform_indices = @transform_7, window_bounds = array<i64: 256, 128>}, {pipeline_mode = #tpu.pipeline_mode<synchronous>, transform_indices = @transform_8, window_bounds = array<i64: 1, 128>}, {transform_indices = @transform_9, window_bounds = array<i64: 8, 128>}]} {
    %c0 = arith.constant 0 : index
    %c0_0 = arith.constant 0 : index
    %0 = vector.load %arg1[%c0, %c0_0] : memref<8x16xf32, #tpu.memory_space<vmem>>, vector<8x16xf32>
    %1 = arith.truncf %0 : vector<8x16xf32> to vector<8x16xbf16>
    %c0_1 = arith.constant 0 : index
    %c0_2 = arith.constant 0 : index
    %2 = vector.load %arg2[%c0_1, %c0_2] : memref<16x896xbf16, #tpu.memory_space<vmem>>, vector<16x896xbf16>
    %cst = arith.constant dense<0.000000e+00> : vector<8x896xf32>
    %3 = tpu.matmul %1, %2, %cst {dimension_numbers = #tpu.dot_dimension_numbers<[1], [0], [0], [1], [0, 0, 1, 1], [], []>} : vector<8x16xbf16>, vector<16x896xbf16>, vector<8x896xf32> -> vector<8x896xf32>
    %c0_3 = arith.constant 0 : index
    %c0_4 = arith.constant 0 : index
    %4 = vector.load %arg3[%c0_3, %c0_4] : memref<1x896xf32, #tpu.memory_space<vmem>>, vector<1x896xf32>
    %5 = vector.broadcast %4 : vector<1x896xf32> to vector<8x896xf32>
    %6 = arith.addf %3, %5 : vector<8x896xf32>
    %cst_5 = arith.constant 0.000000e+00 : f32
    %7 = vector.broadcast %cst_5 : f32 to vector<8x896xf32>
    %8 = arith.maximumf %6, %7 : vector<8x896xf32>
    %9 = arith.truncf %8 : vector<8x896xf32> to vector<8x896xbf16>
    %c0_6 = arith.constant 0 : index
    %c0_7 = arith.constant 0 : index
    %10 = vector.load %arg4[%c0_6, %c0_7] : memref<896x512xbf16, #tpu.memory_space<vmem>>, vector<896x512xbf16>
    %cst_8 = arith.constant dense<0.000000e+00> : vector<8x512xf32>
    %11 = tpu.matmul %9, %10, %cst_8 {dimension_numbers = #tpu.dot_dimension_numbers<[1], [0], [0], [1], [0, 0, 1, 1], [], []>} : vector<8x896xbf16>, vector<896x512xbf16>, vector<8x512xf32> -> vector<8x512xf32>
    %c0_9 = arith.constant 0 : index
    %c0_10 = arith.constant 0 : index
    %12 = vector.load %arg5[%c0_9, %c0_10] : memref<1x512xf32, #tpu.memory_space<vmem>>, vector<1x512xf32>
    %13 = vector.broadcast %12 : vector<1x512xf32> to vector<8x512xf32>
    %14 = arith.addf %11, %13 : vector<8x512xf32>
    %cst_11 = arith.constant 0.000000e+00 : f32
    %15 = vector.broadcast %cst_11 : f32 to vector<8x512xf32>
    %16 = arith.maximumf %14, %15 : vector<8x512xf32>
    %17 = arith.truncf %16 : vector<8x512xf32> to vector<8x512xbf16>
    %c0_12 = arith.constant 0 : index
    %c0_13 = arith.constant 0 : index
    %18 = vector.load %arg6[%c0_12, %c0_13] : memref<512x256xbf16, #tpu.memory_space<vmem>>, vector<512x256xbf16>
    %cst_14 = arith.constant dense<0.000000e+00> : vector<8x256xf32>
    %19 = tpu.matmul %17, %18, %cst_14 {dimension_numbers = #tpu.dot_dimension_numbers<[1], [0], [0], [1], [0, 0, 1, 1], [], []>} : vector<8x512xbf16>, vector<512x256xbf16>, vector<8x256xf32> -> vector<8x256xf32>
    %c0_15 = arith.constant 0 : index
    %c0_16 = arith.constant 0 : index
    %20 = vector.load %arg7[%c0_15, %c0_16] : memref<1x256xf32, #tpu.memory_space<vmem>>, vector<1x256xf32>
    %21 = vector.broadcast %20 : vector<1x256xf32> to vector<8x256xf32>
    %22 = arith.addf %19, %21 : vector<8x256xf32>
    %cst_17 = arith.constant 0.000000e+00 : f32
    %23 = vector.broadcast %cst_17 : f32 to vector<8x256xf32>
    %24 = arith.maximumf %22, %23 : vector<8x256xf32>
    %25 = arith.truncf %24 : vector<8x256xf32> to vector<8x256xbf16>
    %c0_18 = arith.constant 0 : index
    %c0_19 = arith.constant 0 : index
    %26 = vector.load %arg8[%c0_18, %c0_19] : memref<256x128xbf16, #tpu.memory_space<vmem>>, vector<256x128xbf16>
    %cst_20 = arith.constant dense<0.000000e+00> : vector<8x128xf32>
    %27 = tpu.matmul %25, %26, %cst_20 {dimension_numbers = #tpu.dot_dimension_numbers<[1], [0], [0], [1], [0, 0, 1, 1], [], []>} : vector<8x256xbf16>, vector<256x128xbf16>, vector<8x128xf32> -> vector<8x128xf32>
    %c0_21 = arith.constant 0 : index
    %c0_22 = arith.constant 0 : index
    %28 = vector.load %arg9[%c0_21, %c0_22] : memref<1x128xf32, #tpu.memory_space<vmem>>, vector<1x128xf32>
    %29 = vector.broadcast %28 : vector<1x128xf32> to vector<8x128xf32>
    %30 = arith.addf %27, %29 : vector<8x128xf32>
    %31 = math.tanh %30 : vector<8x128xf32>
    %32 = arith.truncf %31 : vector<8x128xf32> to vector<8x128xbf16>
    %c0_23 = arith.constant 0 : index
    %c0_24 = arith.constant 0 : index
    %33 = vector.load %arg10[%c0_23, %c0_24] : memref<8x128xbf16, #tpu.memory_space<vmem>>, vector<8x128xbf16>
    tpu.vector_store %arg10[%c0_23, %c0_24], %32 {strides = array<i32>} : memref<8x128xbf16, #tpu.memory_space<vmem>>, vector<8x128xbf16>,
    return
  }
  func.func @transform_0(%arg0: i32) -> (i32, i32) {
    %c0_i32 = arith.constant 0 : i32
    %c0_i32_0 = arith.constant 0 : i32
    return %arg0, %c0_i32 : i32, i32
  }
  func.func @transform_1(%arg0: i32) -> (i32, i32) {
    %c0_i32 = arith.constant 0 : i32
    %c0_i32_0 = arith.constant 0 : i32
    %c0_i32_1 = arith.constant 0 : i32
    return %c0_i32, %c0_i32_0 : i32, i32
  }
  func.func @transform_2(%arg0: i32) -> (i32, i32) {
    %c0_i32 = arith.constant 0 : i32
    %c0_i32_0 = arith.constant 0 : i32
    %c0_i32_1 = arith.constant 0 : i32
    return %c0_i32, %c0_i32_0 : i32, i32
  }
  func.func @transform_3(%arg0: i32) -> (i32, i32) {
    %c0_i32 = arith.constant 0 : i32
    %c0_i32_0 = arith.constant 0 : i32
    %c0_i32_1 = arith.constant 0 : i32
    return %c0_i32, %c0_i32_0 : i32, i32
  }
  func.func @transform_4(%arg0: i32) -> (i32, i32) {
    %c0_i32 = arith.constant 0 : i32
    %c0_i32_0 = arith.constant 0 : i32
    %c0_i32_1 = arith.constant 0 : i32
    return %c0_i32, %c0_i32_0 : i32, i32
  }
  func.func @transform_5(%arg0: i32) -> (i32, i32) {
    %c0_i32 = arith.constant 0 : i32
    %c0_i32_0 = arith.constant 0 : i32
    %c0_i32_1 = arith.constant 0 : i32
    return %c0_i32, %c0_i32_0 : i32, i32
  }
  func.func @transform_6(%arg0: i32) -> (i32, i32) {
    %c0_i32 = arith.constant 0 : i32
    %c0_i32_0 = arith.constant 0 : i32
    %c0_i32_1 = arith.constant 0 : i32
    return %c0_i32, %c0_i32_0 : i32, i32
  }
  func.func @transform_7(%arg0: i32) -> (i32, i32) {
    %c0_i32 = arith.constant 0 : i32
    %c0_i32_0 = arith.constant 0 : i32
    %c0_i32_1 = arith.constant 0 : i32
    return %c0_i32, %c0_i32_0 : i32, i32
  }
  func.func @transform_8(%arg0: i32) -> (i32, i32) {
    %c0_i32 = arith.constant 0 : i32
    %c0_i32_0 = arith.constant 0 : i32
    %c0_i32_1 = arith.constant 0 : i32
    return %c0_i32, %c0_i32_0 : i32, i32
  }
  func.func @transform_9(%arg0: i32) -> (i32, i32) {
    %c0_i32 = arith.constant 0 : i32
    %c0_i32_0 = arith.constant 0 : i32
    return %arg0, %c0_i32 : i32, i32
  }
}

</mosaic_0001>

<bundles_post_ra>
// kernel: tpu_custom_call.1
= control target key start
LH: loop header
LB: loop body
LE: loop exit
PB: predicated region body
PF: predicated region fallthrough
CT: control target
= control target key end

     0   :  { %14 = vsyncpa [#allocation3], 0  ;;  %s3977_s0 = inlined_call_operand.hbm [shape: f32[8,16], index: 0, kind: input, shape index: {}]   ;;  %s3978_s1 = inlined_call_operand.hbm [shape: bf16[16,896], index: 1, kind: input, shape index: {}]   ;;  %s3979_s2 = inlined_call_operand.vmem [shape: f32[1,896], index: 2, kind: input, shape index: {}]   ;;  %s3980_s3 = inlined_call_operand.hbm [shape: bf16[896,512], index: 3, kind: input, shape index: {}]   ;;  %s3981_s4 = inlined_call_operand.vmem [shape: f32[1,512], index: 4, kind: input, shape index: {}]   ;;  %s3982_s5 = inlined_call_operand.hbm [shape: bf16[512,256], index: 5, kind: input, shape index: {}]   ;;  %s3983_s6 = inlined_call_operand.vmem [shape: f32[1,256], index: 6, kind: input, shape index: {}]   ;;  %s3984_s7 = inlined_call_operand.hbm [shape: bf16[256,128], index: 7, kind: input, shape index: {}]   ;;  %s3985_s8 = inlined_call_operand.vmem [shape: f32[1,128], index: 8, kind: input, shape index: {}]   ;;  %s3986_s9 = inlined_call_operand.hbm [shape: bf16[8,128], index: 9, kind: output, shape index: {}]  }
   0x1   :  { %15 = vsyncpa [#allocation6], 0 }
   0x2   :  { %16 = vsyncpa [#allocation9], 0 }
   0x3   :  { %17 = vsyncpa [#allocation4], 0  ;;  %s3738_s30 = smov [#allocation5]   ;;  %s3598_s13 = scalar_lea.hbm %s3978_s1, 896 }
   0x4   :  { %s33_s10 = sshll.u32 %s3738_s30, 4  ;;  %p3599_p0 = scmp.ne.s32.totalorder %s3978_s1, %s3598_s13  ;;  %s34_s10 = int_to_ptr.vmem [resolvable:$true] %s33_s10 }
   0x5   :  { %p3602_p1 = scmp.lt.u32.totalorder %s3598_s13, %s3978_s1 }
   0x7   :  { %p3604_p2 = pnand %p3602_p1, %p3599_p0 }
   0x9   :  { %3607 = shalt.err (!%p3604_p2)
}
   0xa   :  { %s3608_s18 = scalar_lea.vmem %s34_s10, 896  ;;  %p3613_p4 = scmp.lt.s32.totalorder %s34_s10, %s34_s10 }
   0xb   :  { %p3609_p3 = scmp.ne.s32.totalorder %s34_s10, %s3608_s18  ;;  %p3614_p5 = scmp.lt.s32.totalorder %s3608_s18, %s3608_s18 }
   0xd   :  { %p3615_p6 = por %p3614_p5, %p3613_p4 }
   0xf   :  { %p3616_p7 = pnand %p3615_p6, %p3609_p3 }
  0x11   :  { %3619 = shalt.err (!%p3616_p7)
}
  0x12   :  { %s3739_s19 = smov 448   ;;  %s3740_s20 = smov 28  }
  0x13   :  { %39 = dma.hbm_to_vmem [thread:$0]  %s3978_s1, 896, %s34_s10, [#allocation6], %s3739_s19, %s3739_s19, %s3740_s20  }
  0x14   :  { %s3741_s23 = smov [#allocation8]   ;;  %s3620_s27 = scalar_lea.hbm %s3982_s5, 8192 }
  0x15   :  { %s61_s24 = sshll.u32 %s3741_s23, 4  ;;  %p3621_p8 = scmp.ne.s32.totalorder %s3982_s5, %s3620_s27  ;;  %s62_s24 = int_to_ptr.vmem [resolvable:$true] %s61_s24 }
  0x16   :  { %p3624_p9 = scmp.lt.u32.totalorder %s3620_s27, %s3982_s5 }
  0x18   :  { %p3626_p10 = pnand %p3624_p9, %p3621_p8 }
  0x1a   :  { %3629 = shalt.err (!%p3626_p10)
}
  0x1b   :  { %s3630_s12 = scalar_lea.vmem %s62_s24, 8192  ;;  %p3635_p12 = scmp.lt.s32.totalorder %s62_s24, %s62_s24 }
  0x1c   :  { %p3631_p11 = scmp.ne.s32.totalorder %s62_s24, %s3630_s12  ;;  %p3636_p13 = scmp.lt.s32.totalorder %s3630_s12, %s3630_s12 }
  0x1e   :  { %p3637_p0 = por %p3636_p13, %p3635_p12 }
  0x20   :  { %p3638_p1 = pnand %p3637_p0, %p3631_p11 }
  0x22   :  { %3641 = shalt.err (!%p3638_p1)
}
  0x23   :  { %s3742_s1 = smov 128   ;;  %s3743_s10 = smov 8  }
  0x24   :  { %67 = dma.hbm_to_vmem [thread:$0]  %s3982_s5, 8192, %s62_s24, [#allocation9], %s3742_s1, %s3742_s1, %s3743_s10  }
  0x25   :  { %s3744_s15 = smov [#allocation2]   ;;  %s3745_s17 = smov [#allocation7]  }
  0x26   :  { %s24_s16 = sshll.u32 %s3744_s15, 4  ;;  %s47_s18 = sshll.u32 %s3745_s17, 4  ;;  %s25_s16 = int_to_ptr.vmem [resolvable:$true] %s24_s16  ;;  %s3829_s18 = int_to_ptr.vmem [resolvable:$true] %s47_s18 }
  0x27   :  { %s3642_s21 = scalar_lea.hbm %s3977_s0, 128 }
  0x28   :  { %p3643_p2 = scmp.ne.s32.totalorder %s3977_s0, %s3642_s21  ;;  %p3646_p3 = scmp.lt.u32.totalorder %s3642_s21, %s3977_s0 }
  0x2a   :  { %p3648_p4 = pnand %p3646_p3, %p3643_p2 }
  0x2c   :  { %3651 = shalt.err (!%p3648_p4)
}
  0x2d   :  { %s3652_s5 = scalar_lea.vmem %s25_s16, 128  ;;  %p3657_p6 = scmp.lt.s32.totalorder %s25_s16, %s25_s16 }
  0x2e   :  { %p3653_p5 = scmp.ne.s32.totalorder %s25_s16, %s3652_s5  ;;  %p3658_p7 = scmp.lt.s32.totalorder %s3652_s5, %s3652_s5 }
  0x30   :  { %p3659_p8 = por %p3658_p7, %p3657_p6 }
  0x32   :  { %p3660_p9 = pnand %p3659_p8, %p3653_p5 }
  0x34   :  { %3663 = shalt.err (!%p3660_p9)
}
  0x35   :  { %27 = dma.hbm_to_vmem [thread:$0]  %s3977_s0, 128, %s25_s16, [#allocation3]  }
  0x36   :  { %s3664_s30 = scalar_lea.hbm %s3980_s3, 28672 }
  0x37   :  { %p3665_p10 = scmp.ne.s32.totalorder %s3980_s3, %s3664_s30  ;;  %p3668_p11 = scmp.lt.u32.totalorder %s3664_s30, %s3980_s3 }
  0x39   :  { %p3670_p12 = pnand %p3668_p11, %p3665_p10 }
  0x3b   :  { %3673 = shalt.err (!%p3670_p12)
}
  0x3c   :  { %s3674_s13 = scalar_lea.vmem %s3829_s18, 28672  ;;  %p3679_p0 = scmp.lt.s32.totalorder %s3829_s18, %s3829_s18 }
  0x3d   :  { %p3675_p13 = scmp.ne.s32.totalorder %s3829_s18, %s3674_s13  ;;  %p3680_p1 = scmp.lt.s32.totalorder %s3674_s13, %s3674_s13 }
  0x3f   :  { %p3681_p2 = por %p3680_p1, %p3679_p0 }
  0x41   :  { %p3682_p3 = pnand %p3681_p2, %p3675_p13 }
  0x43   :  { %3685 = shalt.err (!%p3682_p3)
}
  0x44   :  { %s3746_s0 = smov 256   ;;  %s3747_s14 = smov 16  }
  0x45   :  { %53 = dma.hbm_to_vmem [thread:$0]  %s3980_s3, 28672, %s3829_s18, [#allocation6], %s3746_s0, %s3746_s0, %s3747_s14  }
  0x46   :  { %s3748_s17 = smov [#allocation10]   ;;  %s3686_s22 = scalar_lea.hbm %s3984_s7, 2048 }
  0x47   :  { %s75_s19 = sshll.u32 %s3748_s17, 4  ;;  %p3687_p4 = scmp.ne.s32.totalorder %s3984_s7, %s3686_s22  ;;  %s76_s19 = int_to_ptr.vmem [resolvable:$true] %s75_s19 }
  0x48   :  { %p3690_p5 = scmp.lt.u32.totalorder %s3686_s22, %s3984_s7 }
  0x4a   :  { %p3692_p6 = pnand %p3690_p5, %p3687_p4 }
  0x4c   :  { %3695 = shalt.err (!%p3692_p6)
}
  0x4d   :  { %s3696_s24 = scalar_lea.vmem %s76_s19, 2048  ;;  %p3701_p8 = scmp.lt.s32.totalorder %s76_s19, %s76_s19 }
  0x4e   :  { %p3697_p7 = scmp.ne.s32.totalorder %s76_s19, %s3696_s24  ;;  %p3702_p9 = scmp.lt.s32.totalorder %s3696_s24, %s3696_s24 }
  0x50   :  { %p3703_p10 = por %p3702_p9, %p3701_p8 }
  0x52   :  { %p3704_p11 = pnand %p3703_p10, %p3697_p7 }
  0x54   :  { %3707 = shalt.err (!%p3704_p11)
}
  0x55   :  { %s3749_s3 = smov 64   ;;  %s3750_s18 = smov 4  }
  0x56   :  { %81 = dma.hbm_to_vmem [thread:$0]  %s3984_s7, 2048, %s76_s19, [#allocation9], %s3749_s3, %s3749_s3, %s3750_s18  }
  0x57   :  { %3730 = dma.done.wait [#allocation3], 128  }
  0x58   :  { %3731 = vsyncadd [#allocation3], 4294967168 }
  0x59   :  { %3732 = dma.done.wait [#allocation6], 29568  }
  0x5a   :  { %3733 = vsyncadd [#allocation6], 4294937728 }
  0x5b   :  { %3734 = dma.done.wait [#allocation9], 10240  }
  0x5c   :  { %3735 = vsyncadd [#allocation9], 4294957056  ;;  %v3751_v0 = vmov 0   ;;  %v3138_v1 = vld [vmem:[#allocation5 + $0x4] ss:$28 sps:$4 sm:$0xff]   ;;  %v100_v3 = vld [vmem:[#allocation2] sm:$0xff] }
  0x5d   :  { %219 = vmatprep.mubr.bf16.mxu0 %v3751_v0  ;;  %v3140_v2 = vld [vmem:[#allocation5] ss:$28 sps:$4 sm:$0xff]   ;;  %187 = vmatprep.subr.bf16.mxu0 %v3138_v1  ;;  %v101_v4 = vpack.c.bf16 %v100_v3, %v100_v3  ;;  %v3143_v5 = vld [vmem:[#allocation5 + $0xc] ss:$28 sps:$4 sm:$0xff]   ;;  %vm183_vm0 = vcmask 130048   ;;  %v3752_v16 = vmov 0.0  }
  0x5e   :  { %188 = vmatpush1.bf16.msra.mxu0 %v3140_v2  ;;  %v3141_v6 = vld [vmem:[#allocation5 + $0x8] ss:$28 sps:$4 sm:$0xff]   ;;  %v3146_v7 = vld [vmem:[#allocation5 + $0x14] ss:$28 sps:$4 sm:$0xff]   ;;  %v3148_v8 = vld [vmem:[#allocation7 + $0x4] ss:$16 sps:$4 sm:$0xff]  }
  0x5f   :  { %228 = vmatprep.subr.bf16.mxu0 %v3143_v5  ;;  %v3150_v9 = vld [vmem:[#allocation7] ss:$16 sps:$4 sm:$0xff]   ;;  %v3151_v10 = vld [vmem:[#allocation7 + $0x24] ss:$16 sps:$4 sm:$0xff]   ;;  %1730 = vmatprep.subr.bf16.mxu1 %v3148_v8  ;;  %vm3753_vm1 = vmmov 0  }
  0x60   :  { %1731 = vmatpush1.bf16.msra.mxu1 %v3150_v9  ;;  %v3153_v11 = vld [vmem:[#allocation7 + $0x20] ss:$16 sps:$4 sm:$0xff]   ;;  %v3154_v12 = vld [vmem:[#allocation7 + $0x44] ss:$16 sps:$4 sm:$0xff]   ;;  %v3243_v9 = vld [vmem:[#allocation7 + $0xc] ss:$16 sps:$4 sm:$0xff]  }
  0x61   :  { %2750 = vmatmul.mubr.msk.bf16.vlgmr.msra.gmra.mrb[0].mxu0 %vm183_vm0, %v101_v4  ;;  %1732 = vmatprep.subr.bf16.mxu1 %v3151_v10  ;;  %v3144_v13 = vld [vmem:[#allocation5 + $0x10] ss:$28 sps:$4 sm:$0xff]   ;;  %v3159_v14 = vld [vmem:[#allocation7 + $0x40] ss:$16 sps:$4 sm:$0xff]  }
  0x62   :  { %229 = vmatpush1.bf16.msra.mxu0 %v3141_v6  ;;  %260 = vmatprep.mubr.bf16.mxu0 %v3751_v0  ;;  %v3160_v15 = vld [vmem:[#allocation7 + $0x64] ss:$16 sps:$4 sm:$0xff]   ;;  %v3165_v17 = vld [vmem:[#allocation7 + $0x60] ss:$16 sps:$4 sm:$0xff]  }
  0x63   :  { %269 = vmatprep.subr.bf16.mxu0 %v3146_v7  ;;  %v3166_v18 = vld [vmem:[#allocation7 + $0x84] ss:$16 sps:$4 sm:$0xff]   ;;  %v3147_v19 = vld [vmem:[#allocation5 + $0x18] ss:$28 sps:$4 sm:$0xff]  }
  0x64   :  { %1733 = vmatpush1.bf16.msra.mxu1 %v3153_v11  ;;  %v3158_v20 = vld [vmem:[#allocation7 + $0x204] ss:$16 sps:$4 sm:$0xff]   ;;  %v3171_v21 = vld [vmem:[#allocation7 + $0x80] ss:$16 sps:$4 sm:$0xff]  }
  0x65   :  { %1734 = vmatprep.subr.bf16.mxu1 %v3154_v12  ;;  %v3172_v22 = vld [vmem:[#allocation7 + $0xa4] ss:$16 sps:$4 sm:$0xff]   ;;  %v3177_v23 = vld [vmem:[#allocation7 + $0xa0] ss:$16 sps:$4 sm:$0xff]  }
  0x66   :  { %v3178_v24 = vld [vmem:[#allocation7 + $0xc4] ss:$16 sps:$4 sm:$0xff]   ;;  %v3156_v25 = vld [vmem:[#allocation7 + $0x200] ss:$16 sps:$4 sm:$0xff]  }
  0x67   :  { %v3164_v26 = vld [vmem:[#allocation7 + $0x224] ss:$16 sps:$4 sm:$0xff]   ;;  %v3183_v27 = vld [vmem:[#allocation7 + $0xc0] ss:$16 sps:$4 sm:$0xff]  }
  0x68   :  { %1735 = vmatpush1.bf16.msra.mxu1 %v3159_v14  ;;  %v3184_v28 = vld [vmem:[#allocation7 + $0xe4] ss:$16 sps:$4 sm:$0xff]   ;;  %v3162_v29 = vld [vmem:[#allocation7 + $0x220] ss:$16 sps:$4 sm:$0xff]   ;;  %v112_v14 = vlaneseq }
  0x69   :  { %2751 = vmatmul.mubr.msk.bf16.vlgmr.msra.gmra.mrb[4].mxu0 %vm183_vm0, %v101_v4  ;;  %1736 = vmatprep.subr.bf16.mxu1 %v3160_v15  ;;  %v3170_v30 = vld [vmem:[#allocation7 + $0x244] ss:$16 sps:$4 sm:$0xff]   ;;  %v3189_v31 = vld [vmem:[#allocation7 + $0xe0] ss:$16 sps:$4 sm:$0xff]  }
  0x6a   :  { %270 = vmatpush1.bf16.msra.mxu0 %v3144_v13  ;;  %301 = vmatprep.mubr.bf16.mxu0 %v3751_v0  ;;  %v3190_v32 = vld [vmem:[#allocation7 + $0x104] ss:$16 sps:$4 sm:$0xff]   ;;  %v3168_v33 = vld [vmem:[#allocation7 + $0x240] ss:$16 sps:$4 sm:$0xff]   ;;  %v3879_v15 = vshrl.u32 %v112_v14, 7 }
  0x6b   :  { %3083 = vmatprep.subr.bf16.mxu0 %v3752_v16  ;;  %v3176_v34 = vld [vmem:[#allocation7 + $0x264] ss:$16 sps:$4 sm:$0xff]   ;;  %v3195_v35 = vld [vmem:[#allocation7 + $0x100] ss:$16 sps:$4 sm:$0xff]  }
  0x6c   :  { %1737 = vmatpush1.bf16.msra.mxu1 %v3165_v17  ;;  %v3196_v36 = vld [vmem:[#allocation7 + $0x124] ss:$16 sps:$4 sm:$0xff]   ;;  %v3174_v37 = vld [vmem:[#allocation7 + $0x260] ss:$16 sps:$4 sm:$0xff]  }
  0x6d   :  { %1738 = vmatprep.subr.bf16.mxu1 %v3166_v18  ;;  %v3182_v38 = vld [vmem:[#allocation7 + $0x284] ss:$16 sps:$4 sm:$0xff]   ;;  %v3201_v39 = vld [vmem:[#allocation7 + $0x120] ss:$16 sps:$4 sm:$0xff]   ;;  %v3890_v18 = vsub.s32 1, %v3879_v15 }
  0x6e   :  { %v3202_v40 = vld [vmem:[#allocation7 + $0x144] ss:$16 sps:$4 sm:$0xff]   ;;  %v3180_v41 = vld [vmem:[#allocation7 + $0x280] ss:$16 sps:$4 sm:$0xff]  }
  0x6f   :  { %v3188_v42 = vld [vmem:[#allocation7 + $0x2a4] ss:$16 sps:$4 sm:$0xff]   ;;  %v3207_v43 = vld [vmem:[#allocation7 + $0x140] ss:$16 sps:$4 sm:$0xff]  }
  0x70   :  { %1739 = vmatpush1.bf16.msra.mxu1 %v3171_v21  ;;  %v3208_v44 = vld [vmem:[#allocation7 + $0x164] ss:$16 sps:$4 sm:$0xff]   ;;  %v3186_v45 = vld [vmem:[#allocation7 + $0x2a0] ss:$16 sps:$4 sm:$0xff]  }
  0x71   :  { %2752 = vmatmul.mubr.msk.bf16.vlgmr.msra.gmra.mrb[8].mxu0 %vm183_vm0, %v101_v4  ;;  %1740 = vmatprep.subr.bf16.mxu1 %v3172_v22  ;;  %v3194_v46 = vld [vmem:[#allocation7 + $0x2c4] ss:$16 sps:$4 sm:$0xff]   ;;  %v3213_v47 = vld [vmem:[#allocation7 + $0x160] ss:$16 sps:$4 sm:$0xff]  }
  0x72   :  { %3084 = vmatpush3.bf16.msra.mxu0 %v3147_v19  ;;  %3085 = vmatprep.mubr.msk.bf16.mxu0 %vm3753_vm1, %v3752_v16  ;;  %v3214_v48 = vld [vmem:[#allocation7 + $0x184] ss:$16 sps:$4 sm:$0xff]   ;;  %v3192_v49 = vld [vmem:[#allocation7 + $0x2c0] ss:$16 sps:$4 sm:$0xff]   ;;  %v3882_v16 = vsub.s32 0, %v3879_v15 }
  0x73   :  { %1771 = vmatprep.subr.bf16.mxu0 %v3158_v20  ;;  %v3200_v50 = vld [vmem:[#allocation7 + $0x2e4] ss:$16 sps:$4 sm:$0xff]   ;;  %v3219_v51 = vld [vmem:[#allocation7 + $0x180] ss:$16 sps:$4 sm:$0xff]  }
  0x74   :  { %1741 = vmatpush1.bf16.msra.mxu1 %v3177_v23  ;;  %v3220_v52 = vld [vmem:[#allocation7 + $0x1a4] ss:$16 sps:$4 sm:$0xff]   ;;  %v3198_v53 = vld [vmem:[#allocation7 + $0x2e0] ss:$16 sps:$4 sm:$0xff]  }
  0x75   :  { %1742 = vmatprep.subr.bf16.mxu1 %v3178_v24  ;;  %v3206_v54 = vld [vmem:[#allocation7 + $0x304] ss:$16 sps:$4 sm:$0xff]   ;;  %v3225_v55 = vld [vmem:[#allocation7 + $0x1a0] ss:$16 sps:$4 sm:$0xff]   ;;  %v122_v24 = vsub.s32 2, %v3879_v15 }
  0x76   :  { %v3204_v56 = vld [vmem:[#allocation7 + $0x300] ss:$16 sps:$4 sm:$0xff]   ;;  %v3212_v57 = vld [vmem:[#allocation7 + $0x324] ss:$16 sps:$4 sm:$0xff]  }
  0x77   :  { %v3210_v58 = vld [vmem:[#allocation7 + $0x320] ss:$16 sps:$4 sm:$0xff]   ;;  %v3218_v59 = vld [vmem:[#allocation7 + $0x344] ss:$16 sps:$4 sm:$0xff]  }
  0x78   :  { %1743 = vmatpush1.bf16.msra.mxu1 %v3183_v27  ;;  %v3216_v60 = vld [vmem:[#allocation7 + $0x340] ss:$16 sps:$4 sm:$0xff]   ;;  %v3224_v61 = vld [vmem:[#allocation7 + $0x364] ss:$16 sps:$4 sm:$0xff]   ;;  %v126_v27 = vsub.s32 3, %v3879_v15 }
  0x79   :  { %3086 = vmatmul.mubr.msk.bf16.vlgmr.msra.gmra.mrb[12].mxu0 %vm183_vm0, %v101_v4  ;;  %1744 = vmatprep.subr.bf16.mxu1 %v3184_v28  ;;  %v3222_v62 = vld [vmem:[#allocation7 + $0x360] ss:$16 sps:$4 sm:$0xff]   ;;  %v3226_v63 = vld [vmem:[#allocation7 + $0x1c4] ss:$16 sps:$4 sm:$0xff]  }
  0x7a   :  { %1772 = vmatpush1.bf16.msra.mxu0 %v3156_v25  ;;  %v3230_v1 = vld [vmem:[#allocation7 + $0x384] ss:$16 sps:$4 sm:$0xff]   ;;  %v3228_v2 = vld [vmem:[#allocation7 + $0x380] ss:$16 sps:$4 sm:$0xff]  }
  0x7b   :  { %1773 = vmatprep.subr.bf16.mxu0 %v3164_v26  ;;  %v3231_v3 = vld [vmem:[#allocation7 + $0x1c0] ss:$16 sps:$4 sm:$0xff]   ;;  %v3232_v4 = vld [vmem:[#allocation7 + $0x1e4] ss:$16 sps:$4 sm:$0xff]  }
  0x7c   :  { %1745 = vmatpush1.bf16.msra.mxu1 %v3189_v31  ;;  %v3236_v5 = vld [vmem:[#allocation7 + $0x3a4] ss:$16 sps:$4 sm:$0xff]   ;;  %v3234_v6 = vld [vmem:[#allocation7 + $0x3a0] ss:$16 sps:$4 sm:$0xff]  }
  0x7d   :  { %1746 = vmatprep.subr.bf16.mxu1 %v3190_v32  ;;  %v3237_v7 = vld [vmem:[#allocation7 + $0x1e0] ss:$16 sps:$4 sm:$0xff]   ;;  %v3240_v8 = vld [vmem:[#allocation7 + $0x3c4] ss:$16 sps:$4 sm:$0xff]  }
  0x7e   :  { %1774 = vmatpush1.bf16.msra.mxu0 %v3162_v29  ;;  %v3238_v10 = vld [vmem:[#allocation7 + $0x3c0] ss:$16 sps:$4 sm:$0xff]   ;;  %v3246_v11 = vld [vmem:[#allocation7 + $0x3e4] ss:$16 sps:$4 sm:$0xff]  }
  0x7f   :  { %1775 = vmatprep.subr.bf16.mxu0 %v3170_v30  ;;  %v3244_v12 = vld [vmem:[#allocation7 + $0x3e0] ss:$16 sps:$4 sm:$0xff]   ;;  %v3252_v13 = vld [vmem:[#allocation7 + $0x404] ss:$16 sps:$4 sm:$0xff]  }
  0x80   :  { %1747 = vmatpush1.bf16.msra.mxu1 %v3195_v35  ;;  %v3887_v17 = vld [vmem:[%s3979_s2] sm:$0xff] }
  0x81   :  { %1748 = vmatprep.subr.bf16.mxu1 %v3196_v36  ;;  %v115_v19 = vrot.slane %v3887_v17, %v3882_v16  ;;  %v119_v20 = vrot.slane %v3887_v17, %v3890_v18  ;;  %v123_v31 = vrot.slane %v3887_v17, %v122_v24  ;;  %v3249_v36 = vld [vmem:[#allocation7 + $0x2c] ss:$16 sps:$4 sm:$0xff]  }
  0x82   :  { %1776 = vmatpush1.bf16.msra.mxu0 %v3168_v33  ;;  %v3241_v33 = vld [vmem:[#allocation7 + $0x8] ss:$16 sps:$4 sm:$0xff]  }
  0x83   :  { %1777 = vmatprep.subr.bf16.mxu0 %v3176_v34  ;;  %v127_v34 = vrot.slane %v3887_v17, %v126_v27 }
  0x84   :  { %1749 = vmatpush1.bf16.msra.mxu1 %v3201_v39 }
  0x85   :  { %1750 = vmatprep.subr.bf16.mxu1 %v3202_v40 }
  0x86   :  { %1778 = vmatpush1.bf16.msra.mxu0 %v3174_v37 }
  0x87   :  { %1779 = vmatprep.subr.bf16.mxu0 %v3182_v38 }
  0x88   :  { %1751 = vmatpush1.bf16.msra.mxu1 %v3207_v43  ;;  %v134_v43 = vsub.s32 5, %v3879_v15 }
  0x89   :  { %1752 = vmatprep.subr.bf16.mxu1 %v3208_v44 }
  0x8a   :  { %1780 = vmatpush1.bf16.msra.mxu0 %v3180_v41  ;;  %v3247_v41 = vld [vmem:[#allocation7 + $0x28] ss:$16 sps:$4 sm:$0xff]  }
  0x8b   :  { %1781 = vmatprep.subr.bf16.mxu0 %v3188_v42 }
  0x8c   :  { %1753 = vmatpush1.bf16.msra.mxu1 %v3213_v47 }
  0x8d   :  { %1754 = vmatprep.subr.bf16.mxu1 %v3214_v48 }
  0x8e   :  { %1782 = vmatpush1.bf16.msra.mxu0 %v3186_v45  ;;  %v3255_v45 = vld [vmem:[#allocation7 + $0x4c] ss:$16 sps:$4 sm:$0xff]  }
  0x8f   :  { %1783 = vmatprep.subr.bf16.mxu0 %v3194_v46 }
  0x90   :  { %1755 = vmatpush1.bf16.msra.mxu1 %v3219_v51  ;;  %v3253_v51 = vld [vmem:[#allocation7 + $0x48] ss:$16 sps:$4 sm:$0xff]  }
  0x91   :  { %1756 = vmatprep.subr.bf16.mxu1 %v3220_v52  ;;  %v135_v52 = vrot.slane %v3887_v17, %v134_v43  ;;  %v3307_v43 = vld [vmem:[#allocation7 + $0x168] ss:$16 sps:$4 sm:$0xff]  }
  0x92   :  { %1784 = vmatpush1.bf16.msra.mxu0 %v3192_v49 }
  0x93   :  { %1785 = vmatprep.subr.bf16.mxu0 %v3200_v50  ;;  %v3250_v50 = vld [vmem:[#allocation7 + $0x400] ss:$16 sps:$4 sm:$0xff]  }
  0x94   :  { %1757 = vmatpush1.bf16.msra.mxu1 %v3225_v55 }
  0x95   :  { %1758 = vmatprep.subr.bf16.mxu1 %v3226_v63 }
  0x96   :  { %1786 = vmatpush1.bf16.msra.mxu0 %v3198_v53  ;;  %v3258_v53 = vld [vmem:[#allocation7 + $0x424] ss:$16 sps:$4 sm:$0xff]  }
  0x97   :  { %1787 = vmatprep.subr.bf16.mxu0 %v3206_v54  ;;  %v3261_v54 = vld [vmem:[#allocation7 + $0x6c] ss:$16 sps:$4 sm:$0xff]  }
  0x98   :  { %1759 = vmatpush1.bf16.msra.mxu1 %v3231_v3  ;;  %v3265_v3 = vld [vmem:[#allocation7 + $0x88] ss:$16 sps:$4 sm:$0xff]  }
  0x99   :  { %1760 = vmatprep.subr.bf16.mxu1 %v3232_v4 }
  0x9a   :  { %1788 = vmatpush1.bf16.msra.mxu0 %v3204_v56 }
  0x9b   :  { %1789 = vmatprep.subr.bf16.mxu0 %v3212_v57  ;;  %v3256_v57 = vld [vmem:[#allocation7 + $0x420] ss:$16 sps:$4 sm:$0xff]  }
  0x9c   :  { %1761 = vmatpush1.bf16.msra.mxu1 %v3237_v7 }
  0x9d   :  { %1894 = vmatprep.subr.bf16.mxu1 %v3243_v9  ;;  %v3268_v9 = vld [vmem:[#allocation7 + $0x460] ss:$16 sps:$4 sm:$0xff]  }
  0x9e   :  { %1790 = vmatpush1.bf16.msra.mxu0 %v3210_v58  ;;  %v3259_v58 = vld [vmem:[#allocation7 + $0x68] ss:$16 sps:$4 sm:$0xff]  }
  0x9f   :  { %1791 = vmatprep.subr.bf16.mxu0 %v3218_v59 }
  0xa2   :  { %1792 = vmatpush1.bf16.msra.mxu0 %v3216_v60 }
  0xa3   :  { %1793 = vmatprep.subr.bf16.mxu0 %v3224_v61  ;;  %v3264_v61 = vld [vmem:[#allocation7 + $0x444] ss:$16 sps:$4 sm:$0xff]  }
  0xa6   :  { %1794 = vmatpush1.bf16.msra.mxu0 %v3222_v62  ;;  %v3267_v62 = vld [vmem:[#allocation7 + $0x8c] ss:$16 sps:$4 sm:$0xff]  }
  0xa7   :  { %1795 = vmatprep.subr.bf16.mxu0 %v3230_v1 }
  0xaa   :  { %1796 = vmatpush1.bf16.msra.mxu0 %v3228_v2  ;;  %v3262_v2 = vld [vmem:[#allocation7 + $0x440] ss:$16 sps:$4 sm:$0xff]  }
  0xab   :  { %1797 = vmatprep.subr.bf16.mxu0 %v3236_v5  ;;  %v3270_v5 = vld [vmem:[#allocation7 + $0x464] ss:$16 sps:$4 sm:$0xff]  }
  0xae   :  { %1798 = vmatpush1.bf16.msra.mxu0 %v3234_v6  ;;  %v3273_v6 = vld [vmem:[#allocation7 + $0xac] ss:$16 sps:$4 sm:$0xff]  }
  0xaf   :  { %1799 = vmatprep.subr.bf16.mxu0 %v3240_v8 }
  0xb2   :  { %1800 = vmatpush1.bf16.msra.mxu0 %v3238_v10  ;;  %v3271_v10 = vld [vmem:[#allocation7 + $0xa8] ss:$16 sps:$4 sm:$0xff]  }
  0xb3   :  { %1801 = vmatprep.subr.bf16.mxu0 %v3246_v11 }
  0xb6   :  { %1802 = vmatpush1.bf16.msra.mxu0 %v3244_v12  ;;  %v3276_v12 = vld [vmem:[#allocation7 + $0x484] ss:$16 sps:$4 sm:$0xff]  }
  0xb7   :  { %1812 = vmatprep.subr.bf16.mxu0 %v3252_v13  ;;  %v3279_v13 = vld [vmem:[#allocation7 + $0xcc] ss:$16 sps:$4 sm:$0xff]  }
 0x134   :  { %v221_v21 = vpop.f32.mrb[0].mxu0 }
 0x135   :  { %v222_v22 = vadd.f32 %v221_v21, %v115_v19  ;;  %v223_v23 = vpop.f32.mrb[1].mxu0  ;;  %v3274_v19 = vld [vmem:[#allocation7 + $0x480] ss:$16 sps:$4 sm:$0xff]   ;;  %v3282_v21 = vld [vmem:[#allocation7 + $0x4a4] ss:$16 sps:$4 sm:$0xff]  }
 0x136   :  { %v224_v25 = vadd.f32 %v223_v23, %v119_v20  ;;  %v225_v26 = vpop.f32.mrb[2].mxu0  ;;  %v3277_v20 = vld [vmem:[#allocation7 + $0xc8] ss:$16 sps:$4 sm:$0xff]   ;;  %v3280_v23 = vld [vmem:[#allocation7 + $0x4a0] ss:$16 sps:$4 sm:$0xff]  }
 0x137   :  { %v350_v28 = vmax.f32 %v222_v22, 0.0  ;;  %v226_v29 = vpop.f32.mrb[3].mxu0  ;;  %v3285_v22 = vld [vmem:[#allocation7 + $0xec] ss:$16 sps:$4 sm:$0xff]   ;;  %v3288_v26 = vld [vmem:[#allocation7 + $0x4c4] ss:$16 sps:$4 sm:$0xff]  }
 0x138   :  { %v351_v30 = vmax.f32 %v224_v25, 0.0  ;;  %v3283_v25 = vld [vmem:[#allocation7 + $0xe8] ss:$16 sps:$4 sm:$0xff]   ;;  %v3286_v29 = vld [vmem:[#allocation7 + $0x4c0] ss:$16 sps:$4 sm:$0xff]  }
 0x139   :  { %v3904_v35 = vpack.c.bf16 %v350_v28, %v350_v28  ;;  %v3291_v28 = vld [vmem:[#allocation7 + $0x10c] ss:$16 sps:$4 sm:$0xff]  }
 0x13a   :  { %v358_v32 = vpack.c.bf16 %v351_v30, %v351_v30  ;;  %v3289_v30 = vld [vmem:[#allocation7 + $0x108] ss:$16 sps:$4 sm:$0xff]  }
 0x13c   :  { %v262_v37 = vpop.f32.mrb[4].mxu0  ;;  %1762 = vmatprep.mubr.bf16.mxu1 %v358_v32 }
 0x13d   :  { %v263_v38 = vadd.f32 %v262_v37, %v123_v31  ;;  %v264_v39 = vpop.f32.mrb[5].mxu0  ;;  %1763 = vmatmul.mubr.bf16.vlgmr.msra.gmra.mrb[0].mxu1 %v3904_v35  ;;  %v3294_v31 = vld [vmem:[#allocation7 + $0x4e4] ss:$16 sps:$4 sm:$0xff]   ;;  %v3303_v37 = vld [vmem:[#allocation7 + $0x14c] ss:$16 sps:$4 sm:$0xff]  }
 0x13e   :  { %v265_v40 = vadd.f32 %v264_v39, %v127_v34  ;;  %1895 = vmatpush1.bf16.msra.mxu1 %v3241_v33  ;;  %1926 = vmatprep.mubr.bf16.mxu1 %v358_v32  ;;  %v266_v42 = vpop.f32.mrb[6].mxu0  ;;  %v3297_v32 = vld [vmem:[#allocation7 + $0x12c] ss:$16 sps:$4 sm:$0xff]   ;;  %v3292_v33 = vld [vmem:[#allocation7 + $0x4e0] ss:$16 sps:$4 sm:$0xff]  }
 0x13f   :  { %v352_v44 = vmax.f32 %v263_v38, 0.0  ;;  %1896 = vmatprep.subr.bf16.mxu1 %v3249_v36  ;;  %v267_v46 = vpop.f32.mrb[7].mxu0  ;;  %v3295_v34 = vld [vmem:[#allocation7 + $0x128] ss:$16 sps:$4 sm:$0xff]   ;;  %v3300_v36 = vld [vmem:[#allocation7 + $0x504] ss:$16 sps:$4 sm:$0xff]  }
 0x140   :  { %v353_v47 = vmax.f32 %v265_v40, 0.0  ;;  %v3298_v38 = vld [vmem:[#allocation7 + $0x500] ss:$16 sps:$4 sm:$0xff]   ;;  %v3301_v39 = vld [vmem:[#allocation7 + $0x148] ss:$16 sps:$4 sm:$0xff]  }
 0x141   :  { %v3908_v48 = vpack.c.bf16 %v352_v44, %v352_v44  ;;  %v3306_v40 = vld [vmem:[#allocation7 + $0x524] ss:$16 sps:$4 sm:$0xff]   ;;  %v3304_v42 = vld [vmem:[#allocation7 + $0x520] ss:$16 sps:$4 sm:$0xff]  }
 0x142   :  { %v3910_v49 = vpack.c.bf16 %v353_v47, %v353_v47  ;;  %1897 = vmatpush1.bf16.msra.mxu1 %v3247_v41  ;;  %v3309_v41 = vld [vmem:[#allocation7 + $0x16c] ss:$16 sps:$4 sm:$0xff]   ;;  %v3312_v44 = vld [vmem:[#allocation7 + $0x544] ss:$16 sps:$4 sm:$0xff]   ;;  %v3310_v46 = vld [vmem:[#allocation7 + $0x540] ss:$16 sps:$4 sm:$0xff]  }
 0x143   :  { %1898 = vmatprep.subr.bf16.mxu1 %v3255_v45  ;;  %v3315_v45 = vld [vmem:[#allocation7 + $0x18c] ss:$16 sps:$4 sm:$0xff]   ;;  %v3313_v47 = vld [vmem:[#allocation7 + $0x188] ss:$16 sps:$4 sm:$0xff]  }
 0x144   :  { %1803 = vmatprep.mubr.bf16.mxu0 %v3910_v49  ;;  %v3914_v55 = vpop.f32.mrb[8].mxu0 }
 0x145   :  { %1804 = vmatmul.mubr.bf16.vlgmr.msra.gmra.mrb[16].mxu0 %v3908_v48  ;;  %v305_v56 = vpop.f32.mrb[9].mxu0 }
 0x146   :  { %1813 = vmatpush1.bf16.msra.mxu0 %v3250_v50  ;;  %1899 = vmatpush1.bf16.msra.mxu1 %v3253_v51  ;;  %v306_v59 = vadd.f32 %v305_v56, %v135_v52  ;;  %v307_v60 = vpop.f32.mrb[10].mxu0  ;;  %v3318_v50 = vld [vmem:[#allocation7 + $0x564] ss:$16 sps:$4 sm:$0xff]   ;;  %v3321_v51 = vld [vmem:[#allocation7 + $0x1ac] ss:$16 sps:$4 sm:$0xff]  }
 0x147   :  { %1814 = vmatprep.subr.bf16.mxu0 %v3258_v53  ;;  %1900 = vmatprep.subr.bf16.mxu1 %v3261_v54  ;;  %v308_v63 = vpop.f32.mrb[11].mxu0  ;;  %v3316_v52 = vld [vmem:[#allocation7 + $0x560] ss:$16 sps:$4 sm:$0xff]   ;;  %v3319_v53 = vld [vmem:[#allocation7 + $0x1a8] ss:$16 sps:$4 sm:$0xff]  }
 0x148   :  { %v355_v1 = vmax.f32 %v306_v59, 0.0  ;;  %v3324_v54 = vld [vmem:[#allocation7 + $0x584] ss:$16 sps:$4 sm:$0xff]   ;;  %v3327_v56 = vld [vmem:[#allocation7 + $0x1cc] ss:$16 sps:$4 sm:$0xff]  }
 0x149   :  { %v3325_v59 = vld [vmem:[#allocation7 + $0x1c8] ss:$16 sps:$4 sm:$0xff]   ;;  %v3330_v60 = vld [vmem:[#allocation7 + $0x5a4] ss:$16 sps:$4 sm:$0xff]   ;;  %v3328_v63 = vld [vmem:[#allocation7 + $0x5a0] ss:$16 sps:$4 sm:$0xff]  }
 0x14a   :  { %1815 = vmatpush1.bf16.msra.mxu0 %v3256_v57  ;;  %1901 = vmatpush1.bf16.msra.mxu1 %v3259_v58  ;;  %v3917_v4 = vpack.c.bf16 %v355_v1, %v355_v1  ;;  %v130_v57 = vsub.s32 4, %v3879_v15  ;;  %v3322_v58 = vld [vmem:[#allocation7 + $0x580] ss:$16 sps:$4 sm:$0xff]   ;;  %v3331_v1 = vld [vmem:[#allocation7 + $0x1e8] ss:$16 sps:$4 sm:$0xff]  }
 0x14b   :  { %1816 = vmatprep.subr.bf16.mxu0 %v3264_v61  ;;  %1902 = vmatprep.subr.bf16.mxu1 %v3267_v62  ;;  %v3333_v61 = vld [vmem:[#allocation7 + $0x1ec] ss:$16 sps:$4 sm:$0xff]  }
 0x14c   :  { %1844 = vmatprep.mubr.bf16.mxu0 %v3917_v4  ;;  %v3920_v7 = vpop.f32.mrb[12].mxu0  ;;  %v131_v62 = vrot.slane %v3887_v17, %v130_v57  ;;  %v3396_v57 = vld [vmem:[#allocation7 + $0x34c] ss:$16 sps:$4 sm:$0xff]  }
 0x14d   :  { %v3087_v8 = vpop.f32.mrb[13].mxu0 }
 0x14e   :  { %1817 = vmatpush1.bf16.msra.mxu0 %v3262_v2  ;;  %1903 = vmatpush1.bf16.msra.mxu1 %v3265_v3  ;;  %v347_v11 = vpop.f32.mrb[14].mxu0  ;;  %v3336_v2 = vld [vmem:[#allocation7 + $0x5c4] ss:$16 sps:$4 sm:$0xff]   ;;  %v3339_v3 = vld [vmem:[#allocation7 + $0x20c] ss:$16 sps:$4 sm:$0xff]  }
 0x14f   :  { %1818 = vmatprep.subr.bf16.mxu0 %v3270_v5  ;;  %1904 = vmatprep.subr.bf16.mxu1 %v3273_v6  ;;  %v3088_v14 = vpop.f32.mrb[15].mxu0  ;;  %v304_v5 = vadd.f32 %v3914_v55, %v131_v62  ;;  %v3334_v6 = vld [vmem:[#allocation7 + $0x5c0] ss:$16 sps:$4 sm:$0xff]   ;;  %v3337_v8 = vld [vmem:[#allocation7 + $0x208] ss:$16 sps:$4 sm:$0xff]  }
 0x150   :  { %v3348_v14 = vld [vmem:[#allocation7 + $0x604] ss:$16 sps:$4 sm:$0xff]   ;;  %v3351_v55 = vld [vmem:[#allocation7 + $0x24c] ss:$16 sps:$4 sm:$0xff]  }
 0x151   :  { %v354_v11 = vmax.f32 %v304_v5, 0.0  ;;  %v3489_v62 = vld [vmem:[#allocation8 + $0x14] ss:$8 sps:$4 sm:$0xff]   ;;  %v3400_v5 = vld [vmem:[#allocation7 + $0x388] ss:$16 sps:$4 sm:$0xff]  }
 0x152   :  { %1819 = vmatpush1.bf16.msra.mxu0 %v3268_v9  ;;  %1905 = vmatpush1.bf16.msra.mxu1 %v3271_v10  ;;  %v3342_v9 = vld [vmem:[#allocation7 + $0x5e4] ss:$16 sps:$4 sm:$0xff]   ;;  %v3345_v10 = vld [vmem:[#allocation7 + $0x22c] ss:$16 sps:$4 sm:$0xff]  }
 0x153   :  { %1820 = vmatprep.subr.bf16.mxu0 %v3276_v12  ;;  %1906 = vmatprep.subr.bf16.mxu1 %v3279_v13  ;;  %v3340_v12 = vld [vmem:[#allocation7 + $0x5e0] ss:$16 sps:$4 sm:$0xff]   ;;  %v3343_v13 = vld [vmem:[#allocation7 + $0x228] ss:$16 sps:$4 sm:$0xff]  }
 0x156   :  { %1821 = vmatpush1.bf16.msra.mxu0 %v3274_v19  ;;  %1907 = vmatpush1.bf16.msra.mxu1 %v3277_v20  ;;  %v3927_v19 = vpack.c.bf16 %v354_v11, %v354_v11  ;;  %v3346_v20 = vld [vmem:[#allocation7 + $0x600] ss:$16 sps:$4 sm:$0xff]  }
 0x157   :  { %1822 = vmatprep.subr.bf16.mxu0 %v3282_v21  ;;  %1908 = vmatprep.subr.bf16.mxu1 %v3285_v22  ;;  %v3349_v21 = vld [vmem:[#allocation7 + $0x248] ss:$16 sps:$4 sm:$0xff]   ;;  %v3354_v22 = vld [vmem:[#allocation7 + $0x624] ss:$16 sps:$4 sm:$0xff]  }
 0x158   :  { %v3493_v11 = vld [vmem:[#allocation8 + $0x30] ss:$8 sps:$4 sm:$0xff]  }
 0x15a   :  { %1823 = vmatpush1.bf16.msra.mxu0 %v3280_v23  ;;  %1909 = vmatpush1.bf16.msra.mxu1 %v3283_v25  ;;  %v3352_v23 = vld [vmem:[#allocation7 + $0x620] ss:$16 sps:$4 sm:$0xff]   ;;  %v3360_v25 = vld [vmem:[#allocation7 + $0x644] ss:$16 sps:$4 sm:$0xff]  }
 0x15b   :  { %1824 = vmatprep.subr.bf16.mxu0 %v3288_v26  ;;  %1910 = vmatprep.subr.bf16.mxu1 %v3291_v28  ;;  %v3363_v26 = vld [vmem:[#allocation7 + $0x28c] ss:$16 sps:$4 sm:$0xff]   ;;  %v3358_v28 = vld [vmem:[#allocation7 + $0x640] ss:$16 sps:$4 sm:$0xff]  }
 0x15e   :  { %1825 = vmatpush1.bf16.msra.mxu0 %v3286_v29  ;;  %1911 = vmatpush1.bf16.msra.mxu1 %v3289_v30  ;;  %v3361_v29 = vld [vmem:[#allocation7 + $0x288] ss:$16 sps:$4 sm:$0xff]   ;;  %v3366_v30 = vld [vmem:[#allocation7 + $0x664] ss:$16 sps:$4 sm:$0xff]  }
 0x15f   :  { %1826 = vmatprep.subr.bf16.mxu0 %v3294_v31  ;;  %1912 = vmatprep.subr.bf16.mxu1 %v3297_v32  ;;  %v3369_v31 = vld [vmem:[#allocation7 + $0x2ac] ss:$16 sps:$4 sm:$0xff]   ;;  %v3364_v32 = vld [vmem:[#allocation7 + $0x660] ss:$16 sps:$4 sm:$0xff]  }
 0x162   :  { %1827 = vmatpush1.bf16.msra.mxu0 %v3292_v33  ;;  %1913 = vmatpush1.bf16.msra.mxu1 %v3295_v34  ;;  %v3367_v33 = vld [vmem:[#allocation7 + $0x2a8] ss:$16 sps:$4 sm:$0xff]   ;;  %v3372_v34 = vld [vmem:[#allocation7 + $0x684] ss:$16 sps:$4 sm:$0xff]  }
 0x163   :  { %1828 = vmatprep.subr.bf16.mxu0 %v3300_v36  ;;  %1914 = vmatprep.subr.bf16.mxu1 %v3303_v37  ;;  %v3375_v36 = vld [vmem:[#allocation7 + $0x2cc] ss:$16 sps:$4 sm:$0xff]   ;;  %v138_v37 = vsub.s32 6, %v3879_v15 }
 0x164   :  { %v3595_v15 = vld [vmem:[#allocation10 + $0x38] sm:$0xff]  }
 0x166   :  { %1829 = vmatpush1.bf16.msra.mxu0 %v3298_v38  ;;  %1915 = vmatpush1.bf16.msra.mxu1 %v3301_v39  ;;  %v3370_v38 = vld [vmem:[#allocation7 + $0x680] ss:$16 sps:$4 sm:$0xff]   ;;  %v3373_v39 = vld [vmem:[#allocation7 + $0x2c8] ss:$16 sps:$4 sm:$0xff]  }
 0x167   :  { %1830 = vmatprep.subr.bf16.mxu0 %v3306_v40  ;;  %1916 = vmatprep.subr.bf16.mxu1 %v3309_v41  ;;  %v3378_v40 = vld [vmem:[#allocation7 + $0x6a4] ss:$16 sps:$4 sm:$0xff]   ;;  %v3381_v41 = vld [vmem:[#allocation7 + $0x2ec] ss:$16 sps:$4 sm:$0xff]  }
 0x16a   :  { %1831 = vmatpush1.bf16.msra.mxu0 %v3304_v42  ;;  %1917 = vmatpush1.bf16.msra.mxu1 %v3307_v43  ;;  %v139_v42 = vrot.slane %v3887_v17, %v138_v37  ;;  %v3376_v43 = vld [vmem:[#allocation7 + $0x6a0] ss:$16 sps:$4 sm:$0xff]  }
 0x16b   :  { %1832 = vmatprep.subr.bf16.mxu0 %v3312_v44  ;;  %1918 = vmatprep.subr.bf16.mxu1 %v3315_v45  ;;  %v3379_v44 = vld [vmem:[#allocation7 + $0x2e8] ss:$16 sps:$4 sm:$0xff]   ;;  %v3384_v45 = vld [vmem:[#allocation7 + $0x6c4] ss:$16 sps:$4 sm:$0xff]   ;;  %v3388_v17 = vld [vmem:[#allocation7 + $0x6e0] ss:$16 sps:$4 sm:$0xff]  }
 0x16c   :  { %v3508_v37 = vld [vmem:[#allocation8 + $0x80] ss:$8 sps:$4 sm:$0xff]  }
 0x16e   :  { %1833 = vmatpush1.bf16.msra.mxu0 %v3310_v46  ;;  %1919 = vmatpush1.bf16.msra.mxu1 %v3313_v47  ;;  %v3387_v46 = vld [vmem:[#allocation7 + $0x30c] ss:$16 sps:$4 sm:$0xff]   ;;  %v345_v47 = vadd.f32 %v3920_v7, %v139_v42  ;;  %v3394_v7 = vld [vmem:[#allocation7 + $0x348] ss:$16 sps:$4 sm:$0xff]  }
 0x16f   :  { %1834 = vmatprep.subr.bf16.mxu0 %v3318_v50  ;;  %1920 = vmatprep.subr.bf16.mxu1 %v3321_v51  ;;  %v3382_v50 = vld [vmem:[#allocation7 + $0x6c0] ss:$16 sps:$4 sm:$0xff]   ;;  %v3385_v51 = vld [vmem:[#allocation7 + $0x308] ss:$16 sps:$4 sm:$0xff]   ;;  %v3429_v42 = vld [vmem:[#allocation7 + $0x4ac] ss:$16 sps:$4 sm:$0xff]  }
 0x172   :  { %1835 = vmatpush1.bf16.msra.mxu0 %v3316_v52  ;;  %1921 = vmatpush1.bf16.msra.mxu1 %v3319_v53  ;;  %v3390_v52 = vld [vmem:[#allocation7 + $0x6e4] ss:$16 sps:$4 sm:$0xff]   ;;  %v3393_v53 = vld [vmem:[#allocation7 + $0x32c] ss:$16 sps:$4 sm:$0xff]  }
 0x173   :  { %1836 = vmatprep.subr.bf16.mxu0 %v3324_v54  ;;  %1922 = vmatprep.subr.bf16.mxu1 %v3327_v56  ;;  %v356_v54 = vmax.f32 %v345_v47, 0.0  ;;  %v3391_v56 = vld [vmem:[#allocation7 + $0x328] ss:$16 sps:$4 sm:$0xff]  }
 0x174   :  { %v3517_v47 = vld [vmem:[#allocation8 + $0xb0] ss:$8 sps:$4 sm:$0xff]  }
 0x176   :  { %1837 = vmatpush1.bf16.msra.mxu0 %v3322_v58  ;;  %1923 = vmatpush1.bf16.msra.mxu1 %v3325_v59  ;;  %v3486_v58 = vld [vmem:[#allocation8 + $0x4] ss:$8 sps:$4 sm:$0xff]   ;;  %v3934_v59 = vpack.c.bf16 %v356_v54, %v356_v54  ;;  %v3525_v54 = vld [vmem:[#allocation8 + $0xd4] ss:$8 sps:$4 sm:$0xff]  }
 0x177   :  { %1838 = vmatprep.subr.bf16.mxu0 %v3330_v60  ;;  %1924 = vmatprep.subr.bf16.mxu1 %v3333_v61  ;;  %v3484_v60 = vld [vmem:[#allocation8] ss:$8 sps:$4 sm:$0xff]   ;;  %v3399_v61 = vld [vmem:[#allocation7 + $0x36c] ss:$16 sps:$4 sm:$0xff]  }
 0x17a   :  { %1839 = vmatpush1.bf16.msra.mxu0 %v3328_v63  ;;  %1925 = vmatpush1.bf16.msra.mxu1 %v3331_v1  ;;  %v3397_v63 = vld [vmem:[#allocation7 + $0x368] ss:$16 sps:$4 sm:$0xff]  }
 0x17b   :  { %1840 = vmatprep.subr.bf16.mxu0 %v3336_v2  ;;  %1935 = vmatprep.subr.bf16.mxu1 %v3339_v3  ;;  %v3487_v1 = vld [vmem:[#allocation8 + $0x10] ss:$8 sps:$4 sm:$0xff]   ;;  %v3402_v2 = vld [vmem:[#allocation7 + $0x38c] ss:$16 sps:$4 sm:$0xff]  }
 0x17c   :  { %v3492_v3 = vld [vmem:[#allocation8 + $0x24] ss:$8 sps:$4 sm:$0xff]  }
 0x17d   :  { %1927 = vmatmul.mubr.bf16.vlgmr.msra.gmra.mrb[4].mxu1 %v3904_v35  ;;  %v3357_v35 = vld [vmem:[#allocation7 + $0x26c] ss:$16 sps:$4 sm:$0xff]  }
 0x17e   :  { %1841 = vmatpush1.bf16.msra.mxu0 %v3334_v6  ;;  %1936 = vmatpush1.bf16.msra.mxu1 %v3337_v8  ;;  %v3490_v6 = vld [vmem:[#allocation8 + $0x20] ss:$8 sps:$4 sm:$0xff]   ;;  %v3405_v8 = vld [vmem:[#allocation7 + $0x3ac] ss:$16 sps:$4 sm:$0xff]  }
 0x17f   :  { %1967 = vmatprep.mubr.bf16.mxu1 %v3910_v49  ;;  %1842 = vmatprep.subr.bf16.mxu0 %v3342_v9  ;;  %v3355_v49 = vld [vmem:[#allocation7 + $0x268] ss:$16 sps:$4 sm:$0xff]   ;;  %v3495_v9 = vld [vmem:[#allocation8 + $0x34] ss:$8 sps:$4 sm:$0xff]  }
 0x180   :  { %1937 = vmatprep.subr.bf16.mxu1 %v3345_v10  ;;  %v3403_v10 = vld [vmem:[#allocation7 + $0x3a8] ss:$16 sps:$4 sm:$0xff]  }
 0x182   :  { %1843 = vmatpush1.bf16.msra.mxu0 %v3340_v12  ;;  %1938 = vmatpush1.bf16.msra.mxu1 %v3343_v13  ;;  %v3408_v12 = vld [vmem:[#allocation7 + $0x3cc] ss:$16 sps:$4 sm:$0xff]  }
 0x183   :  { %1853 = vmatprep.subr.bf16.mxu0 %v3348_v14  ;;  %1939 = vmatprep.subr.bf16.mxu1 %v3351_v55  ;;  %v3498_v13 = vld [vmem:[#allocation8 + $0x44] ss:$8 sps:$4 sm:$0xff]   ;;  %v3406_v14 = vld [vmem:[#allocation7 + $0x3c8] ss:$16 sps:$4 sm:$0xff]  }
 0x184   :  { %v3496_v55 = vld [vmem:[#allocation8 + $0x40] ss:$8 sps:$4 sm:$0xff]  }
 0x185   :  { %1845 = vmatmul.mubr.bf16.vlgmr.msra.gmra.mrb[16].mxu0 %v3927_v19 }
 0x186   :  { %1854 = vmatpush1.bf16.msra.mxu0 %v3346_v20  ;;  %1940 = vmatpush1.bf16.msra.mxu1 %v3349_v21  ;;  %v3411_v20 = vld [vmem:[#allocation7 + $0x3ec] ss:$16 sps:$4 sm:$0xff]  }
 0x187   :  { %1855 = vmatprep.subr.bf16.mxu0 %v3354_v22  ;;  %1941 = vmatprep.subr.bf16.mxu1 %v3357_v35  ;;  %v3501_v21 = vld [vmem:[#allocation8 + $0x54] ss:$8 sps:$4 sm:$0xff]   ;;  %v3409_v22 = vld [vmem:[#allocation7 + $0x3e8] ss:$16 sps:$4 sm:$0xff]  }
 0x188   :  { %1885 = vmatprep.mubr.bf16.mxu0 %v3751_v0  ;;  %v3499_v35 = vld [vmem:[#allocation8 + $0x50] ss:$8 sps:$4 sm:$0xff]  }
 0x18a   :  { %1856 = vmatpush1.bf16.msra.mxu0 %v3352_v23  ;;  %1942 = vmatpush1.bf16.msra.mxu1 %v3355_v49  ;;  %v3414_v23 = vld [vmem:[#allocation7 + $0x40c] ss:$16 sps:$4 sm:$0xff]  }
 0x18b   :  { %1857 = vmatprep.subr.bf16.mxu0 %v3360_v25  ;;  %1943 = vmatprep.subr.bf16.mxu1 %v3363_v26  ;;  %v3504_v49 = vld [vmem:[#allocation8 + $0x64] ss:$8 sps:$4 sm:$0xff]   ;;  %v3412_v25 = vld [vmem:[#allocation7 + $0x408] ss:$16 sps:$4 sm:$0xff]  }
 0x18c   :  { %v3417_v26 = vld [vmem:[#allocation7 + $0x42c] ss:$16 sps:$4 sm:$0xff]  }
 0x18e   :  { %1858 = vmatpush1.bf16.msra.mxu0 %v3358_v28  ;;  %1944 = vmatpush1.bf16.msra.mxu1 %v3361_v29  ;;  %v3502_v28 = vld [vmem:[#allocation8 + $0x60] ss:$8 sps:$4 sm:$0xff]   ;;  %v3507_v29 = vld [vmem:[#allocation8 + $0x74] ss:$8 sps:$4 sm:$0xff]  }
 0x18f   :  { %1859 = vmatprep.subr.bf16.mxu0 %v3366_v30  ;;  %1945 = vmatprep.subr.bf16.mxu1 %v3369_v31  ;;  %v3415_v30 = vld [vmem:[#allocation7 + $0x428] ss:$16 sps:$4 sm:$0xff]   ;;  %v3420_v31 = vld [vmem:[#allocation7 + $0x44c] ss:$16 sps:$4 sm:$0xff]  }
 0x192   :  { %1860 = vmatpush1.bf16.msra.mxu0 %v3364_v32  ;;  %1946 = vmatpush1.bf16.msra.mxu1 %v3367_v33  ;;  %v3505_v32 = vld [vmem:[#allocation8 + $0x70] ss:$8 sps:$4 sm:$0xff]   ;;  %v3510_v33 = vld [vmem:[#allocation8 + $0x84] ss:$8 sps:$4 sm:$0xff]  }
 0x193   :  { %1861 = vmatprep.subr.bf16.mxu0 %v3372_v34  ;;  %1947 = vmatprep.subr.bf16.mxu1 %v3375_v36  ;;  %v3418_v34 = vld [vmem:[#allocation7 + $0x448] ss:$16 sps:$4 sm:$0xff]   ;;  %v3423_v36 = vld [vmem:[#allocation7 + $0x46c] ss:$16 sps:$4 sm:$0xff]  }
 0x196   :  { %1862 = vmatpush1.bf16.msra.mxu0 %v3370_v38  ;;  %1948 = vmatpush1.bf16.msra.mxu1 %v3373_v39  ;;  %v3513_v38 = vld [vmem:[#allocation8 + $0x94] ss:$8 sps:$4 sm:$0xff]  }
 0x197   :  { %1863 = vmatprep.subr.bf16.mxu0 %v3378_v40  ;;  %1949 = vmatprep.subr.bf16.mxu1 %v3381_v41  ;;  %v3426_v39 = vld [vmem:[#allocation7 + $0x48c] ss:$16 sps:$4 sm:$0xff]   ;;  %v3424_v41 = vld [vmem:[#allocation7 + $0x488] ss:$16 sps:$4 sm:$0xff]  }
 0x198   :  { %v3516_v40 = vld [vmem:[#allocation8 + $0xa4] ss:$8 sps:$4 sm:$0xff]  }
 0x19a   :  { %1864 = vmatpush1.bf16.msra.mxu0 %v3376_v43  ;;  %1950 = vmatpush1.bf16.msra.mxu1 %v3379_v44  ;;  %v3514_v43 = vld [vmem:[#allocation8 + $0xa0] ss:$8 sps:$4 sm:$0xff]   ;;  %v3519_v44 = vld [vmem:[#allocation8 + $0xb4] ss:$8 sps:$4 sm:$0xff]  }
 0x19b   :  { %1865 = vmatprep.subr.bf16.mxu0 %v3384_v45  ;;  %1951 = vmatprep.subr.bf16.mxu1 %v3387_v46  ;;  %v3427_v45 = vld [vmem:[#allocation7 + $0x4a8] ss:$16 sps:$4 sm:$0xff]   ;;  %v3432_v46 = vld [vmem:[#allocation7 + $0x4cc] ss:$16 sps:$4 sm:$0xff]  }
 0x19e   :  { %1866 = vmatpush1.bf16.msra.mxu0 %v3382_v50  ;;  %1952 = vmatpush1.bf16.msra.mxu1 %v3385_v51  ;;  %v3522_v50 = vld [vmem:[#allocation8 + $0xc4] ss:$8 sps:$4 sm:$0xff]   ;;  %v3430_v51 = vld [vmem:[#allocation7 + $0x4c8] ss:$16 sps:$4 sm:$0xff]  }
 0x19f   :  { %1867 = vmatprep.subr.bf16.mxu0 %v3390_v52  ;;  %1953 = vmatprep.subr.bf16.mxu1 %v3393_v53  ;;  %v3435_v52 = vld [vmem:[#allocation7 + $0x4ec] ss:$16 sps:$4 sm:$0xff]   ;;  %v3520_v53 = vld [vmem:[#allocation8 + $0xc0] ss:$8 sps:$4 sm:$0xff]  }
 0x1a2   :  { %1868 = vmatpush1.bf16.msra.mxu0 %v3388_v17  ;;  %1954 = vmatpush1.bf16.msra.mxu1 %v3391_v56  ;;  %v3433_v17 = vld [vmem:[#allocation7 + $0x4e8] ss:$16 sps:$4 sm:$0xff]   ;;  %v3438_v56 = vld [vmem:[#allocation7 + $0x50c] ss:$16 sps:$4 sm:$0xff]  }
 0x1a3   :  { %1955 = vmatprep.subr.bf16.mxu1 %v3396_v57  ;;  %2462 = vmatprep.subr.bf16.mxu0 %v3486_v58  ;;  %v3523_v57 = vld [vmem:[#allocation8 + $0xd0] ss:$8 sps:$4 sm:$0xff]  }
 0x1a4   :  { %v3436_v58 = vld [vmem:[#allocation7 + $0x508] ss:$16 sps:$4 sm:$0xff]  }
 0x1a5   :  { %1886 = vmatmul.mubr.bf16.vlgmr.msra.gmra.mrb[16].mxu0 %v3934_v59 }
 0x1a6   :  { %1956 = vmatpush1.bf16.msra.mxu1 %v3394_v7  ;;  %2463 = vmatpush1.bf16.msra.mxu0 %v3484_v60  ;;  %v3441_v7 = vld [vmem:[#allocation7 + $0x52c] ss:$16 sps:$4 sm:$0xff]   ;;  %v3439_v60 = vld [vmem:[#allocation7 + $0x528] ss:$16 sps:$4 sm:$0xff]  }
 0x1a7   :  { %1957 = vmatprep.subr.bf16.mxu1 %v3399_v61  ;;  %2464 = vmatprep.subr.bf16.mxu0 %v3489_v62  ;;  %v3444_v61 = vld [vmem:[#allocation7 + $0x54c] ss:$16 sps:$4 sm:$0xff]   ;;  %v3442_v62 = vld [vmem:[#allocation7 + $0x548] ss:$16 sps:$4 sm:$0xff]  }
 0x1aa   :  { %1958 = vmatpush1.bf16.msra.mxu1 %v3397_v63  ;;  %2465 = vmatpush1.bf16.msra.mxu0 %v3487_v1  ;;  %v3447_v63 = vld [vmem:[#allocation7 + $0x56c] ss:$16 sps:$4 sm:$0xff]   ;;  %v3445_v1 = vld [vmem:[#allocation7 + $0x568] ss:$16 sps:$4 sm:$0xff]  }
 0x1ab   :  { %1959 = vmatprep.subr.bf16.mxu1 %v3402_v2  ;;  %2466 = vmatprep.subr.bf16.mxu0 %v3492_v3  ;;  %v3450_v2 = vld [vmem:[#allocation7 + $0x58c] ss:$16 sps:$4 sm:$0xff]   ;;  %v3448_v3 = vld [vmem:[#allocation7 + $0x588] ss:$16 sps:$4 sm:$0xff]  }
 0x1ae   :  { %1960 = vmatpush1.bf16.msra.mxu1 %v3400_v5  ;;  %2467 = vmatpush1.bf16.msra.mxu0 %v3490_v6  ;;  %v3453_v5 = vld [vmem:[#allocation7 + $0x5ac] ss:$16 sps:$4 sm:$0xff]   ;;  %v3451_v6 = vld [vmem:[#allocation7 + $0x5a8] ss:$16 sps:$4 sm:$0xff]  }
 0x1af   :  { %1961 = vmatprep.subr.bf16.mxu1 %v3405_v8  ;;  %2468 = vmatprep.subr.bf16.mxu0 %v3495_v9  ;;  %v3456_v8 = vld [vmem:[#allocation7 + $0x5cc] ss:$16 sps:$4 sm:$0xff]   ;;  %v3454_v9 = vld [vmem:[#allocation7 + $0x5c8] ss:$16 sps:$4 sm:$0xff]  }
 0x1b2   :  { %1962 = vmatpush1.bf16.msra.mxu1 %v3403_v10  ;;  %2469 = vmatpush1.bf16.msra.mxu0 %v3493_v11  ;;  %v3459_v10 = vld [vmem:[#allocation7 + $0x5ec] ss:$16 sps:$4 sm:$0xff]   ;;  %v3457_v11 = vld [vmem:[#allocation7 + $0x5e8] ss:$16 sps:$4 sm:$0xff]  }
 0x1b3   :  { %1963 = vmatprep.subr.bf16.mxu1 %v3408_v12  ;;  %2470 = vmatprep.subr.bf16.mxu0 %v3498_v13  ;;  %v3462_v12 = vld [vmem:[#allocation7 + $0x60c] ss:$16 sps:$4 sm:$0xff]  }
 0x1b4   :  { %v3528_v13 = vld [vmem:[#allocation8 + $0xe4] ss:$8 sps:$4 sm:$0xff]  }
 0x1b6   :  { %1964 = vmatpush1.bf16.msra.mxu1 %v3406_v14  ;;  %2471 = vmatpush1.bf16.msra.mxu0 %v3496_v55  ;;  %v3526_v14 = vld [vmem:[#allocation8 + $0xe0] ss:$8 sps:$4 sm:$0xff]  }
 0x1b7   :  { %1965 = vmatprep.subr.bf16.mxu1 %v3411_v20  ;;  %2472 = vmatprep.subr.bf16.mxu0 %v3501_v21  ;;  %v3460_v55 = vld [vmem:[#allocation7 + $0x608] ss:$16 sps:$4 sm:$0xff]   ;;  %v3465_v20 = vld [vmem:[#allocation7 + $0x62c] ss:$16 sps:$4 sm:$0xff]  }
 0x1b8   :  { %v3531_v21 = vld [vmem:[#allocation8 + $0xf4] ss:$8 sps:$4 sm:$0xff]  }
 0x1ba   :  { %1966 = vmatpush1.bf16.msra.mxu1 %v3409_v22  ;;  %2473 = vmatpush1.bf16.msra.mxu0 %v3499_v35  ;;  %v3529_v22 = vld [vmem:[#allocation8 + $0xf0] ss:$8 sps:$4 sm:$0xff]  }
 0x1bb   :  { %1976 = vmatprep.subr.bf16.mxu1 %v3414_v23  ;;  %2474 = vmatprep.subr.bf16.mxu0 %v3504_v49  ;;  %v3463_v35 = vld [vmem:[#allocation7 + $0x628] ss:$16 sps:$4 sm:$0xff]   ;;  %v3468_v23 = vld [vmem:[#allocation7 + $0x64c] ss:$16 sps:$4 sm:$0xff]  }
 0x1bc   :  { %v3534_v49 = vld [vmem:[#allocation8 + $0x104] ss:$8 sps:$4 sm:$0xff]  }
 0x1bd   :  { %1968 = vmatmul.mubr.bf16.vlgmr.msra.gmra.mrb[4].mxu1 %v3908_v48  ;;  %v3421_v48 = vld [vmem:[#allocation7 + $0x468] ss:$16 sps:$4 sm:$0xff]  }
 0x1be   :  { %1977 = vmatpush1.bf16.msra.mxu1 %v3412_v25  ;;  %2008 = vmatprep.mubr.bf16.mxu1 %v3917_v4  ;;  %v3511_v4 = vld [vmem:[#allocation8 + $0x90] ss:$8 sps:$4 sm:$0xff]  }
 0x1bf   :  { %1978 = vmatprep.subr.bf16.mxu1 %v3417_v26  ;;  %2475 = vmatpush1.bf16.msra.mxu0 %v3502_v28  ;;  %v3466_v25 = vld [vmem:[#allocation7 + $0x648] ss:$16 sps:$4 sm:$0xff]   ;;  %v3471_v26 = vld [vmem:[#allocation7 + $0x66c] ss:$16 sps:$4 sm:$0xff]  }
 0x1c0   :  { %2476 = vmatprep.subr.bf16.mxu0 %v3507_v29  ;;  %v3469_v28 = vld [vmem:[#allocation7 + $0x668] ss:$16 sps:$4 sm:$0xff]   ;;  %v3474_v29 = vld [vmem:[#allocation7 + $0x68c] ss:$16 sps:$4 sm:$0xff]  }
 0x1c2   :  { %1979 = vmatpush1.bf16.msra.mxu1 %v3415_v30  ;;  %v3477_v30 = vld [vmem:[#allocation7 + $0x6ac] ss:$16 sps:$4 sm:$0xff]  }
 0x1c3   :  { %1980 = vmatprep.subr.bf16.mxu1 %v3420_v31  ;;  %2477 = vmatpush1.bf16.msra.mxu0 %v3505_v32  ;;  %v3480_v31 = vld [vmem:[#allocation7 + $0x6cc] ss:$16 sps:$4 sm:$0xff]  }
 0x1c4   :  { %2478 = vmatprep.subr.bf16.mxu0 %v3510_v33 }
 0x1c6   :  { %1981 = vmatpush1.bf16.msra.mxu1 %v3418_v34 }
 0x1c7   :  { %1982 = vmatprep.subr.bf16.mxu1 %v3423_v36  ;;  %2479 = vmatpush1.bf16.msra.mxu0 %v3508_v37  ;;  %v3478_v36 = vld [vmem:[#allocation7 + $0x6c8] ss:$16 sps:$4 sm:$0xff]  }
 0x1c8   :  { %2480 = vmatprep.subr.bf16.mxu0 %v3513_v38  ;;  %v3483_v38 = vld [vmem:[#allocation7 + $0x6ec] ss:$16 sps:$4 sm:$0xff]  }
 0x1ca   :  { %1983 = vmatpush1.bf16.msra.mxu1 %v3421_v48  ;;  %v3481_v48 = vld [vmem:[#allocation7 + $0x6e8] ss:$16 sps:$4 sm:$0xff]  }
 0x1cb   :  { %1984 = vmatprep.subr.bf16.mxu1 %v3426_v39  ;;  %2481 = vmatpush1.bf16.msra.mxu0 %v3511_v4  ;;  %v3945_v39 = vld [vmem:[%s3981_s4] sm:$0xf] }
 0x1cc   :  { %2482 = vmatprep.subr.bf16.mxu0 %v3516_v40  ;;  %v593_v4 = vrot.slane %v3945_v39, %v3882_v16  ;;  %v597_v40 = vrot.slane %v3945_v39, %v3890_v18 }
 0x1ce   :  { %1985 = vmatpush1.bf16.msra.mxu1 %v3424_v41 }
 0x1cf   :  { %1986 = vmatprep.subr.bf16.mxu1 %v3429_v42  ;;  %2483 = vmatpush1.bf16.msra.mxu0 %v3514_v43 }
 0x1d0   :  { %2484 = vmatprep.subr.bf16.mxu0 %v3519_v44 }
 0x1d2   :  { %1987 = vmatpush1.bf16.msra.mxu1 %v3427_v45 }
 0x1d3   :  { %1988 = vmatprep.subr.bf16.mxu1 %v3432_v46  ;;  %2485 = vmatpush1.bf16.msra.mxu0 %v3517_v47  ;;  %v3580_v46 = vld [vmem:[#allocation10 + $0x40] sm:$0xff]  }
 0x1d4   :  { %2486 = vmatprep.subr.bf16.mxu0 %v3522_v50  ;;  %v3581_v47 = vld [vmem:[#allocation10] sm:$0xff]   ;;  %v3582_v50 = vld [vmem:[#allocation10 + $0x48] sm:$0xff]  }
 0x1d6   :  { %1989 = vmatpush1.bf16.msra.mxu1 %v3430_v51 }
 0x1d7   :  { %1990 = vmatprep.subr.bf16.mxu1 %v3435_v52  ;;  %2487 = vmatpush1.bf16.msra.mxu0 %v3520_v53 }
 0x1d8   :  { %2488 = vmatprep.subr.bf16.mxu0 %v3525_v54 }
 0x1da   :  { %1991 = vmatpush1.bf16.msra.mxu1 %v3433_v17  ;;  %v3583_v17 = vld [vmem:[#allocation10 + $0x8] sm:$0xff]  }
 0x1db   :  { %1992 = vmatprep.subr.bf16.mxu1 %v3438_v56  ;;  %2489 = vmatpush1.bf16.msra.mxu0 %v3523_v57  ;;  %v3584_v56 = vld [vmem:[#allocation10 + $0x50] sm:$0xff]  }
 0x1dc   :  { %2490 = vmatprep.subr.bf16.mxu0 %v3528_v13  ;;  %v3544_v13 = vld [vmem:[#allocation8 + $0x140] ss:$8 sps:$4 sm:$0xff]  }
 0x1de   :  { %1993 = vmatpush1.bf16.msra.mxu1 %v3436_v58  ;;  %v3532_v58 = vld [vmem:[#allocation8 + $0x100] ss:$8 sps:$4 sm:$0xff]  }
 0x1df   :  { %1994 = vmatprep.subr.bf16.mxu1 %v3441_v7  ;;  %2491 = vmatpush1.bf16.msra.mxu0 %v3526_v14  ;;  %v3549_v14 = vld [vmem:[#allocation8 + $0x154] ss:$8 sps:$4 sm:$0xff]  }
 0x1e0   :  { %2492 = vmatprep.subr.bf16.mxu0 %v3531_v21  ;;  %v3550_v21 = vld [vmem:[#allocation8 + $0x160] ss:$8 sps:$4 sm:$0xff]  }
 0x1e2   :  { %1995 = vmatpush1.bf16.msra.mxu1 %v3439_v60  ;;  %v3537_v60 = vld [vmem:[#allocation8 + $0x114] ss:$8 sps:$4 sm:$0xff]  }
 0x1e3   :  { %1996 = vmatprep.subr.bf16.mxu1 %v3444_v61  ;;  %2493 = vmatpush1.bf16.msra.mxu0 %v3529_v22  ;;  %v3585_v61 = vld [vmem:[#allocation10 + $0x10] sm:$0xff]  }
 0x1e4   :  { %2503 = vmatprep.subr.bf16.mxu0 %v3534_v49  ;;  %v3555_v22 = vld [vmem:[#allocation8 + $0x174] ss:$8 sps:$4 sm:$0xff]   ;;  %v3556_v49 = vld [vmem:[#allocation8 + $0x180] ss:$8 sps:$4 sm:$0xff]  }
 0x1e6   :  { %1997 = vmatpush1.bf16.msra.mxu1 %v3442_v62  ;;  %v3586_v62 = vld [vmem:[#allocation10 + $0x58] sm:$0xff]  }
 0x1e7   :  { %1998 = vmatprep.subr.bf16.mxu1 %v3447_v63  ;;  %v3535_v63 = vld [vmem:[#allocation8 + $0x110] ss:$8 sps:$4 sm:$0xff]  }
 0x1ea   :  { %1999 = vmatpush1.bf16.msra.mxu1 %v3445_v1  ;;  %v3540_v1 = vld [vmem:[#allocation8 + $0x124] ss:$8 sps:$4 sm:$0xff]  }
 0x1eb   :  { %2000 = vmatprep.subr.bf16.mxu1 %v3450_v2  ;;  %v3587_v2 = vld [vmem:[#allocation10 + $0x18] sm:$0xff]  }
 0x1ee   :  { %2001 = vmatpush1.bf16.msra.mxu1 %v3448_v3  ;;  %v3588_v3 = vld [vmem:[#allocation10 + $0x60] sm:$0xff]  }
 0x1ef   :  { %2002 = vmatprep.subr.bf16.mxu1 %v3453_v5  ;;  %v3538_v5 = vld [vmem:[#allocation8 + $0x120] ss:$8 sps:$4 sm:$0xff]  }
 0x1f2   :  { %2003 = vmatpush1.bf16.msra.mxu1 %v3451_v6  ;;  %v3543_v6 = vld [vmem:[#allocation8 + $0x134] ss:$8 sps:$4 sm:$0xff]  }
 0x1f3   :  { %2004 = vmatprep.subr.bf16.mxu1 %v3456_v8  ;;  %v3589_v8 = vld [vmem:[#allocation10 + $0x20] sm:$0xff]  }
 0x1f6   :  { %2005 = vmatpush1.bf16.msra.mxu1 %v3454_v9  ;;  %v3590_v9 = vld [vmem:[#allocation10 + $0x68] sm:$0xff]  }
 0x1f7   :  { %2006 = vmatprep.subr.bf16.mxu1 %v3459_v10  ;;  %v3541_v10 = vld [vmem:[#allocation8 + $0x130] ss:$8 sps:$4 sm:$0xff]  }
 0x1fa   :  { %2007 = vmatpush1.bf16.msra.mxu1 %v3457_v11  ;;  %v3546_v11 = vld [vmem:[#allocation8 + $0x144] ss:$8 sps:$4 sm:$0xff]  }
 0x1fb   :  { %2017 = vmatprep.subr.bf16.mxu1 %v3462_v12  ;;  %v3591_v12 = vld [vmem:[#allocation10 + $0x28] sm:$0xff]  }
 0x1fd   :  { %2009 = vmatmul.mubr.bf16.vlgmr.msra.gmra.mrb[4].mxu1 %v3927_v19  ;;  %v3472_v19 = vld [vmem:[#allocation7 + $0x688] ss:$16 sps:$4 sm:$0xff]  }
 0x1fe   :  { %2018 = vmatpush1.bf16.msra.mxu1 %v3460_v55  ;;  %2049 = vmatprep.mubr.bf16.mxu1 %v3751_v0  ;;  %v3475_v0 = vld [vmem:[#allocation7 + $0x6a8] ss:$16 sps:$4 sm:$0xff]  }
 0x1ff   :  { %2019 = vmatprep.subr.bf16.mxu1 %v3465_v20  ;;  %v3547_v55 = vld [vmem:[#allocation8 + $0x150] ss:$8 sps:$4 sm:$0xff]   ;;  %v3552_v20 = vld [vmem:[#allocation8 + $0x164] ss:$8 sps:$4 sm:$0xff]  }
 0x202   :  { %2020 = vmatpush1.bf16.msra.mxu1 %v3463_v35  ;;  %v3553_v35 = vld [vmem:[#allocation8 + $0x170] ss:$8 sps:$4 sm:$0xff]  }
 0x203   :  { %2021 = vmatprep.subr.bf16.mxu1 %v3468_v23  ;;  %v3558_v23 = vld [vmem:[#allocation8 + $0x184] ss:$8 sps:$4 sm:$0xff]  }
 0x206   :  { %2022 = vmatpush1.bf16.msra.mxu1 %v3466_v25  ;;  %v3561_v25 = vld [vmem:[#allocation8 + $0x194] ss:$8 sps:$4 sm:$0xff]  }
 0x207   :  { %2023 = vmatprep.subr.bf16.mxu1 %v3471_v26  ;;  %v3559_v26 = vld [vmem:[#allocation8 + $0x190] ss:$8 sps:$4 sm:$0xff]  }
 0x20a   :  { %2024 = vmatpush1.bf16.msra.mxu1 %v3469_v28  ;;  %v3564_v28 = vld [vmem:[#allocation8 + $0x1a4] ss:$8 sps:$4 sm:$0xff]  }
 0x20b   :  { %2025 = vmatprep.subr.bf16.mxu1 %v3474_v29  ;;  %v3562_v29 = vld [vmem:[#allocation8 + $0x1a0] ss:$8 sps:$4 sm:$0xff]  }
 0x20e   :  { %2026 = vmatpush1.bf16.msra.mxu1 %v3472_v19  ;;  %v3567_v19 = vld [vmem:[#allocation8 + $0x1b4] ss:$8 sps:$4 sm:$0xff]  }
 0x20f   :  { %2027 = vmatprep.subr.bf16.mxu1 %v3477_v30  ;;  %v3565_v30 = vld [vmem:[#allocation8 + $0x1b0] ss:$8 sps:$4 sm:$0xff]  }
 0x210   :  { %v1764_v32 = vpop.f32.mrb[0].mxu1 }
 0x211   :  { %v1766_v33 = vpop.f32.mrb[1].mxu1  ;;  %v1765_v41 = vadd.f32 %v1764_v32, %v593_v4  ;;  %v3573_v32 = vld [vmem:[#allocation8 + $0x1d4] ss:$8 sps:$4 sm:$0xff]   ;;  %v605_v4 = vrot.slane %v3945_v39, %v126_v27  ;;  %v2130_v27 = vld [vmem:[%s3983_s6] sm:$0x3]  ;;  %s3754_s6 = smov [#allocation11]  }
 0x212   :  { %2028 = vmatpush1.bf16.msra.mxu1 %v3475_v0  ;;  %v1768_v34 = vpop.f32.mrb[2].mxu1  ;;  %v1767_v42 = vadd.f32 %v1766_v33, %v597_v40  ;;  %v3570_v0 = vld [vmem:[#allocation8 + $0x1c4] ss:$8 sps:$4 sm:$0xff]   ;;  %v3571_v33 = vld [vmem:[#allocation8 + $0x1d0] ss:$8 sps:$4 sm:$0xff]   ;;  %s2732_s10 = sshll.u32 %s3754_s6, 4  ;;  %s2733_s10 = int_to_ptr.vmem [resolvable:$true] %s2732_s10 }
 0x213   :  { %v1769_v37 = vpop.f32.mrb[3].mxu1  ;;  %2029 = vmatprep.subr.bf16.mxu1 %v3480_v31  ;;  %v3568_v31 = vld [vmem:[#allocation8 + $0x1c0] ss:$8 sps:$4 sm:$0xff]   ;;  %v3576_v34 = vld [vmem:[#allocation8 + $0x1e4] ss:$8 sps:$4 sm:$0xff]   ;;  %s3708_s13 = scalar_lea.vmem %s2733_s10, 64  ;;  %p3713_p13 = scmp.lt.s32.totalorder %s2733_s10, %s2733_s10 }
 0x214   :  { %v3579_v37 = vld [vmem:[#allocation8 + $0x1f4] ss:$8 sps:$4 sm:$0xff]   ;;  %p3709_p12 = scmp.ne.s32.totalorder %s2733_s10, %s3708_s13  ;;  %p3714_p0 = scmp.lt.s32.totalorder %s3708_s13, %s3708_s13 }
 0x216   :  { %2030 = vmatpush1.bf16.msra.mxu1 %v3478_v36  ;;  %v3574_v36 = vld [vmem:[#allocation8 + $0x1e0] ss:$8 sps:$4 sm:$0xff]   ;;  %p3715_p1 = por %p3714_p0, %p3713_p13 }
 0x217   :  { %2031 = vmatprep.subr.bf16.mxu1 %v3483_v38  ;;  %v3577_v38 = vld [vmem:[#allocation8 + $0x1f0] ss:$8 sps:$4 sm:$0xff]  }
 0x218   :  { %p3716_p2 = pnand %p3715_p1, %p3709_p12 }
 0x21a   :  { %2032 = vmatpush1.bf16.msra.mxu1 %v3481_v48  ;;  %v601_v48 = vrot.slane %v3945_v39, %v122_v24  ;;  %v3594_v24 = vld [vmem:[#allocation10 + $0x78] sm:$0xff]   ;;  %v2135_v39 = vrot.slane %v2130_v27, %v3882_v16 }
 0x21b   :  { %3061 = vmatprep.subr.bf16.mxu1 %v3580_v46 }
 0x21d   :  { %2050 = vmatmul.mubr.bf16.vlgmr.msra.gmra.mrb[4].mxu1 %v3934_v59 }
 0x21e   :  { %3062 = vmatpush3.bf16.msra.mxu1 %v3581_v47 }
 0x21f   :  { %3063 = vmatprep.subr.bf16.mxu1 %v3582_v50 }
 0x222   :  { %3064 = vmatpush3.bf16.msra.mxu1 %v3583_v17 }
 0x223   :  { %3065 = vmatprep.subr.bf16.mxu1 %v3584_v56 }
 0x226   :  { %3066 = vmatpush3.bf16.msra.mxu1 %v3585_v61 }
 0x227   :  { %3067 = vmatprep.subr.bf16.mxu1 %v3586_v62 }
 0x22a   :  { %3068 = vmatpush3.bf16.msra.mxu1 %v3587_v2  ;;  %v3042_v2 = vld [vmem:[%s3985_s8] ss:$0 sm:$0xff] }
 0x22b   :  { %3069 = vmatprep.subr.bf16.mxu1 %v3588_v3 }
 0x22e   :  { %3070 = vmatpush3.bf16.msra.mxu1 %v3589_v8 }
 0x22f   :  { %3071 = vmatprep.subr.bf16.mxu1 %v3590_v9 }
 0x232   :  { %3072 = vmatpush3.bf16.msra.mxu1 %v3591_v12 }
 0x278   :  { %v1887_v43 = vpop.f32.mrb[16].mxu0 }
 0x279   :  { %v3090_v44 = vadd.f32 %v1887_v43, %v1765_v41  ;;  %v1889_v45 = vpop.f32.mrb[17].mxu0 }
 0x27a   :  { %v3092_v59 = vadd.f32 %v1889_v45, %v1767_v42  ;;  %v1891_v51 = vpop.f32.mrb[18].mxu0 }
 0x27b   :  { %v2058_v52 = vmax.f32 %v3090_v44, 0.0  ;;  %v1892_v53 = vpop.f32.mrb[19].mxu0  ;;  %v3592_v51 = vld [vmem:[#allocation10 + $0x70] sm:$0xff]  }
 0x27c   :  { %v2059_v54 = vmax.f32 %v3092_v59, 0.0  ;;  %3073 = vmatprep.subr.bf16.mxu1 %v3592_v51  ;;  %v2139_v53 = vrot.slane %v2130_v27, %v3890_v18 }
 0x27d   :  { %v2062_v7 = vpack.c.bf16 %v2058_v52, %v2058_v52  ;;  %v3593_v52 = vld [vmem:[#allocation10 + $0x30] sm:$0xff]  }
 0x27e   :  { %v2063_v57 = vpack.c.bf16 %v2059_v54, %v2059_v54  ;;  %3074 = vmatpush3.bf16.msra.mxu1 %v3593_v52 }
 0x27f   :  { %3075 = vmatprep.subr.bf16.mxu1 %v3594_v24 }
 0x280   :  { %2494 = vmatprep.mubr.bf16.mxu0 %v2063_v57 }
 0x281   :  { %2495 = vmatmul.mubr.bf16.vlgmr.msra.gmra.mrb[20].mxu0 %v2062_v7 }
 0x282   :  { %2504 = vmatpush1.bf16.msra.mxu0 %v3532_v58  ;;  %3076 = vmatpush3.bf16.msra.mxu1 %v3595_v15 }
 0x283   :  { %2505 = vmatprep.subr.bf16.mxu0 %v3537_v60 }
 0x286   :  { %2506 = vmatpush1.bf16.msra.mxu0 %v3535_v63 }
 0x287   :  { %2507 = vmatprep.subr.bf16.mxu0 %v3540_v1 }
 0x28a   :  { %2508 = vmatpush1.bf16.msra.mxu0 %v3538_v5 }
 0x28b   :  { %2509 = vmatprep.subr.bf16.mxu0 %v3543_v6 }
 0x28e   :  { %2510 = vmatpush1.bf16.msra.mxu0 %v3541_v10 }
 0x28f   :  { %2511 = vmatprep.subr.bf16.mxu0 %v3546_v11 }
 0x292   :  { %2512 = vmatpush1.bf16.msra.mxu0 %v3544_v13 }
 0x293   :  { %2513 = vmatprep.subr.bf16.mxu0 %v3549_v14 }
 0x296   :  { %2514 = vmatpush1.bf16.msra.mxu0 %v3547_v55 }
 0x297   :  { %2515 = vmatprep.subr.bf16.mxu0 %v3552_v20 }
 0x29a   :  { %2516 = vmatpush1.bf16.msra.mxu0 %v3550_v21 }
 0x29b   :  { %2517 = vmatprep.subr.bf16.mxu0 %v3555_v22 }
 0x29e   :  { %2518 = vmatpush1.bf16.msra.mxu0 %v3553_v35 }
 0x29f   :  { %2519 = vmatprep.subr.bf16.mxu0 %v3558_v23 }
 0x2a2   :  { %2520 = vmatpush1.bf16.msra.mxu0 %v3556_v49 }
 0x2a3   :  { %2521 = vmatprep.subr.bf16.mxu0 %v3561_v25 }
 0x2a6   :  { %2522 = vmatpush1.bf16.msra.mxu0 %v3559_v26 }
 0x2a7   :  { %2523 = vmatprep.subr.bf16.mxu0 %v3564_v28 }
 0x2aa   :  { %2524 = vmatpush1.bf16.msra.mxu0 %v3562_v29 }
 0x2ab   :  { %2525 = vmatprep.subr.bf16.mxu0 %v3567_v19 }
 0x2ae   :  { %2526 = vmatpush1.bf16.msra.mxu0 %v3565_v30 }
 0x2af   :  { %2527 = vmatprep.subr.bf16.mxu0 %v3570_v0 }
 0x2b2   :  { %2528 = vmatpush1.bf16.msra.mxu0 %v3568_v31 }
 0x2b3   :  { %2529 = vmatprep.subr.bf16.mxu0 %v3573_v32 }
 0x2b6   :  { %2530 = vmatpush1.bf16.msra.mxu0 %v3571_v33 }
 0x2b7   :  { %2531 = vmatprep.subr.bf16.mxu0 %v3576_v34 }
 0x2ba   :  { %2532 = vmatpush1.bf16.msra.mxu0 %v3574_v36 }
 0x2bb   :  { %2533 = vmatprep.subr.bf16.mxu0 %v3579_v37 }
 0x2be   :  { %2534 = vmatpush1.bf16.msra.mxu0 %v3577_v38 }
 0x2f0   :  { %v2051_v40 = vpop.f32.mrb[4].mxu1 }
 0x2f1   :  { %v3093_v41 = vadd.f32 %v2051_v40, %v601_v48  ;;  %v2053_v42 = vpop.f32.mrb[5].mxu1 }
 0x2f2   :  { %v3094_v43 = vadd.f32 %v2053_v42, %v605_v4  ;;  %v2055_v44 = vpop.f32.mrb[6].mxu1 }
 0x2f3   :  { %v2060_v45 = vmax.f32 %v3093_v41, 0.0  ;;  %v2056_v46 = vpop.f32.mrb[7].mxu1 }
 0x2f4   :  { %v2061_v47 = vmax.f32 %v3094_v43, 0.0 }
 0x2f5   :  { %v2064_v59 = vpack.c.bf16 %v2060_v45, %v2060_v45 }
 0x2f6   :  { %v2065_v50 = vpack.c.bf16 %v2061_v47, %v2061_v47 }
 0x2f8   :  { %2535 = vmatprep.mubr.bf16.mxu0 %v2065_v50 }
 0x2f9   :  { %2536 = vmatmul.mubr.bf16.vlgmr.msra.gmra.mrb[20].mxu0 %v2064_v59 }
 0x3cc   :  { %v2537_v54 = vpop.f32.mrb[20].mxu0 }
 0x3cd   :  { %v3095_v17 = vadd.f32 %v2537_v54, %v2135_v39  ;;  %v2539_v56 = vpop.f32.mrb[21].mxu0 }
 0x3ce   :  { %v3096_v57 = vadd.f32 %v2539_v56, %v2139_v53  ;;  %v2541_v58 = vpop.f32.mrb[22].mxu0 }
 0x3cf   :  { %v2544_v7 = vmax.f32 %v3095_v17, 0.0  ;;  %v2542_v60 = vpop.f32.mrb[23].mxu0 }
 0x3d0   :  { %v2545_v61 = vmax.f32 %v3096_v57, 0.0 }
 0x3d1   :  { %v2546_v63 = vpack.c.bf16 %v2544_v7, %v2544_v7 }
 0x3d2   :  { %v2547_v62 = vpack.c.bf16 %v2545_v61, %v2545_v61 }
 0x3d4   :  { %2715 = vmatprep.mubr.bf16.mxu1 %v2547_v62 }
 0x3d5   :  { %2716 = vmatmul.mubr.bf16.vlgmr.msra.gmra.mrb[8].mxu1 %v2546_v63 }
 0x4a8   :  { %v3077_v1 = vpop.f32.mrb[8].mxu1 }
 0x4a9   :  { %v3078_v16 = vpop.f32.mrb[9].mxu1 }
 0x4aa   :  { %v3079_v3 = vadd.f32 %v3078_v16, %v3077_v1  ;;  %v3080_v18 = vpop.f32.mrb[10].mxu1 }
 0x4ab   :  { %v3081_v5 = vpop.f32.mrb[11].mxu1 }
 0x4ac   :  { %v2718_v6 = vadd.f32 %v3079_v3, %v3042_v2 }
 0x4ae   :  { %3596 = vtanh.f32 %v2718_v6 }
 0x4b8   :  { %v3597_v8 = vpop.eup %3596 }
 0x4b9   :  { %v2724_v9 = vpack.c.bf16 %v3597_v8, %v3597_v8 }
 0x4bb   :  { %2725 = vst [vmem:[#allocation11] sm:$0xf] %v2724_v9 }
 0x4bc   :  { %3719 = shalt.err (!%p3716_p2)
}
 0x4bd   :  { %s3720_s14 = scalar_lea.hbm %s3986_s9, 64 }
 0x4be   :  { %p3721_p3 = scmp.ne.s32.totalorder %s3986_s9, %s3720_s14  ;;  %p3724_p4 = scmp.lt.u32.totalorder %s3720_s14, %s3986_s9 }
 0x4c0   :  { %p3726_p5 = pnand %p3724_p4, %p3721_p3 }
 0x4c2   :  { %3729 = shalt.err (!%p3726_p5)
}
 0x4c3   :  { %2735 = dma.vmem_to_hbm [thread:$0]  %s2733_s10, 64, %s3986_s9, [#allocation4]  }
 0x4c4   :  { %3736 = dma.done.wait [#allocation4], 64  }
 0x4c5   :  { %3737 = vsyncadd [#allocation4], 4294967232 }
 0x4c6   :  { %2739 = vsyncpa [#allocation3], 1 }
 0x4c7   :  { %2740 = vsyncpa [#allocation6], 1 }
 0x4c8   :  { %2741 = vsyncpa [#allocation9], 1 }
 0x4c9   :  { %2742 = vsyncpa [#allocation4], 1 }

// kernel: tpu_custom_call.1
= control target key start
LH: loop header
LB: loop body
LE: loop exit
PB: predicated region body
PF: predicated region fallthrough
CT: control target
= control target key end

     0   :  { %14 = vsyncpa [#allocation3], 0  ;;  %s3977_s0 = inlined_call_operand.hbm [shape: f32[8,16], index: 0, kind: input, shape index: {}]   ;;  %s3978_s1 = inlined_call_operand.hbm [shape: bf16[16,896], index: 1, kind: input, shape index: {}]   ;;  %s3979_s2 = inlined_call_operand.vmem [shape: f32[1,896], index: 2, kind: input, shape index: {}]   ;;  %s3980_s3 = inlined_call_operand.hbm [shape: bf16[896,512], index: 3, kind: input, shape index: {}]   ;;  %s3981_s4 = inlined_call_operand.vmem [shape: f32[1,512], index: 4, kind: input, shape index: {}]   ;;  %s3982_s5 = inlined_call_operand.hbm [shape: bf16[512,256], index: 5, kind: input, shape index: {}]   ;;  %s3983_s6 = inlined_call_operand.vmem [shape: f32[1,256], index: 6, kind: input, shape index: {}]   ;;  %s3984_s7 = inlined_call_operand.hbm [shape: bf16[256,128], index: 7, kind: input, shape index: {}]   ;;  %s3985_s8 = inlined_call_operand.vmem [shape: f32[1,128], index: 8, kind: input, shape index: {}]   ;;  %s3986_s9 = inlined_call_operand.hbm [shape: bf16[8,128], index: 9, kind: output, shape index: {}]  }
   0x1   :  { %15 = vsyncpa [#allocation6], 0 }
   0x2   :  { %16 = vsyncpa [#allocation9], 0 }
   0x3   :  { %17 = vsyncpa [#allocation4], 0  ;;  %s3738_s30 = smov [#allocation5]   ;;  %s3598_s13 = scalar_lea.hbm %s3978_s1, 896 }
   0x4   :  { %s33_s10 = sshll.u32 %s3738_s30, 4  ;;  %p3599_p0 = scmp.ne.s32.totalorder %s3978_s1, %s3598_s13  ;;  %s34_s10 = int_to_ptr.vmem [resolvable:$true] %s33_s10 }
   0x5   :  { %p3602_p1 = scmp.lt.u32.totalorder %s3598_s13, %s3978_s1 }
   0x7   :  { %p3604_p2 = pnand %p3602_p1, %p3599_p0 }
   0x9   :  { %3607 = shalt.err (!%p3604_p2)
}
   0xa   :  { %s3608_s18 = scalar_lea.vmem %s34_s10, 896  ;;  %p3613_p4 = scmp.lt.s32.totalorder %s34_s10, %s34_s10 }
   0xb   :  { %p3609_p3 = scmp.ne.s32.totalorder %s34_s10, %s3608_s18  ;;  %p3614_p5 = scmp.lt.s32.totalorder %s3608_s18, %s3608_s18 }
   0xd   :  { %p3615_p6 = por %p3614_p5, %p3613_p4 }
   0xf   :  { %p3616_p7 = pnand %p3615_p6, %p3609_p3 }
  0x11   :  { %3619 = shalt.err (!%p3616_p7)
}
  0x12   :  { %s3739_s19 = smov 448   ;;  %s3740_s20 = smov 28  }
  0x13   :  { %39 = dma.hbm_to_vmem [thread:$0]  %s3978_s1, 896, %s34_s10, [#allocation6], %s3739_s19, %s3739_s19, %s3740_s20  }
  0x14   :  { %s3741_s23 = smov [#allocation8]   ;;  %s3620_s27 = scalar_lea.hbm %s3982_s5, 8192 }
  0x15   :  { %s61_s24 = sshll.u32 %s3741_s23, 4  ;;  %p3621_p8 = scmp.ne.s32.totalorder %s3982_s5, %s3620_s27  ;;  %s62_s24 = int_to_ptr.vmem [resolvable:$true] %s61_s24 }
  0x16   :  { %p3624_p9 = scmp.lt.u32.totalorder %s3620_s27, %s3982_s5 }
  0x18   :  { %p3626_p10 = pnand %p3624_p9, %p3621_p8 }
  0x1a   :  { %3629 = shalt.err (!%p3626_p10)
}
  0x1b   :  { %s3630_s12 = scalar_lea.vmem %s62_s24, 8192  ;;  %p3635_p12 = scmp.lt.s32.totalorder %s62_s24, %s62_s24 }
  0x1c   :  { %p3631_p11 = scmp.ne.s32.totalorder %s62_s24, %s3630_s12  ;;  %p3636_p13 = scmp.lt.s32.totalorder %s3630_s12, %s3630_s12 }
  0x1e   :  { %p3637_p0 = por %p3636_p13, %p3635_p12 }
  0x20   :  { %p3638_p1 = pnand %p3637_p0, %p3631_p11 }
  0x22   :  { %3641 = shalt.err (!%p3638_p1)
}
  0x23   :  { %s3742_s1 = smov 128   ;;  %s3743_s10 = smov 8  }
  0x24   :  { %67 = dma.hbm_to_vmem [thread:$0]  %s3982_s5, 8192, %s62_s24, [#allocation9], %s3742_s1, %s3742_s1, %s3743_s10  }
  0x25   :  { %s3744_s15 = smov [#allocation2]   ;;  %s3745_s17 = smov [#allocation7]  }
  0x26   :  { %s24_s16 = sshll.u32 %s3744_s15, 4  ;;  %s47_s18 = sshll.u32 %s3745_s17, 4  ;;  %s25_s16 = int_to_ptr.vmem [resolvable:$true] %s24_s16  ;;  %s3829_s18 = int_to_ptr.vmem [resolvable:$true] %s47_s18 }
  0x27   :  { %s3642_s21 = scalar_lea.hbm %s3977_s0, 128 }
  0x28   :  { %p3643_p2 = scmp.ne.s32.totalorder %s3977_s0, %s3642_s21  ;;  %p3646_p3 = scmp.lt.u32.totalorder %s3642_s21, %s3977_s0 }
  0x2a   :  { %p3648_p4 = pnand %p3646_p3, %p3643_p2 }
  0x2c   :  { %3651 = shalt.err (!%p3648_p4)
}
  0x2d   :  { %s3652_s5 = scalar_lea.vmem %s25_s16, 128  ;;  %p3657_p6 = scmp.lt.s32.totalorder %s25_s16, %s25_s16 }
  0x2e   :  { %p3653_p5 = scmp.ne.s32.totalorder %s25_s16, %s3652_s5  ;;  %p3658_p7 = scmp.lt.s32.totalorder %s3652_s5, %s3652_s5 }
  0x30   :  { %p3659_p8 = por %p3658_p7, %p3657_p6 }
  0x32   :  { %p3660_p9 = pnand %p3659_p8, %p3653_p5 }
  0x34   :  { %3663 = shalt.err (!%p3660_p9)
}
  0x35   :  { %27 = dma.hbm_to_vmem [thread:$0]  %s3977_s0, 128, %s25_s16, [#allocation3]  }
  0x36   :  { %s3664_s30 = scalar_lea.hbm %s3980_s3, 28672 }
  0x37   :  { %p3665_p10 = scmp.ne.s32.totalorder %s3980_s3, %s3664_s30  ;;  %p3668_p11 = scmp.lt.u32.totalorder %s3664_s30, %s3980_s3 }
  0x39   :  { %p3670_p12 = pnand %p3668_p11, %p3665_p10 }
  0x3b   :  { %3673 = shalt.err (!%p3670_p12)
}
  0x3c   :  { %s3674_s13 = scalar_lea.vmem %s3829_s18, 28672  ;;  %p3679_p0 = scmp.lt.s32.totalorder %s3829_s18, %s3829_s18 }
  0x3d   :  { %p3675_p13 = scmp.ne.s32.totalorder %s3829_s18, %s3674_s13  ;;  %p3680_p1 = scmp.lt.s32.totalorder %s3674_s13, %s3674_s13 }
  0x3f   :  { %p3681_p2 = por %p3680_p1, %p3679_p0 }
  0x41   :  { %p3682_p3 = pnand %p3681_p2, %p3675_p13 }
  0x43   :  { %3685 = shalt.err (!%p3682_p3)
}
  0x44   :  { %s3746_s0 = smov 256   ;;  %s3747_s14 = smov 16  }
  0x45   :  { %53 = dma.hbm_to_vmem [thread:$0]  %s3980_s3, 28672, %s3829_s18, [#allocation6], %s3746_s0, %s3746_s0, %s3747_s14  }
  0x46   :  { %s3748_s17 = smov [#allocation10]   ;;  %s3686_s22 = scalar_lea.hbm %s3984_s7, 2048 }
  0x47   :  { %s75_s19 = sshll.u32 %s3748_s17, 4  ;;  %p3687_p4 = scmp.ne.s32.totalorder %s3984_s7, %s3686_s22  ;;  %s76_s19 = int_to_ptr.vmem [resolvable:$true] %s75_s19 }
  0x48   :  { %p3690_p5 = scmp.lt.u32.totalorder %s3686_s22, %s3984_s7 }
  0x4a   :  { %p3692_p6 = pnand %p3690_p5, %p3687_p4 }
  0x4c   :  { %3695 = shalt.err (!%p3692_p6)
}
  0x4d   :  { %s3696_s24 = scalar_lea.vmem %s76_s19, 2048  ;;  %p3701_p8 = scmp.lt.s32.totalorder %s76_s19, %s76_s19 }
  0x4e   :  { %p3697_p7 = scmp.ne.s32.totalorder %s76_s19, %s3696_s24  ;;  %p3702_p9 = scmp.lt.s32.totalorder %s3696_s24, %s3696_s24 }
  0x50   :  { %p3703_p10 = por %p3702_p9, %p3701_p8 }
  0x52   :  { %p3704_p11 = pnand %p3703_p10, %p3697_p7 }
  0x54   :  { %3707 = shalt.err (!%p3704_p11)
}
  0x55   :  { %s3749_s3 = smov 64   ;;  %s3750_s18 = smov 4  }
  0x56   :  { %81 = dma.hbm_to_vmem [thread:$0]  %s3984_s7, 2048, %s76_s19, [#allocation9], %s3749_s3, %s3749_s3, %s3750_s18  }
  0x57   :  { %3730 = dma.done.wait [#allocation3], 128  }
  0x58   :  { %3731 = vsyncadd [#allocation3], 4294967168 }
  0x59   :  { %3732 = dma.done.wait [#allocation6], 29568  }
  0x5a   :  { %3733 = vsyncadd [#allocation6], 4294937728 }
  0x5b   :  { %3734 = dma.done.wait [#allocation9], 10240  }
  0x5c   :  { %3735 = vsyncadd [#allocation9], 4294957056  ;;  %v3751_v0 = vmov 0   ;;  %v3138_v1 = vld [vmem:[#allocation5 + $0x4] ss:$28 sps:$4 sm:$0xff]   ;;  %v100_v3 = vld [vmem:[#allocation2] sm:$0xff] }
  0x5d   :  { %219 = vmatprep.mubr.bf16.mxu0 %v3751_v0  ;;  %v3140_v2 = vld [vmem:[#allocation5] ss:$28 sps:$4 sm:$0xff]   ;;  %187 = vmatprep.subr.bf16.mxu0 %v3138_v1  ;;  %v101_v4 = vpack.c.bf16 %v100_v3, %v100_v3  ;;  %v3143_v5 = vld [vmem:[#allocation5 + $0xc] ss:$28 sps:$4 sm:$0xff]   ;;  %vm183_vm0 = vcmask 130048   ;;  %v3752_v16 = vmov 0.0  }
  0x5e   :  { %188 = vmatpush1.bf16.msra.mxu0 %v3140_v2  ;;  %v3141_v6 = vld [vmem:[#allocation5 + $0x8] ss:$28 sps:$4 sm:$0xff]   ;;  %v3146_v7 = vld [vmem:[#allocation5 + $0x14] ss:$28 sps:$4 sm:$0xff]   ;;  %v3148_v8 = vld [vmem:[#allocation7 + $0x4] ss:$16 sps:$4 sm:$0xff]  }
  0x5f   :  { %228 = vmatprep.subr.bf16.mxu0 %v3143_v5  ;;  %v3150_v9 = vld [vmem:[#allocation7] ss:$16 sps:$4 sm:$0xff]   ;;  %v3151_v10 = vld [vmem:[#allocation7 + $0x24] ss:$16 sps:$4 sm:$0xff]   ;;  %1730 = vmatprep.subr.bf16.mxu1 %v3148_v8  ;;  %vm3753_vm1 = vmmov 0  }
  0x60   :  { %1731 = vmatpush1.bf16.msra.mxu1 %v3150_v9  ;;  %v3153_v11 = vld [vmem:[#allocation7 + $0x20] ss:$16 sps:$4 sm:$0xff]   ;;  %v3154_v12 = vld [vmem:[#allocation7 + $0x44] ss:$16 sps:$4 sm:$0xff]   ;;  %v3243_v9 = vld [vmem:[#allocation7 + $0xc] ss:$16 sps:$4 sm:$0xff]  }
  0x61   :  { %2750 = vmatmul.mubr.msk.bf16.vlgmr.msra.gmra.mrb[0].mxu0 %vm183_vm0, %v101_v4  ;;  %1732 = vmatprep.subr.bf16.mxu1 %v3151_v10  ;;  %v3144_v13 = vld [vmem:[#allocation5 + $0x10] ss:$28 sps:$4 sm:$0xff]   ;;  %v3159_v14 = vld [vmem:[#allocation7 + $0x40] ss:$16 sps:$4 sm:$0xff]  }
  0x62   :  { %229 = vmatpush1.bf16.msra.mxu0 %v3141_v6  ;;  %260 = vmatprep.mubr.bf16.mxu0 %v3751_v0  ;;  %v3160_v15 = vld [vmem:[#allocation7 + $0x64] ss:$16 sps:$4 sm:$0xff]   ;;  %v3165_v17 = vld [vmem:[#allocation7 + $0x60] ss:$16 sps:$4 sm:$0xff]  }
  0x63   :  { %269 = vmatprep.subr.bf16.mxu0 %v3146_v7  ;;  %v3166_v18 = vld [vmem:[#allocation7 + $0x84] ss:$16 sps:$4 sm:$0xff]   ;;  %v3147_v19 = vld [vmem:[#allocation5 + $0x18] ss:$28 sps:$4 sm:$0xff]  }
  0x64   :  { %1733 = vmatpush1.bf16.msra.mxu1 %v3153_v11  ;;  %v3158_v20 = vld [vmem:[#allocation7 + $0x204] ss:$16 sps:$4 sm:$0xff]   ;;  %v3171_v21 = vld [vmem:[#allocation7 + $0x80] ss:$16 sps:$4 sm:$0xff]  }
  0x65   :  { %1734 = vmatprep.subr.bf16.mxu1 %v3154_v12  ;;  %v3172_v22 = vld [vmem:[#allocation7 + $0xa4] ss:$16 sps:$4 sm:$0xff]   ;;  %v3177_v23 = vld [vmem:[#allocation7 + $0xa0] ss:$16 sps:$4 sm:$0xff]  }
  0x66   :  { %v3178_v24 = vld [vmem:[#allocation7 + $0xc4] ss:$16 sps:$4 sm:$0xff]   ;;  %v3156_v25 = vld [vmem:[#allocation7 + $0x200] ss:$16 sps:$4 sm:$0xff]  }
  0x67   :  { %v3164_v26 = vld [vmem:[#allocation7 + $0x224] ss:$16 sps:$4 sm:$0xff]   ;;  %v3183_v27 = vld [vmem:[#allocation7 + $0xc0] ss:$16 sps:$4 sm:$0xff]  }
  0x68   :  { %1735 = vmatpush1.bf16.msra.mxu1 %v3159_v14  ;;  %v3184_v28 = vld [vmem:[#allocation7 + $0xe4] ss:$16 sps:$4 sm:$0xff]   ;;  %v3162_v29 = vld [vmem:[#allocation7 + $0x220] ss:$16 sps:$4 sm:$0xff]   ;;  %v112_v14 = vlaneseq }
  0x69   :  { %2751 = vmatmul.mubr.msk.bf16.vlgmr.msra.gmra.mrb[4].mxu0 %vm183_vm0, %v101_v4  ;;  %1736 = vmatprep.subr.bf16.mxu1 %v3160_v15  ;;  %v3170_v30 = vld [vmem:[#allocation7 + $0x244] ss:$16 sps:$4 sm:$0xff]   ;;  %v3189_v31 = vld [vmem:[#allocation7 + $0xe0] ss:$16 sps:$4 sm:$0xff]  }
  0x6a   :  { %270 = vmatpush1.bf16.msra.mxu0 %v3144_v13  ;;  %301 = vmatprep.mubr.bf16.mxu0 %v3751_v0  ;;  %v3190_v32 = vld [vmem:[#allocation7 + $0x104] ss:$16 sps:$4 sm:$0xff]   ;;  %v3168_v33 = vld [vmem:[#allocation7 + $0x240] ss:$16 sps:$4 sm:$0xff]   ;;  %v3879_v15 = vshrl.u32 %v112_v14, 7 }
  0x6b   :  { %3083 = vmatprep.subr.bf16.mxu0 %v3752_v16  ;;  %v3176_v34 = vld [vmem:[#allocation7 + $0x264] ss:$16 sps:$4 sm:$0xff]   ;;  %v3195_v35 = vld [vmem:[#allocation7 + $0x100] ss:$16 sps:$4 sm:$0xff]  }
  0x6c   :  { %1737 = vmatpush1.bf16.msra.mxu1 %v3165_v17  ;;  %v3196_v36 = vld [vmem:[#allocation7 + $0x124] ss:$16 sps:$4 sm:$0xff]   ;;  %v3174_v37 = vld [vmem:[#allocation7 + $0x260] ss:$16 sps:$4 sm:$0xff]  }
  0x6d   :  { %1738 = vmatprep.subr.bf16.mxu1 %v3166_v18  ;;  %v3182_v38 = vld [vmem:[#allocation7 + $0x284] ss:$16 sps:$4 sm:$0xff]   ;;  %v3201_v39 = vld [vmem:[#allocation7 + $0x120] ss:$16 sps:$4 sm:$0xff]   ;;  %v3890_v18 = vsub.s32 1, %v3879_v15 }
  0x6e   :  { %v3202_v40 = vld [vmem:[#allocation7 + $0x144] ss:$16 sps:$4 sm:$0xff]   ;;  %v3180_v41 = vld [vmem:[#allocation7 + $0x280] ss:$16 sps:$4 sm:$0xff]  }
  0x6f   :  { %v3188_v42 = vld [vmem:[#allocation7 + $0x2a4] ss:$16 sps:$4 sm:$0xff]   ;;  %v3207_v43 = vld [vmem:[#allocation7 + $0x140] ss:$16 sps:$4 sm:$0xff]  }
  0x70   :  { %1739 = vmatpush1.bf16.msra.mxu1 %v3171_v21  ;;  %v3208_v44 = vld [vmem:[#allocation7 + $0x164] ss:$16 sps:$4 sm:$0xff]   ;;  %v3186_v45 = vld [vmem:[#allocation7 + $0x2a0] ss:$16 sps:$4 sm:$0xff]  }
  0x71   :  { %2752 = vmatmul.mubr.msk.bf16.vlgmr.msra.gmra.mrb[8].mxu0 %vm183_vm0, %v101_v4  ;;  %1740 = vmatprep.subr.bf16.mxu1 %v3172_v22  ;;  %v3194_v46 = vld [vmem:[#allocation7 + $0x2c4] ss:$16 sps:$4 sm:$0xff]   ;;  %v3213_v47 = vld [vmem:[#allocation7 + $0x160] ss:$16 sps:$4 sm:$0xff]  }
  0x72   :  { %3084 = vmatpush3.bf16.msra.mxu0 %v3147_v19  ;;  %3085 = vmatprep.mubr.msk.bf16.mxu0 %vm3753_vm1, %v3752_v16  ;;  %v3214_v48 = vld [vmem:[#allocation7 + $0x184] ss:$16 sps:$4 sm:$0xff]   ;;  %v3192_v49 = vld [vmem:[#allocation7 + $0x2c0] ss:$16 sps:$4 sm:$0xff]   ;;  %v3882_v16 = vsub.s32 0, %v3879_v15 }
  0x73   :  { %1771 = vmatprep.subr.bf16.mxu0 %v3158_v20  ;;  %v3200_v50 = vld [vmem:[#allocation7 + $0x2e4] ss:$16 sps:$4 sm:$0xff]   ;;  %v3219_v51 = vld [vmem:[#allocation7 + $0x180] ss:$16 sps:$4 sm:$0xff]  }
  0x74   :  { %1741 = vmatpush1.bf16.msra.mxu1 %v3177_v23  ;;  %v3220_v52 = vld [vmem:[#allocation7 + $0x1a4] ss:$16 sps:$4 sm:$0xff]   ;;  %v3198_v53 = vld [vmem:[#allocation7 + $0x2e0] ss:$16 sps:$4 sm:$0xff]  }
  0x75   :  { %1742 = vmatprep.subr.bf16.mxu1 %v3178_v24  ;;  %v3206_v54 = vld [vmem:[#allocation7 + $0x304] ss:$16 sps:$4 sm:$0xff]   ;;  %v3225_v55 = vld [vmem:[#allocation7 + $0x1a0] ss:$16 sps:$4 sm:$0xff]   ;;  %v122_v24 = vsub.s32 2, %v3879_v15 }
  0x76   :  { %v3204_v56 = vld [vmem:[#allocation7 + $0x300] ss:$16 sps:$4 sm:$0xff]   ;;  %v3212_v57 = vld [vmem:[#allocation7 + $0x324] ss:$16 sps:$4 sm:$0xff]  }
  0x77   :  { %v3210_v58 = vld [vmem:[#allocation7 + $0x320] ss:$16 sps:$4 sm:$0xff]   ;;  %v3218_v59 = vld [vmem:[#allocation7 + $0x344] ss:$16 sps:$4 sm:$0xff]  }
  0x78   :  { %1743 = vmatpush1.bf16.msra.mxu1 %v3183_v27  ;;  %v3216_v60 = vld [vmem:[#allocation7 + $0x340] ss:$16 sps:$4 sm:$0xff]   ;;  %v3224_v61 = vld [vmem:[#allocation7 + $0x364] ss:$16 sps:$4 sm:$0xff]   ;;  %v126_v27 = vsub.s32 3, %v3879_v15 }
  0x79   :  { %3086 = vmatmul.mubr.msk.bf16.vlgmr.msra.gmra.mrb[12].mxu0 %vm183_vm0, %v101_v4  ;;  %1744 = vmatprep.subr.bf16.mxu1 %v3184_v28  ;;  %v3222_v62 = vld [vmem:[#allocation7 + $0x360] ss:$16 sps:$4 sm:$0xff]   ;;  %v3226_v63 = vld [vmem:[#allocation7 + $0x1c4] ss:$16 sps:$4 sm:$0xff]  }
  0x7a   :  { %1772 = vmatpush1.bf16.msra.mxu0 %v3156_v25  ;;  %v3230_v1 = vld [vmem:[#allocation7 + $0x384] ss:$16 sps:$4 sm:$0xff]   ;;  %v3228_v2 = vld [vmem:[#allocation7 + $0x380] ss:$16 sps:$4 sm:$0xff]  }
  0x7b   :  { %1773 = vmatprep.subr.bf16.mxu0 %v3164_v26  ;;  %v3231_v3 = vld [vmem:[#allocation7 + $0x1c0] ss:$16 sps:$4 sm:$0xff]   ;;  %v3232_v4 = vld [vmem:[#allocation7 + $0x1e4] ss:$16 sps:$4 sm:$0xff]  }
  0x7c   :  { %1745 = vmatpush1.bf16.msra.mxu1 %v3189_v31  ;;  %v3236_v5 = vld [vmem:[#allocation7 + $0x3a4] ss:$16 sps:$4 sm:$0xff]   ;;  %v3234_v6 = vld [vmem:[#allocation7 + $0x3a0] ss:$16 sps:$4 sm:$0xff]  }
  0x7d   :  { %1746 = vmatprep.subr.bf16.mxu1 %v3190_v32  ;;  %v3237_v7 = vld [vmem:[#allocation7 + $0x1e0] ss:$16 sps:$4 sm:$0xff]   ;;  %v3240_v8 = vld [vmem:[#allocation7 + $0x3c4] ss:$16 sps:$4 sm:$0xff]  }
  0x7e   :  { %1774 = vmatpush1.bf16.msra.mxu0 %v3162_v29  ;;  %v3238_v10 = vld [vmem:[#allocation7 + $0x3c0] ss:$16 sps:$4 sm:$0xff]   ;;  %v3246_v11 = vld [vmem:[#allocation7 + $0x3e4] ss:$16 sps:$4 sm:$0xff]  }
  0x7f   :  { %1775 = vmatprep.subr.bf16.mxu0 %v3170_v30  ;;  %v3244_v12 = vld [vmem:[#allocation7 + $0x3e0] ss:$16 sps:$4 sm:$0xff]   ;;  %v3252_v13 = vld [vmem:[#allocation7 + $0x404] ss:$16 sps:$4 sm:$0xff]  }
  0x80   :  { %1747 = vmatpush1.bf16.msra.mxu1 %v3195_v35  ;;  %v3887_v17 = vld [vmem:[%s3979_s2] sm:$0xff] }
  0x81   :  { %1748 = vmatprep.subr.bf16.mxu1 %v3196_v36  ;;  %v115_v19 = vrot.slane %v3887_v17, %v3882_v16  ;;  %v119_v20 = vrot.slane %v3887_v17, %v3890_v18  ;;  %v123_v31 = vrot.slane %v3887_v17, %v122_v24  ;;  %v3249_v36 = vld [vmem:[#allocation7 + $0x2c] ss:$16 sps:$4 sm:$0xff]  }
  0x82   :  { %1776 = vmatpush1.bf16.msra.mxu0 %v3168_v33  ;;  %v3241_v33 = vld [vmem:[#allocation7 + $0x8] ss:$16 sps:$4 sm:$0xff]  }
  0x83   :  { %1777 = vmatprep.subr.bf16.mxu0 %v3176_v34  ;;  %v127_v34 = vrot.slane %v3887_v17, %v126_v27 }
  0x84   :  { %1749 = vmatpush1.bf16.msra.mxu1 %v3201_v39 }
  0x85   :  { %1750 = vmatprep.subr.bf16.mxu1 %v3202_v40 }
  0x86   :  { %1778 = vmatpush1.bf16.msra.mxu0 %v3174_v37 }
  0x87   :  { %1779 = vmatprep.subr.bf16.mxu0 %v3182_v38 }
  0x88   :  { %1751 = vmatpush1.bf16.msra.mxu1 %v3207_v43  ;;  %v134_v43 = vsub.s32 5, %v3879_v15 }
  0x89   :  { %1752 = vmatprep.subr.bf16.mxu1 %v3208_v44 }
  0x8a   :  { %1780 = vmatpush1.bf16.msra.mxu0 %v3180_v41  ;;  %v3247_v41 = vld [vmem:[#allocation7 + $0x28] ss:$16 sps:$4 sm:$0xff]  }
  0x8b   :  { %1781 = vmatprep.subr.bf16.mxu0 %v3188_v42 }
  0x8c   :  { %1753 = vmatpush1.bf16.msra.mxu1 %v3213_v47 }
  0x8d   :  { %1754 = vmatprep.subr.bf16.mxu1 %v3214_v48 }
  0x8e   :  { %1782 = vmatpush1.bf16.msra.mxu0 %v3186_v45  ;;  %v3255_v45 = vld [vmem:[#allocation7 + $0x4c] ss:$16 sps:$4 sm:$0xff]  }
  0x8f   :  { %1783 = vmatprep.subr.bf16.mxu0 %v3194_v46 }
  0x90   :  { %1755 = vmatpush1.bf16.msra.mxu1 %v3219_v51  ;;  %v3253_v51 = vld [vmem:[#allocation7 + $0x48] ss:$16 sps:$4 sm:$0xff]  }
  0x91   :  { %1756 = vmatprep.subr.bf16.mxu1 %v3220_v52  ;;  %v135_v52 = vrot.slane %v3887_v17, %v134_v43  ;;  %v3307_v43 = vld [vmem:[#allocation7 + $0x168] ss:$16 sps:$4 sm:$0xff]  }
  0x92   :  { %1784 = vmatpush1.bf16.msra.mxu0 %v3192_v49 }
  0x93   :  { %1785 = vmatprep.subr.bf16.mxu0 %v3200_v50  ;;  %v3250_v50 = vld [vmem:[#allocation7 + $0x400] ss:$16 sps:$4 sm:$0xff]  }
  0x94   :  { %1757 = vmatpush1.bf16.msra.mxu1 %v3225_v55 }
  0x95   :  { %1758 = vmatprep.subr.bf16.mxu1 %v3226_v63 }
  0x96   :  { %1786 = vmatpush1.bf16.msra.mxu0 %v3198_v53  ;;  %v3258_v53 = vld [vmem:[#allocation7 + $0x424] ss:$16 sps:$4 sm:$0xff]  }
  0x97   :  { %1787 = vmatprep.subr.bf16.mxu0 %v3206_v54  ;;  %v3261_v54 = vld [vmem:[#allocation7 + $0x6c] ss:$16 sps:$4 sm:$0xff]  }
  0x98   :  { %1759 = vmatpush1.bf16.msra.mxu1 %v3231_v3  ;;  %v3265_v3 = vld [vmem:[#allocation7 + $0x88] ss:$16 sps:$4 sm:$0xff]  }
  0x99   :  { %1760 = vmatprep.subr.bf16.mxu1 %v3232_v4 }
  0x9a   :  { %1788 = vmatpush1.bf16.msra.mxu0 %v3204_v56 }
  0x9b   :  { %1789 = vmatprep.subr.bf16.mxu0 %v3212_v57  ;;  %v3256_v57 = vld [vmem:[#allocation7 + $0x420] ss:$16 sps:$4 sm:$0xff]  }
  0x9c   :  { %1761 = vmatpush1.bf16.msra.mxu1 %v3237_v7 }
  0x9d   :  { %1894 = vmatprep.subr.bf16.mxu1 %v3243_v9  ;;  %v3268_v9 = vld [vmem:[#allocation7 + $0x460] ss:$16 sps:$4 sm:$0xff]  }
  0x9e   :  { %1790 = vmatpush1.bf16.msra.mxu0 %v3210_v58  ;;  %v3259_v58 = vld [vmem:[#allocation7 + $0x68] ss:$16 sps:$4 sm:$0xff]  }
  0x9f   :  { %1791 = vmatprep.subr.bf16.mxu0 %v3218_v59 }
  0xa2   :  { %1792 = vmatpush1.bf16.msra.mxu0 %v3216_v60 }
  0xa3   :  { %1793 = vmatprep.subr.bf16.mxu0 %v3224_v61  ;;  %v3264_v61 = vld [vmem:[#allocation7 + $0x444] ss:$16 sps:$4 sm:$0xff]  }
  0xa6   :  { %1794 = vmatpush1.bf16.msra.mxu0 %v3222_v62  ;;  %v3267_v62 = vld [vmem:[#allocation7 + $0x8c] ss:$16 sps:$4 sm:$0xff]  }
  0xa7   :  { %1795 = vmatprep.subr.bf16.mxu0 %v3230_v1 }
  0xaa   :  { %1796 = vmatpush1.bf16.msra.mxu0 %v3228_v2  ;;  %v3262_v2 = vld [vmem:[#allocation7 + $0x440] ss:$16 sps:$4 sm:$0xff]  }
  0xab   :  { %1797 = vmatprep.subr.bf16.mxu0 %v3236_v5  ;;  %v3270_v5 = vld [vmem:[#allocation7 + $0x464] ss:$16 sps:$4 sm:$0xff]  }
  0xae   :  { %1798 = vmatpush1.bf16.msra.mxu0 %v3234_v6  ;;  %v3273_v6 = vld [vmem:[#allocation7 + $0xac] ss:$16 sps:$4 sm:$0xff]  }
  0xaf   :  { %1799 = vmatprep.subr.bf16.mxu0 %v3240_v8 }
  0xb2   :  { %1800 = vmatpush1.bf16.msra.mxu0 %v3238_v10  ;;  %v3271_v10 = vld [vmem:[#allocation7 + $0xa8] ss:$16 sps:$4 sm:$0xff]  }
  0xb3   :  { %1801 = vmatprep.subr.bf16.mxu0 %v3246_v11 }
  0xb6   :  { %1802 = vmatpush1.bf16.msra.mxu0 %v3244_v12  ;;  %v3276_v12 = vld [vmem:[#allocation7 + $0x484] ss:$16 sps:$4 sm:$0xff]  }
  0xb7   :  { %1812 = vmatprep.subr.bf16.mxu0 %v3252_v13  ;;  %v3279_v13 = vld [vmem:[#allocation7 + $0xcc] ss:$16 sps:$4 sm:$0xff]  }
 0x134   :  { %v221_v21 = vpop.f32.mrb[0].mxu0 }
 0x135   :  { %v222_v22 = vadd.f32 %v221_v21, %v115_v19  ;;  %v223_v23 = vpop.f32.mrb[1].mxu0  ;;  %v3274_v19 = vld [vmem:[#allocation7 + $0x480] ss:$16 sps:$4 sm:$0xff]   ;;  %v3282_v21 = vld [vmem:[#allocation7 + $0x4a4] ss:$16 sps:$4 sm:$0xff]  }
 0x136   :  { %v224_v25 = vadd.f32 %v223_v23, %v119_v20  ;;  %v225_v26 = vpop.f32.mrb[2].mxu0  ;;  %v3277_v20 = vld [vmem:[#allocation7 + $0xc8] ss:$16 sps:$4 sm:$0xff]   ;;  %v3280_v23 = vld [vmem:[#allocation7 + $0x4a0] ss:$16 sps:$4 sm:$0xff]  }
 0x137   :  { %v350_v28 = vmax.f32 %v222_v22, 0.0  ;;  %v226_v29 = vpop.f32.mrb[3].mxu0  ;;  %v3285_v22 = vld [vmem:[#allocation7 + $0xec] ss:$16 sps:$4 sm:$0xff]   ;;  %v3288_v26 = vld [vmem:[#allocation7 + $0x4c4] ss:$16 sps:$4 sm:$0xff]  }
 0x138   :  { %v351_v30 = vmax.f32 %v224_v25, 0.0  ;;  %v3283_v25 = vld [vmem:[#allocation7 + $0xe8] ss:$16 sps:$4 sm:$0xff]   ;;  %v3286_v29 = vld [vmem:[#allocation7 + $0x4c0] ss:$16 sps:$4 sm:$0xff]  }
 0x139   :  { %v3904_v35 = vpack.c.bf16 %v350_v28, %v350_v28  ;;  %v3291_v28 = vld [vmem:[#allocation7 + $0x10c] ss:$16 sps:$4 sm:$0xff]  }
 0x13a   :  { %v358_v32 = vpack.c.bf16 %v351_v30, %v351_v30  ;;  %v3289_v30 = vld [vmem:[#allocation7 + $0x108] ss:$16 sps:$4 sm:$0xff]  }
 0x13c   :  { %v262_v37 = vpop.f32.mrb[4].mxu0  ;;  %1762 = vmatprep.mubr.bf16.mxu1 %v358_v32 }
 0x13d   :  { %v263_v38 = vadd.f32 %v262_v37, %v123_v31  ;;  %v264_v39 = vpop.f32.mrb[5].mxu0  ;;  %1763 = vmatmul.mubr.bf16.vlgmr.msra.gmra.mrb[0].mxu1 %v3904_v35  ;;  %v3294_v31 = vld [vmem:[#allocation7 + $0x4e4] ss:$16 sps:$4 sm:$0xff]   ;;  %v3303_v37 = vld [vmem:[#allocation7 + $0x14c] ss:$16 sps:$4 sm:$0xff]  }
 0x13e   :  { %v265_v40 = vadd.f32 %v264_v39, %v127_v34  ;;  %1895 = vmatpush1.bf16.msra.mxu1 %v3241_v33  ;;  %1926 = vmatprep.mubr.bf16.mxu1 %v358_v32  ;;  %v266_v42 = vpop.f32.mrb[6].mxu0  ;;  %v3297_v32 = vld [vmem:[#allocation7 + $0x12c] ss:$16 sps:$4 sm:$0xff]   ;;  %v3292_v33 = vld [vmem:[#allocation7 + $0x4e0] ss:$16 sps:$4 sm:$0xff]  }
 0x13f   :  { %v352_v44 = vmax.f32 %v263_v38, 0.0  ;;  %1896 = vmatprep.subr.bf16.mxu1 %v3249_v36  ;;  %v267_v46 = vpop.f32.mrb[7].mxu0  ;;  %v3295_v34 = vld [vmem:[#allocation7 + $0x128] ss:$16 sps:$4 sm:$0xff]   ;;  %v3300_v36 = vld [vmem:[#allocation7 + $0x504] ss:$16 sps:$4 sm:$0xff]  }
 0x140   :  { %v353_v47 = vmax.f32 %v265_v40, 0.0  ;;  %v3298_v38 = vld [vmem:[#allocation7 + $0x500] ss:$16 sps:$4 sm:$0xff]   ;;  %v3301_v39 = vld [vmem:[#allocation7 + $0x148] ss:$16 sps:$4 sm:$0xff]  }
 0x141   :  { %v3908_v48 = vpack.c.bf16 %v352_v44, %v352_v44  ;;  %v3306_v40 = vld [vmem:[#allocation7 + $0x524] ss:$16 sps:$4 sm:$0xff]   ;;  %v3304_v42 = vld [vmem:[#allocation7 + $0x520] ss:$16 sps:$4 sm:$0xff]  }
 0x142   :  { %v3910_v49 = vpack.c.bf16 %v353_v47, %v353_v47  ;;  %1897 = vmatpush1.bf16.msra.mxu1 %v3247_v41  ;;  %v3309_v41 = vld [vmem:[#allocation7 + $0x16c] ss:$16 sps:$4 sm:$0xff]   ;;  %v3312_v44 = vld [vmem:[#allocation7 + $0x544] ss:$16 sps:$4 sm:$0xff]   ;;  %v3310_v46 = vld [vmem:[#allocation7 + $0x540] ss:$16 sps:$4 sm:$0xff]  }
 0x143   :  { %1898 = vmatprep.subr.bf16.mxu1 %v3255_v45  ;;  %v3315_v45 = vld [vmem:[#allocation7 + $0x18c] ss:$16 sps:$4 sm:$0xff]   ;;  %v3313_v47 = vld [vmem:[#allocation7 + $0x188] ss:$16 sps:$4 sm:$0xff]  }
 0x144   :  { %1803 = vmatprep.mubr.bf16.mxu0 %v3910_v49  ;;  %v3914_v55 = vpop.f32.mrb[8].mxu0 }
 0x145   :  { %1804 = vmatmul.mubr.bf16.vlgmr.msra.gmra.mrb[16].mxu0 %v3908_v48  ;;  %v305_v56 = vpop.f32.mrb[9].mxu0 }
 0x146   :  { %1813 = vmatpush1.bf16.msra.mxu0 %v3250_v50  ;;  %1899 = vmatpush1.bf16.msra.mxu1 %v3253_v51  ;;  %v306_v59 = vadd.f32 %v305_v56, %v135_v52  ;;  %v307_v60 = vpop.f32.mrb[10].mxu0  ;;  %v3318_v50 = vld [vmem:[#allocation7 + $0x564] ss:$16 sps:$4 sm:$0xff]   ;;  %v3321_v51 = vld [vmem:[#allocation7 + $0x1ac] ss:$16 sps:$4 sm:$0xff]  }
 0x147   :  { %1814 = vmatprep.subr.bf16.mxu0 %v3258_v53  ;;  %1900 = vmatprep.subr.bf16.mxu1 %v3261_v54  ;;  %v308_v63 = vpop.f32.mrb[11].mxu0  ;;  %v3316_v52 = vld [vmem:[#allocation7 + $0x560] ss:$16 sps:$4 sm:$0xff]   ;;  %v3319_v53 = vld [vmem:[#allocation7 + $0x1a8] ss:$16 sps:$4 sm:$0xff]  }
 0x148   :  { %v355_v1 = vmax.f32 %v306_v59, 0.0  ;;  %v3324_v54 = vld [vmem:[#allocation7 + $0x584] ss:$16 sps:$4 sm:$0xff]   ;;  %v3327_v56 = vld [vmem:[#allocation7 + $0x1cc] ss:$16 sps:$4 sm:$0xff]  }
 0x149   :  { %v3325_v59 = vld [vmem:[#allocation7 + $0x1c8] ss:$16 sps:$4 sm:$0xff]   ;;  %v3330_v60 = vld [vmem:[#allocation7 + $0x5a4] ss:$16 sps:$4 sm:$0xff]   ;;  %v3328_v63 = vld [vmem:[#allocation7 + $0x5a0] ss:$16 sps:$4 sm:$0xff]  }
 0x14a   :  { %1815 = vmatpush1.bf16.msra.mxu0 %v3256_v57  ;;  %1901 = vmatpush1.bf16.msra.mxu1 %v3259_v58  ;;  %v3917_v4 = vpack.c.bf16 %v355_v1, %v355_v1  ;;  %v130_v57 = vsub.s32 4, %v3879_v15  ;;  %v3322_v58 = vld [vmem:[#allocation7 + $0x580] ss:$16 sps:$4 sm:$0xff]   ;;  %v3331_v1 = vld [vmem:[#allocation7 + $0x1e8] ss:$16 sps:$4 sm:$0xff]  }
 0x14b   :  { %1816 = vmatprep.subr.bf16.mxu0 %v3264_v61  ;;  %1902 = vmatprep.subr.bf16.mxu1 %v3267_v62  ;;  %v3333_v61 = vld [vmem:[#allocation7 + $0x1ec] ss:$16 sps:$4 sm:$0xff]  }
 0x14c   :  { %1844 = vmatprep.mubr.bf16.mxu0 %v3917_v4  ;;  %v3920_v7 = vpop.f32.mrb[12].mxu0  ;;  %v131_v62 = vrot.slane %v3887_v17, %v130_v57  ;;  %v3396_v57 = vld [vmem:[#allocation7 + $0x34c] ss:$16 sps:$4 sm:$0xff]  }
 0x14d   :  { %v3087_v8 = vpop.f32.mrb[13].mxu0 }
 0x14e   :  { %1817 = vmatpush1.bf16.msra.mxu0 %v3262_v2  ;;  %1903 = vmatpush1.bf16.msra.mxu1 %v3265_v3  ;;  %v347_v11 = vpop.f32.mrb[14].mxu0  ;;  %v3336_v2 = vld [vmem:[#allocation7 + $0x5c4] ss:$16 sps:$4 sm:$0xff]   ;;  %v3339_v3 = vld [vmem:[#allocation7 + $0x20c] ss:$16 sps:$4 sm:$0xff]  }
 0x14f   :  { %1818 = vmatprep.subr.bf16.mxu0 %v3270_v5  ;;  %1904 = vmatprep.subr.bf16.mxu1 %v3273_v6  ;;  %v3088_v14 = vpop.f32.mrb[15].mxu0  ;;  %v304_v5 = vadd.f32 %v3914_v55, %v131_v62  ;;  %v3334_v6 = vld [vmem:[#allocation7 + $0x5c0] ss:$16 sps:$4 sm:$0xff]   ;;  %v3337_v8 = vld [vmem:[#allocation7 + $0x208] ss:$16 sps:$4 sm:$0xff]  }
 0x150   :  { %v3348_v14 = vld [vmem:[#allocation7 + $0x604] ss:$16 sps:$4 sm:$0xff]   ;;  %v3351_v55 = vld [vmem:[#allocation7 + $0x24c] ss:$16 sps:$4 sm:$0xff]  }
 0x151   :  { %v354_v11 = vmax.f32 %v304_v5, 0.0  ;;  %v3489_v62 = vld [vmem:[#allocation8 + $0x14] ss:$8 sps:$4 sm:$0xff]   ;;  %v3400_v5 = vld [vmem:[#allocation7 + $0x388] ss:$16 sps:$4 sm:$0xff]  }
 0x152   :  { %1819 = vmatpush1.bf16.msra.mxu0 %v3268_v9  ;;  %1905 = vmatpush1.bf16.msra.mxu1 %v3271_v10  ;;  %v3342_v9 = vld [vmem:[#allocation7 + $0x5e4] ss:$16 sps:$4 sm:$0xff]   ;;  %v3345_v10 = vld [vmem:[#allocation7 + $0x22c] ss:$16 sps:$4 sm:$0xff]  }
 0x153   :  { %1820 = vmatprep.subr.bf16.mxu0 %v3276_v12  ;;  %1906 = vmatprep.subr.bf16.mxu1 %v3279_v13  ;;  %v3340_v12 = vld [vmem:[#allocation7 + $0x5e0] ss:$16 sps:$4 sm:$0xff]   ;;  %v3343_v13 = vld [vmem:[#allocation7 + $0x228] ss:$16 sps:$4 sm:$0xff]  }
 0x156   :  { %1821 = vmatpush1.bf16.msra.mxu0 %v3274_v19  ;;  %1907 = vmatpush1.bf16.msra.mxu1 %v3277_v20  ;;  %v3927_v19 = vpack.c.bf16 %v354_v11, %v354_v11  ;;  %v3346_v20 = vld [vmem:[#allocation7 + $0x600] ss:$16 sps:$4 sm:$0xff]  }
 0x157   :  { %1822 = vmatprep.subr.bf16.mxu0 %v3282_v21  ;;  %1908 = vmatprep.subr.bf16.mxu1 %v3285_v22  ;;  %v3349_v21 = vld [vmem:[#allocation7 + $0x248] ss:$16 sps:$4 sm:$0xff]   ;;  %v3354_v22 = vld [vmem:[#allocation7 + $0x624] ss:$16 sps:$4 sm:$0xff]  }
 0x158   :  { %v3493_v11 = vld [vmem:[#allocation8 + $0x30] ss:$8 sps:$4 sm:$0xff]  }
 0x15a   :  { %1823 = vmatpush1.bf16.msra.mxu0 %v3280_v23  ;;  %1909 = vmatpush1.bf16.msra.mxu1 %v3283_v25  ;;  %v3352_v23 = vld [vmem:[#allocation7 + $0x620] ss:$16 sps:$4 sm:$0xff]   ;;  %v3360_v25 = vld [vmem:[#allocation7 + $0x644] ss:$16 sps:$4 sm:$0xff]  }
 0x15b   :  { %1824 = vmatprep.subr.bf16.mxu0 %v3288_v26  ;;  %1910 = vmatprep.subr.bf16.mxu1 %v3291_v28  ;;  %v3363_v26 = vld [vmem:[#allocation7 + $0x28c] ss:$16 sps:$4 sm:$0xff]   ;;  %v3358_v28 = vld [vmem:[#allocation7 + $0x640] ss:$16 sps:$4 sm:$0xff]  }
 0x15e   :  { %1825 = vmatpush1.bf16.msra.mxu0 %v3286_v29  ;;  %1911 = vmatpush1.bf16.msra.mxu1 %v3289_v30  ;;  %v3361_v29 = vld [vmem:[#allocation7 + $0x288] ss:$16 sps:$4 sm:$0xff]   ;;  %v3366_v30 = vld [vmem:[#allocation7 + $0x664] ss:$16 sps:$4 sm:$0xff]  }
 0x15f   :  { %1826 = vmatprep.subr.bf16.mxu0 %v3294_v31  ;;  %1912 = vmatprep.subr.bf16.mxu1 %v3297_v32  ;;  %v3369_v31 = vld [vmem:[#allocation7 + $0x2ac] ss:$16 sps:$4 sm:$0xff]   ;;  %v3364_v32 = vld [vmem:[#allocation7 + $0x660] ss:$16 sps:$4 sm:$0xff]  }
 0x162   :  { %1827 = vmatpush1.bf16.msra.mxu0 %v3292_v33  ;;  %1913 = vmatpush1.bf16.msra.mxu1 %v3295_v34  ;;  %v3367_v33 = vld [vmem:[#allocation7 + $0x2a8] ss:$16 sps:$4 sm:$0xff]   ;;  %v3372_v34 = vld [vmem:[#allocation7 + $0x684] ss:$16 sps:$4 sm:$0xff]  }
 0x163   :  { %1828 = vmatprep.subr.bf16.mxu0 %v3300_v36  ;;  %1914 = vmatprep.subr.bf16.mxu1 %v3303_v37  ;;  %v3375_v36 = vld [vmem:[#allocation7 + $0x2cc] ss:$16 sps:$4 sm:$0xff]   ;;  %v138_v37 = vsub.s32 6, %v3879_v15 }
 0x164   :  { %v3595_v15 = vld [vmem:[#allocation10 + $0x38] sm:$0xff]  }
 0x166   :  { %1829 = vmatpush1.bf16.msra.mxu0 %v3298_v38  ;;  %1915 = vmatpush1.bf16.msra.mxu1 %v3301_v39  ;;  %v3370_v38 = vld [vmem:[#allocation7 + $0x680] ss:$16 sps:$4 sm:$0xff]   ;;  %v3373_v39 = vld [vmem:[#allocation7 + $0x2c8] ss:$16 sps:$4 sm:$0xff]  }
 0x167   :  { %1830 = vmatprep.subr.bf16.mxu0 %v3306_v40  ;;  %1916 = vmatprep.subr.bf16.mxu1 %v3309_v41  ;;  %v3378_v40 = vld [vmem:[#allocation7 + $0x6a4] ss:$16 sps:$4 sm:$0xff]   ;;  %v3381_v41 = vld [vmem:[#allocation7 + $0x2ec] ss:$16 sps:$4 sm:$0xff]  }
 0x16a   :  { %1831 = vmatpush1.bf16.msra.mxu0 %v3304_v42  ;;  %1917 = vmatpush1.bf16.msra.mxu1 %v3307_v43  ;;  %v139_v42 = vrot.slane %v3887_v17, %v138_v37  ;;  %v3376_v43 = vld [vmem:[#allocation7 + $0x6a0] ss:$16 sps:$4 sm:$0xff]  }
 0x16b   :  { %1832 = vmatprep.subr.bf16.mxu0 %v3312_v44  ;;  %1918 = vmatprep.subr.bf16.mxu1 %v3315_v45  ;;  %v3379_v44 = vld [vmem:[#allocation7 + $0x2e8] ss:$16 sps:$4 sm:$0xff]   ;;  %v3384_v45 = vld [vmem:[#allocation7 + $0x6c4] ss:$16 sps:$4 sm:$0xff]   ;;  %v3388_v17 = vld [vmem:[#allocation7 + $0x6e0] ss:$16 sps:$4 sm:$0xff]  }
 0x16c   :  { %v3508_v37 = vld [vmem:[#allocation8 + $0x80] ss:$8 sps:$4 sm:$0xff]  }
 0x16e   :  { %1833 = vmatpush1.bf16.msra.mxu0 %v3310_v46  ;;  %1919 = vmatpush1.bf16.msra.mxu1 %v3313_v47  ;;  %v3387_v46 = vld [vmem:[#allocation7 + $0x30c] ss:$16 sps:$4 sm:$0xff]   ;;  %v345_v47 = vadd.f32 %v3920_v7, %v139_v42  ;;  %v3394_v7 = vld [vmem:[#allocation7 + $0x348] ss:$16 sps:$4 sm:$0xff]  }
 0x16f   :  { %1834 = vmatprep.subr.bf16.mxu0 %v3318_v50  ;;  %1920 = vmatprep.subr.bf16.mxu1 %v3321_v51  ;;  %v3382_v50 = vld [vmem:[#allocation7 + $0x6c0] ss:$16 sps:$4 sm:$0xff]   ;;  %v3385_v51 = vld [vmem:[#allocation7 + $0x308] ss:$16 sps:$4 sm:$0xff]   ;;  %v3429_v42 = vld [vmem:[#allocation7 + $0x4ac] ss:$16 sps:$4 sm:$0xff]  }
 0x172   :  { %1835 = vmatpush1.bf16.msra.mxu0 %v3316_v52  ;;  %1921 = vmatpush1.bf16.msra.mxu1 %v3319_v53  ;;  %v3390_v52 = vld [vmem:[#allocation7 + $0x6e4] ss:$16 sps:$4 sm:$0xff]   ;;  %v3393_v53 = vld [vmem:[#allocation7 + $0x32c] ss:$16 sps:$4 sm:$0xff]  }
 0x173   :  { %1836 = vmatprep.subr.bf16.mxu0 %v3324_v54  ;;  %1922 = vmatprep.subr.bf16.mxu1 %v3327_v56  ;;  %v356_v54 = vmax.f32 %v345_v47, 0.0  ;;  %v3391_v56 = vld [vmem:[#allocation7 + $0x328] ss:$16 sps:$4 sm:$0xff]  }
 0x174   :  { %v3517_v47 = vld [vmem:[#allocation8 + $0xb0] ss:$8 sps:$4 sm:$0xff]  }
 0x176   :  { %1837 = vmatpush1.bf16.msra.mxu0 %v3322_v58  ;;  %1923 = vmatpush1.bf16.msra.mxu1 %v3325_v59  ;;  %v3486_v58 = vld [vmem:[#allocation8 + $0x4] ss:$8 sps:$4 sm:$0xff]   ;;  %v3934_v59 = vpack.c.bf16 %v356_v54, %v356_v54  ;;  %v3525_v54 = vld [vmem:[#allocation8 + $0xd4] ss:$8 sps:$4 sm:$0xff]  }
 0x177   :  { %1838 = vmatprep.subr.bf16.mxu0 %v3330_v60  ;;  %1924 = vmatprep.subr.bf16.mxu1 %v3333_v61  ;;  %v3484_v60 = vld [vmem:[#allocation8] ss:$8 sps:$4 sm:$0xff]   ;;  %v3399_v61 = vld [vmem:[#allocation7 + $0x36c] ss:$16 sps:$4 sm:$0xff]  }
 0x17a   :  { %1839 = vmatpush1.bf16.msra.mxu0 %v3328_v63  ;;  %1925 = vmatpush1.bf16.msra.mxu1 %v3331_v1  ;;  %v3397_v63 = vld [vmem:[#allocation7 + $0x368] ss:$16 sps:$4 sm:$0xff]  }
 0x17b   :  { %1840 = vmatprep.subr.bf16.mxu0 %v3336_v2  ;;  %1935 = vmatprep.subr.bf16.mxu1 %v3339_v3  ;;  %v3487_v1 = vld [vmem:[#allocation8 + $0x10] ss:$8 sps:$4 sm:$0xff]   ;;  %v3402_v2 = vld [vmem:[#allocation7 + $0x38c] ss:$16 sps:$4 sm:$0xff]  }
 0x17c   :  { %v3492_v3 = vld [vmem:[#allocation8 + $0x24] ss:$8 sps:$4 sm:$0xff]  }
 0x17d   :  { %1927 = vmatmul.mubr.bf16.vlgmr.msra.gmra.mrb[4].mxu1 %v3904_v35  ;;  %v3357_v35 = vld [vmem:[#allocation7 + $0x26c] ss:$16 sps:$4 sm:$0xff]  }
 0x17e   :  { %1841 = vmatpush1.bf16.msra.mxu0 %v3334_v6  ;;  %1936 = vmatpush1.bf16.msra.mxu1 %v3337_v8  ;;  %v3490_v6 = vld [vmem:[#allocation8 + $0x20] ss:$8 sps:$4 sm:$0xff]   ;;  %v3405_v8 = vld [vmem:[#allocation7 + $0x3ac] ss:$16 sps:$4 sm:$0xff]  }
 0x17f   :  { %1967 = vmatprep.mubr.bf16.mxu1 %v3910_v49  ;;  %1842 = vmatprep.subr.bf16.mxu0 %v3342_v9  ;;  %v3355_v49 = vld [vmem:[#allocation7 + $0x268] ss:$16 sps:$4 sm:$0xff]   ;;  %v3495_v9 = vld [vmem:[#allocation8 + $0x34] ss:$8 sps:$4 sm:$0xff]  }
 0x180   :  { %1937 = vmatprep.subr.bf16.mxu1 %v3345_v10  ;;  %v3403_v10 = vld [vmem:[#allocation7 + $0x3a8] ss:$16 sps:$4 sm:$0xff]  }
 0x182   :  { %1843 = vmatpush1.bf16.msra.mxu0 %v3340_v12  ;;  %1938 = vmatpush1.bf16.msra.mxu1 %v3343_v13  ;;  %v3408_v12 = vld [vmem:[#allocation7 + $0x3cc] ss:$16 sps:$4 sm:$0xff]  }
 0x183   :  { %1853 = vmatprep.subr.bf16.mxu0 %v3348_v14  ;;  %1939 = vmatprep.subr.bf16.mxu1 %v3351_v55  ;;  %v3498_v13 = vld [vmem:[#allocation8 + $0x44] ss:$8 sps:$4 sm:$0xff]   ;;  %v3406_v14 = vld [vmem:[#allocation7 + $0x3c8] ss:$16 sps:$4 sm:$0xff]  }
 0x184   :  { %v3496_v55 = vld [vmem:[#allocation8 + $0x40] ss:$8 sps:$4 sm:$0xff]  }
 0x185   :  { %1845 = vmatmul.mubr.bf16.vlgmr.msra.gmra.mrb[16].mxu0 %v3927_v19 }
 0x186   :  { %1854 = vmatpush1.bf16.msra.mxu0 %v3346_v20  ;;  %1940 = vmatpush1.bf16.msra.mxu1 %v3349_v21  ;;  %v3411_v20 = vld [vmem:[#allocation7 + $0x3ec] ss:$16 sps:$4 sm:$0xff]  }
 0x187   :  { %1855 = vmatprep.subr.bf16.mxu0 %v3354_v22  ;;  %1941 = vmatprep.subr.bf16.mxu1 %v3357_v35  ;;  %v3501_v21 = vld [vmem:[#allocation8 + $0x54] ss:$8 sps:$4 sm:$0xff]   ;;  %v3409_v22 = vld [vmem:[#allocation7 + $0x3e8] ss:$16 sps:$4 sm:$0xff]  }
 0x188   :  { %1885 = vmatprep.mubr.bf16.mxu0 %v3751_v0  ;;  %v3499_v35 = vld [vmem:[#allocation8 + $0x50] ss:$8 sps:$4 sm:$0xff]  }
 0x18a   :  { %1856 = vmatpush1.bf16.msra.mxu0 %v3352_v23  ;;  %1942 = vmatpush1.bf16.msra.mxu1 %v3355_v49  ;;  %v3414_v23 = vld [vmem:[#allocation7 + $0x40c] ss:$16 sps:$4 sm:$0xff]  }
 0x18b   :  { %1857 = vmatprep.subr.bf16.mxu0 %v3360_v25  ;;  %1943 = vmatprep.subr.bf16.mxu1 %v3363_v26  ;;  %v3504_v49 = vld [vmem:[#allocation8 + $0x64] ss:$8 sps:$4 sm:$0xff]   ;;  %v3412_v25 = vld [vmem:[#allocation7 + $0x408] ss:$16 sps:$4 sm:$0xff]  }
 0x18c   :  { %v3417_v26 = vld [vmem:[#allocation7 + $0x42c] ss:$16 sps:$4 sm:$0xff]  }
 0x18e   :  { %1858 = vmatpush1.bf16.msra.mxu0 %v3358_v28  ;;  %1944 = vmatpush1.bf16.msra.mxu1 %v3361_v29  ;;  %v3502_v28 = vld [vmem:[#allocation8 + $0x60] ss:$8 sps:$4 sm:$0xff]   ;;  %v3507_v29 = vld [vmem:[#allocation8 + $0x74] ss:$8 sps:$4 sm:$0xff]  }
 0x18f   :  { %1859 = vmatprep.subr.bf16.mxu0 %v3366_v30  ;;  %1945 = vmatprep.subr.bf16.mxu1 %v3369_v31  ;;  %v3415_v30 = vld [vmem:[#allocation7 + $0x428] ss:$16 sps:$4 sm:$0xff]   ;;  %v3420_v31 = vld [vmem:[#allocation7 + $0x44c] ss:$16 sps:$4 sm:$0xff]  }
 0x192   :  { %1860 = vmatpush1.bf16.msra.mxu0 %v3364_v32  ;;  %1946 = vmatpush1.bf16.msra.mxu1 %v3367_v33  ;;  %v3505_v32 = vld [vmem:[#allocation8 + $0x70] ss:$8 sps:$4 sm:$0xff]   ;;  %v3510_v33 = vld [vmem:[#allocation8 + $0x84] ss:$8 sps:$4 sm:$0xff]  }
 0x193   :  { %1861 = vmatprep.subr.bf16.mxu0 %v3372_v34  ;;  %1947 = vmatprep.subr.bf16.mxu1 %v3375_v36  ;;  %v3418_v34 = vld [vmem:[#allocation7 + $0x448] ss:$16 sps:$4 sm:$0xff]   ;;  %v3423_v36 = vld [vmem:[#allocation7 + $0x46c] ss:$16 sps:$4 sm:$0xff]  }
 0x196   :  { %1862 = vmatpush1.bf16.msra.mxu0 %v3370_v38  ;;  %1948 = vmatpush1.bf16.msra.mxu1 %v3373_v39  ;;  %v3513_v38 = vld [vmem:[#allocation8 + $0x94] ss:$8 sps:$4 sm:$0xff]  }
 0x197   :  { %1863 = vmatprep.subr.bf16.mxu0 %v3378_v40  ;;  %1949 = vmatprep.subr.bf16.mxu1 %v3381_v41  ;;  %v3426_v39 = vld [vmem:[#allocation7 + $0x48c] ss:$16 sps:$4 sm:$0xff]   ;;  %v3424_v41 = vld [vmem:[#allocation7 + $0x488] ss:$16 sps:$4 sm:$0xff]  }
 0x198   :  { %v3516_v40 = vld [vmem:[#allocation8 + $0xa4] ss:$8 sps:$4 sm:$0xff]  }
 0x19a   :  { %1864 = vmatpush1.bf16.msra.mxu0 %v3376_v43  ;;  %1950 = vmatpush1.bf16.msra.mxu1 %v3379_v44  ;;  %v3514_v43 = vld [vmem:[#allocation8 + $0xa0] ss:$8 sps:$4 sm:$0xff]   ;;  %v3519_v44 = vld [vmem:[#allocation8 + $0xb4] ss:$8 sps:$4 sm:$0xff]  }
 0x19b   :  { %1865 = vmatprep.subr.bf16.mxu0 %v3384_v45  ;;  %1951 = vmatprep.subr.bf16.mxu1 %v3387_v46  ;;  %v3427_v45 = vld [vmem:[#allocation7 + $0x4a8] ss:$16 sps:$4 sm:$0xff]   ;;  %v3432_v46 = vld [vmem:[#allocation7 + $0x4cc] ss:$16 sps:$4 sm:$0xff]  }
 0x19e   :  { %1866 = vmatpush1.bf16.msra.mxu0 %v3382_v50  ;;  %1952 = vmatpush1.bf16.msra.mxu1 %v3385_v51  ;;  %v3522_v50 = vld [vmem:[#allocation8 + $0xc4] ss:$8 sps:$4 sm:$0xff]   ;;  %v3430_v51 = vld [vmem:[#allocation7 + $0x4c8] ss:$16 sps:$4 sm:$0xff]  }
 0x19f   :  { %1867 = vmatprep.subr.bf16.mxu0 %v3390_v52  ;;  %1953 = vmatprep.subr.bf16.mxu1 %v3393_v53  ;;  %v3435_v52 = vld [vmem:[#allocation7 + $0x4ec] ss:$16 sps:$4 sm:$0xff]   ;;  %v3520_v53 = vld [vmem:[#allocation8 + $0xc0] ss:$8 sps:$4 sm:$0xff]  }
 0x1a2   :  { %1868 = vmatpush1.bf16.msra.mxu0 %v3388_v17  ;;  %1954 = vmatpush1.bf16.msra.mxu1 %v3391_v56  ;;  %v3433_v17 = vld [vmem:[#allocation7 + $0x4e8] ss:$16 sps:$4 sm:$0xff]   ;;  %v3438_v56 = vld [vmem:[#allocation7 + $0x50c] ss:$16 sps:$4 sm:$0xff]  }
 0x1a3   :  { %1955 = vmatprep.subr.bf16.mxu1 %v3396_v57  ;;  %2462 = vmatprep.subr.bf16.mxu0 %v3486_v58  ;;  %v3523_v57 = vld [vmem:[#allocation8 + $0xd0] ss:$8 sps:$4 sm:$0xff]  }
 0x1a4   :  { %v3436_v58 = vld [vmem:[#allocation7 + $0x508] ss:$16 sps:$4 sm:$0xff]  }
 0x1a5   :  { %1886 = vmatmul.mubr.bf16.vlgmr.msra.gmra.mrb[16].mxu0 %v3934_v59 }
 0x1a6   :  { %1956 = vmatpush1.bf16.msra.mxu1 %v3394_v7  ;;  %2463 = vmatpush1.bf16.msra.mxu0 %v3484_v60  ;;  %v3441_v7 = vld [vmem:[#allocation7 + $0x52c] ss:$16 sps:$4 sm:$0xff]   ;;  %v3439_v60 = vld [vmem:[#allocation7 + $0x528] ss:$16 sps:$4 sm:$0xff]  }
 0x1a7   :  { %1957 = vmatprep.subr.bf16.mxu1 %v3399_v61  ;;  %2464 = vmatprep.subr.bf16.mxu0 %v3489_v62  ;;  %v3444_v61 = vld [vmem:[#allocation7 + $0x54c] ss:$16 sps:$4 sm:$0xff]   ;;  %v3442_v62 = vld [vmem:[#allocation7 + $0x548] ss:$16 sps:$4 sm:$0xff]  }
 0x1aa   :  { %1958 = vmatpush1.bf16.msra.mxu1 %v3397_v63  ;;  %2465 = vmatpush1.bf16.msra.mxu0 %v3487_v1  ;;  %v3447_v63 = vld [vmem:[#allocation7 + $0x56c] ss:$16 sps:$4 sm:$0xff]   ;;  %v3445_v1 = vld [vmem:[#allocation7 + $0x568] ss:$16 sps:$4 sm:$0xff]  }
 0x1ab   :  { %1959 = vmatprep.subr.bf16.mxu1 %v3402_v2  ;;  %2466 = vmatprep.subr.bf16.mxu0 %v3492_v3  ;;  %v3450_v2 = vld [vmem:[#allocation7 + $0x58c] ss:$16 sps:$4 sm:$0xff]   ;;  %v3448_v3 = vld [vmem:[#allocation7 + $0x588] ss:$16 sps:$4 sm:$0xff]  }
 0x1ae   :  { %1960 = vmatpush1.bf16.msra.mxu1 %v3400_v5  ;;  %2467 = vmatpush1.bf16.msra.mxu0 %v3490_v6  ;;  %v3453_v5 = vld [vmem:[#allocation7 + $0x5ac] ss:$16 sps:$4 sm:$0xff]   ;;  %v3451_v6 = vld [vmem:[#allocation7 + $0x5a8] ss:$16 sps:$4 sm:$0xff]  }
 0x1af   :  { %1961 = vmatprep.subr.bf16.mxu1 %v3405_v8  ;;  %2468 = vmatprep.subr.bf16.mxu0 %v3495_v9  ;;  %v3456_v8 = vld [vmem:[#allocation7 + $0x5cc] ss:$16 sps:$4 sm:$0xff]   ;;  %v3454_v9 = vld [vmem:[#allocation7 + $0x5c8] ss:$16 sps:$4 sm:$0xff]  }
 0x1b2   :  { %1962 = vmatpush1.bf16.msra.mxu1 %v3403_v10  ;;  %2469 = vmatpush1.bf16.msra.mxu0 %v3493_v11  ;;  %v3459_v10 = vld [vmem:[#allocation7 + $0x5ec] ss:$16 sps:$4 sm:$0xff]   ;;  %v3457_v11 = vld [vmem:[#allocation7 + $0x5e8] ss:$16 sps:$4 sm:$0xff]  }
 0x1b3   :  { %1963 = vmatprep.subr.bf16.mxu1 %v3408_v12  ;;  %2470 = vmatprep.subr.bf16.mxu0 %v3498_v13  ;;  %v3462_v12 = vld [vmem:[#allocation7 + $0x60c] ss:$16 sps:$4 sm:$0xff]  }
 0x1b4   :  { %v3528_v13 = vld [vmem:[#allocation8 + $0xe4] ss:$8 sps:$4 sm:$0xff]  }
 0x1b6   :  { %1964 = vmatpush1.bf16.msra.mxu1 %v3406_v14  ;;  %2471 = vmatpush1.bf16.msra.mxu0 %v3496_v55  ;;  %v3526_v14 = vld [vmem:[#allocation8 + $0xe0] ss:$8 sps:$4 sm:$0xff]  }
 0x1b7   :  { %1965 = vmatprep.subr.bf16.mxu1 %v3411_v20  ;;  %2472 = vmatprep.subr.bf16.mxu0 %v3501_v21  ;;  %v3460_v55 = vld [vmem:[#allocation7 + $0x608] ss:$16 sps:$4 sm:$0xff]   ;;  %v3465_v20 = vld [vmem:[#allocation7 + $0x62c] ss:$16 sps:$4 sm:$0xff]  }
 0x1b8   :  { %v3531_v21 = vld [vmem:[#allocation8 + $0xf4] ss:$8 sps:$4 sm:$0xff]  }
 0x1ba   :  { %1966 = vmatpush1.bf16.msra.mxu1 %v3409_v22  ;;  %2473 = vmatpush1.bf16.msra.mxu0 %v3499_v35  ;;  %v3529_v22 = vld [vmem:[#allocation8 + $0xf0] ss:$8 sps:$4 sm:$0xff]  }
 0x1bb   :  { %1976 = vmatprep.subr.bf16.mxu1 %v3414_v23  ;;  %2474 = vmatprep.subr.bf16.mxu0 %v3504_v49  ;;  %v3463_v35 = vld [vmem:[#allocation7 + $0x628] ss:$16 sps:$4 sm:$0xff]   ;;  %v3468_v23 = vld [vmem:[#allocation7 + $0x64c] ss:$16 sps:$4 sm:$0xff]  }
 0x1bc   :  { %v3534_v49 = vld [vmem:[#allocation8 + $0x104] ss:$8 sps:$4 sm:$0xff]  }
 0x1bd   :  { %1968 = vmatmul.mubr.bf16.vlgmr.msra.gmra.mrb[4].mxu1 %v3908_v48  ;;  %v3421_v48 = vld [vmem:[#allocation7 + $0x468] ss:$16 sps:$4 sm:$0xff]  }
 0x1be   :  { %1977 = vmatpush1.bf16.msra.mxu1 %v3412_v25  ;;  %2008 = vmatprep.mubr.bf16.mxu1 %v3917_v4  ;;  %v3511_v4 = vld [vmem:[#allocation8 + $0x90] ss:$8 sps:$4 sm:$0xff]  }
 0x1bf   :  { %1978 = vmatprep.subr.bf16.mxu1 %v3417_v26  ;;  %2475 = vmatpush1.bf16.msra.mxu0 %v3502_v28  ;;  %v3466_v25 = vld [vmem:[#allocation7 + $0x648] ss:$16 sps:$4 sm:$0xff]   ;;  %v3471_v26 = vld [vmem:[#allocation7 + $0x66c] ss:$16 sps:$4 sm:$0xff]  }
 0x1c0   :  { %2476 = vmatprep.subr.bf16.mxu0 %v3507_v29  ;;  %v3469_v28 = vld [vmem:[#allocation7 + $0x668] ss:$16 sps:$4 sm:$0xff]   ;;  %v3474_v29 = vld [vmem:[#allocation7 + $0x68c] ss:$16 sps:$4 sm:$0xff]  }
 0x1c2   :  { %1979 = vmatpush1.bf16.msra.mxu1 %v3415_v30  ;;  %v3477_v30 = vld [vmem:[#allocation7 + $0x6ac] ss:$16 sps:$4 sm:$0xff]  }
 0x1c3   :  { %1980 = vmatprep.subr.bf16.mxu1 %v3420_v31  ;;  %2477 = vmatpush1.bf16.msra.mxu0 %v3505_v32  ;;  %v3480_v31 = vld [vmem:[#allocation7 + $0x6cc] ss:$16 sps:$4 sm:$0xff]  }
 0x1c4   :  { %2478 = vmatprep.subr.bf16.mxu0 %v3510_v33 }
 0x1c6   :  { %1981 = vmatpush1.bf16.msra.mxu1 %v3418_v34 }
 0x1c7   :  { %1982 = vmatprep.subr.bf16.mxu1 %v3423_v36  ;;  %2479 = vmatpush1.bf16.msra.mxu0 %v3508_v37  ;;  %v3478_v36 = vld [vmem:[#allocation7 + $0x6c8] ss:$16 sps:$4 sm:$0xff]  }
 0x1c8   :  { %2480 = vmatprep.subr.bf16.mxu0 %v3513_v38  ;;  %v3483_v38 = vld [vmem:[#allocation7 + $0x6ec] ss:$16 sps:$4 sm:$0xff]  }
 0x1ca   :  { %1983 = vmatpush1.bf16.msra.mxu1 %v3421_v48  ;;  %v3481_v48 = vld [vmem:[#allocation7 + $0x6e8] ss:$16 sps:$4 sm:$0xff]  }
 0x1cb   :  { %1984 = vmatprep.subr.bf16.mxu1 %v3426_v39  ;;  %2481 = vmatpush1.bf16.msra.mxu0 %v3511_v4  ;;  %v3945_v39 = vld [vmem:[%s3981_s4] sm:$0xf] }
 0x1cc   :  { %2482 = vmatprep.subr.bf16.mxu0 %v3516_v40  ;;  %v593_v4 = vrot.slane %v3945_v39, %v3882_v16  ;;  %v597_v40 = vrot.slane %v3945_v39, %v3890_v18 }
 0x1ce   :  { %1985 = vmatpush1.bf16.msra.mxu1 %v3424_v41 }
 0x1cf   :  { %1986 = vmatprep.subr.bf16.mxu1 %v3429_v42  ;;  %2483 = vmatpush1.bf16.msra.mxu0 %v3514_v43 }
 0x1d0   :  { %2484 = vmatprep.subr.bf16.mxu0 %v3519_v44 }
 0x1d2   :  { %1987 = vmatpush1.bf16.msra.mxu1 %v3427_v45 }
 0x1d3   :  { %1988 = vmatprep.subr.bf16.mxu1 %v3432_v46  ;;  %2485 = vmatpush1.bf16.msra.mxu0 %v3517_v47  ;;  %v3580_v46 = vld [vmem:[#allocation10 + $0x40] sm:$0xff]  }
 0x1d4   :  { %2486 = vmatprep.subr.bf16.mxu0 %v3522_v50  ;;  %v3581_v47 = vld [vmem:[#allocation10] sm:$0xff]   ;;  %v3582_v50 = vld [vmem:[#allocation10 + $0x48] sm:$0xff]  }
 0x1d6   :  { %1989 = vmatpush1.bf16.msra.mxu1 %v3430_v51 }
 0x1d7   :  { %1990 = vmatprep.subr.bf16.mxu1 %v3435_v52  ;;  %2487 = vmatpush1.bf16.msra.mxu0 %v3520_v53 }
 0x1d8   :  { %2488 = vmatprep.subr.bf16.mxu0 %v3525_v54 }
 0x1da   :  { %1991 = vmatpush1.bf16.msra.mxu1 %v3433_v17  ;;  %v3583_v17 = vld [vmem:[#allocation10 + $0x8] sm:$0xff]  }
 0x1db   :  { %1992 = vmatprep.subr.bf16.mxu1 %v3438_v56  ;;  %2489 = vmatpush1.bf16.msra.mxu0 %v3523_v57  ;;  %v3584_v56 = vld [vmem:[#allocation10 + $0x50] sm:$0xff]  }
 0x1dc   :  { %2490 = vmatprep.subr.bf16.mxu0 %v3528_v13  ;;  %v3544_v13 = vld [vmem:[#allocation8 + $0x140] ss:$8 sps:$4 sm:$0xff]  }
 0x1de   :  { %1993 = vmatpush1.bf16.msra.mxu1 %v3436_v58  ;;  %v3532_v58 = vld [vmem:[#allocation8 + $0x100] ss:$8 sps:$4 sm:$0xff]  }
 0x1df   :  { %1994 = vmatprep.subr.bf16.mxu1 %v3441_v7  ;;  %2491 = vmatpush1.bf16.msra.mxu0 %v3526_v14  ;;  %v3549_v14 = vld [vmem:[#allocation8 + $0x154] ss:$8 sps:$4 sm:$0xff]  }
 0x1e0   :  { %2492 = vmatprep.subr.bf16.mxu0 %v3531_v21  ;;  %v3550_v21 = vld [vmem:[#allocation8 + $0x160] ss:$8 sps:$4 sm:$0xff]  }
 0x1e2   :  { %1995 = vmatpush1.bf16.msra.mxu1 %v3439_v60  ;;  %v3537_v60 = vld [vmem:[#allocation8 + $0x114] ss:$8 sps:$4 sm:$0xff]  }
 0x1e3   :  { %1996 = vmatprep.subr.bf16.mxu1 %v3444_v61  ;;  %2493 = vmatpush1.bf16.msra.mxu0 %v3529_v22  ;;  %v3585_v61 = vld [vmem:[#allocation10 + $0x10] sm:$0xff]  }
 0x1e4   :  { %2503 = vmatprep.subr.bf16.mxu0 %v3534_v49  ;;  %v3555_v22 = vld [vmem:[#allocation8 + $0x174] ss:$8 sps:$4 sm:$0xff]   ;;  %v3556_v49 = vld [vmem:[#allocation8 + $0x180] ss:$8 sps:$4 sm:$0xff]  }
 0x1e6   :  { %1997 = vmatpush1.bf16.msra.mxu1 %v3442_v62  ;;  %v3586_v62 = vld [vmem:[#allocation10 + $0x58] sm:$0xff]  }
 0x1e7   :  { %1998 = vmatprep.subr.bf16.mxu1 %v3447_v63  ;;  %v3535_v63 = vld [vmem:[#allocation8 + $0x110] ss:$8 sps:$4 sm:$0xff]  }
 0x1ea   :  { %1999 = vmatpush1.bf16.msra.mxu1 %v3445_v1  ;;  %v3540_v1 = vld [vmem:[#allocation8 + $0x124] ss:$8 sps:$4 sm:$0xff]  }
 0x1eb   :  { %2000 = vmatprep.subr.bf16.mxu1 %v3450_v2  ;;  %v3587_v2 = vld [vmem:[#allocation10 + $0x18] sm:$0xff]  }
 0x1ee   :  { %2001 = vmatpush1.bf16.msra.mxu1 %v3448_v3  ;;  %v3588_v3 = vld [vmem:[#allocation10 + $0x60] sm:$0xff]  }
 0x1ef   :  { %2002 = vmatprep.subr.bf16.mxu1 %v3453_v5  ;;  %v3538_v5 = vld [vmem:[#allocation8 + $0x120] ss:$8 sps:$4 sm:$0xff]  }
 0x1f2   :  { %2003 = vmatpush1.bf16.msra.mxu1 %v3451_v6  ;;  %v3543_v6 = vld [vmem:[#allocation8 + $0x134] ss:$8 sps:$4 sm:$0xff]  }
 0x1f3   :  { %2004 = vmatprep.subr.bf16.mxu1 %v3456_v8  ;;  %v3589_v8 = vld [vmem:[#allocation10 + $0x20] sm:$0xff]  }
 0x1f6   :  { %2005 = vmatpush1.bf16.msra.mxu1 %v3454_v9  ;;  %v3590_v9 = vld [vmem:[#allocation10 + $0x68] sm:$0xff]  }
 0x1f7   :  { %2006 = vmatprep.subr.bf16.mxu1 %v3459_v10  ;;  %v3541_v10 = vld [vmem:[#allocation8 + $0x130] ss:$8 sps:$4 sm:$0xff]  }
 0x1fa   :  { %2007 = vmatpush1.bf16.msra.mxu1 %v3457_v11  ;;  %v3546_v11 = vld [vmem:[#allocation8 + $0x144] ss:$8 sps:$4 sm:$0xff]  }
 0x1fb   :  { %2017 = vmatprep.subr.bf16.mxu1 %v3462_v12  ;;  %v3591_v12 = vld [vmem:[#allocation10 + $0x28] sm:$0xff]  }
 0x1fd   :  { %2009 = vmatmul.mubr.bf16.vlgmr.msra.gmra.mrb[4].mxu1 %v3927_v19  ;;  %v3472_v19 = vld [vmem:[#allocation7 + $0x688] ss:$16 sps:$4 sm:$0xff]  }
 0x1fe   :  { %2018 = vmatpush1.bf16.msra.mxu1 %v3460_v55  ;;  %2049 = vmatprep.mubr.bf16.mxu1 %v3751_v0  ;;  %v3475_v0 = vld [vmem:[#allocation7 + $0x6a8] ss:$16 sps:$4 sm:$0xff]  }
 0x1ff   :  { %2019 = vmatprep.subr.bf16.mxu1 %v3465_v20  ;;  %v3547_v55 = vld [vmem:[#allocation8 + $0x150] ss:$8 sps:$4 sm:$0xff]   ;;  %v3552_v20 = vld [vmem:[#allocation8 + $0x164] ss:$8 sps:$4 sm:$0xff]  }
 0x202   :  { %2020 = vmatpush1.bf16.msra.mxu1 %v3463_v35  ;;  %v3553_v35 = vld [vmem:[#allocation8 + $0x170] ss:$8 sps:$4 sm:$0xff]  }
 0x203   :  { %2021 = vmatprep.subr.bf16.mxu1 %v3468_v23  ;;  %v3558_v23 = vld [vmem:[#allocation8 + $0x184] ss:$8 sps:$4 sm:$0xff]  }
 0x206   :  { %2022 = vmatpush1.bf16.msra.mxu1 %v3466_v25  ;;  %v3561_v25 = vld [vmem:[#allocation8 + $0x194] ss:$8 sps:$4 sm:$0xff]  }
 0x207   :  { %2023 = vmatprep.subr.bf16.mxu1 %v3471_v26  ;;  %v3559_v26 = vld [vmem:[#allocation8 + $0x190] ss:$8 sps:$4 sm:$0xff]  }
 0x20a   :  { %2024 = vmatpush1.bf16.msra.mxu1 %v3469_v28  ;;  %v3564_v28 = vld [vmem:[#allocation8 + $0x1a4] ss:$8 sps:$4 sm:$0xff]  }
 0x20b   :  { %2025 = vmatprep.subr.bf16.mxu1 %v3474_v29  ;;  %v3562_v29 = vld [vmem:[#allocation8 + $0x1a0] ss:$8 sps:$4 sm:$0xff]  }
 0x20e   :  { %2026 = vmatpush1.bf16.msra.mxu1 %v3472_v19  ;;  %v3567_v19 = vld [vmem:[#allocation8 + $0x1b4] ss:$8 sps:$4 sm:$0xff]  }
 0x20f   :  { %2027 = vmatprep.subr.bf16.mxu1 %v3477_v30  ;;  %v3565_v30 = vld [vmem:[#allocation8 + $0x1b0] ss:$8 sps:$4 sm:$0xff]  }
 0x210   :  { %v1764_v32 = vpop.f32.mrb[0].mxu1 }
 0x211   :  { %v1766_v33 = vpop.f32.mrb[1].mxu1  ;;  %v1765_v41 = vadd.f32 %v1764_v32, %v593_v4  ;;  %v3573_v32 = vld [vmem:[#allocation8 + $0x1d4] ss:$8 sps:$4 sm:$0xff]   ;;  %v605_v4 = vrot.slane %v3945_v39, %v126_v27  ;;  %v2130_v27 = vld [vmem:[%s3983_s6] sm:$0x3]  ;;  %s3754_s6 = smov [#allocation11]  }
 0x212   :  { %2028 = vmatpush1.bf16.msra.mxu1 %v3475_v0  ;;  %v1768_v34 = vpop.f32.mrb[2].mxu1  ;;  %v1767_v42 = vadd.f32 %v1766_v33, %v597_v40  ;;  %v3570_v0 = vld [vmem:[#allocation8 + $0x1c4] ss:$8 sps:$4 sm:$0xff]   ;;  %v3571_v33 = vld [vmem:[#allocation8 + $0x1d0] ss:$8 sps:$4 sm:$0xff]   ;;  %s2732_s10 = sshll.u32 %s3754_s6, 4  ;;  %s2733_s10 = int_to_ptr.vmem [resolvable:$true] %s2732_s10 }
 0x213   :  { %v1769_v37 = vpop.f32.mrb[3].mxu1  ;;  %2029 = vmatprep.subr.bf16.mxu1 %v3480_v31  ;;  %v3568_v31 = vld [vmem:[#allocation8 + $0x1c0] ss:$8 sps:$4 sm:$0xff]   ;;  %v3576_v34 = vld [vmem:[#allocation8 + $0x1e4] ss:$8 sps:$4 sm:$0xff]   ;;  %s3708_s13 = scalar_lea.vmem %s2733_s10, 64  ;;  %p3713_p13 = scmp.lt.s32.totalorder %s2733_s10, %s2733_s10 }
 0x214   :  { %v3579_v37 = vld [vmem:[#allocation8 + $0x1f4] ss:$8 sps:$4 sm:$0xff]   ;;  %p3709_p12 = scmp.ne.s32.totalorder %s2733_s10, %s3708_s13  ;;  %p3714_p0 = scmp.lt.s32.totalorder %s3708_s13, %s3708_s13 }
 0x216   :  { %2030 = vmatpush1.bf16.msra.mxu1 %v3478_v36  ;;  %v3574_v36 = vld [vmem:[#allocation8 + $0x1e0] ss:$8 sps:$4 sm:$0xff]   ;;  %p3715_p1 = por %p3714_p0, %p3713_p13 }
 0x217   :  { %2031 = vmatprep.subr.bf16.mxu1 %v3483_v38  ;;  %v3577_v38 = vld [vmem:[#allocation8 + $0x1f0] ss:$8 sps:$4 sm:$0xff]  }
 0x218   :  { %p3716_p2 = pnand %p3715_p1, %p3709_p12 }
 0x21a   :  { %2032 = vmatpush1.bf16.msra.mxu1 %v3481_v48  ;;  %v601_v48 = vrot.slane %v3945_v39, %v122_v24  ;;  %v3594_v24 = vld [vmem:[#allocation10 + $0x78] sm:$0xff]   ;;  %v2135_v39 = vrot.slane %v2130_v27, %v3882_v16 }
 0x21b   :  { %3061 = vmatprep.subr.bf16.mxu1 %v3580_v46 }
 0x21d   :  { %2050 = vmatmul.mubr.bf16.vlgmr.msra.gmra.mrb[4].mxu1 %v3934_v59 }
 0x21e   :  { %3062 = vmatpush3.bf16.msra.mxu1 %v3581_v47 }
 0x21f   :  { %3063 = vmatprep.subr.bf16.mxu1 %v3582_v50 }
 0x222   :  { %3064 = vmatpush3.bf16.msra.mxu1 %v3583_v17 }
 0x223   :  { %3065 = vmatprep.subr.bf16.mxu1 %v3584_v56 }
 0x226   :  { %3066 = vmatpush3.bf16.msra.mxu1 %v3585_v61 }
 0x227   :  { %3067 = vmatprep.subr.bf16.mxu1 %v3586_v62 }
 0x22a   :  { %3068 = vmatpush3.bf16.msra.mxu1 %v3587_v2  ;;  %v3042_v2 = vld [vmem:[%s3985_s8] ss:$0 sm:$0xff] }
 0x22b   :  { %3069 = vmatprep.subr.bf16.mxu1 %v3588_v3 }
 0x22e   :  { %3070 = vmatpush3.bf16.msra.mxu1 %v3589_v8 }
 0x22f   :  { %3071 = vmatprep.subr.bf16.mxu1 %v3590_v9 }
 0x232   :  { %3072 = vmatpush3.bf16.msra.mxu1 %v3591_v12 }
 0x278   :  { %v1887_v43 = vpop.f32.mrb[16].mxu0 }
 0x279   :  { %v3090_v44 = vadd.f32 %v1887_v43, %v1765_v41  ;;  %v1889_v45 = vpop.f32.mrb[17].mxu0 }
 0x27a   :  { %v3092_v59 = vadd.f32 %v1889_v45, %v1767_v42  ;;  %v1891_v51 = vpop.f32.mrb[18].mxu0 }
 0x27b   :  { %v2058_v52 = vmax.f32 %v3090_v44, 0.0  ;;  %v1892_v53 = vpop.f32.mrb[19].mxu0  ;;  %v3592_v51 = vld [vmem:[#allocation10 + $0x70] sm:$0xff]  }
 0x27c   :  { %v2059_v54 = vmax.f32 %v3092_v59, 0.0  ;;  %3073 = vmatprep.subr.bf16.mxu1 %v3592_v51  ;;  %v2139_v53 = vrot.slane %v2130_v27, %v3890_v18 }
 0x27d   :  { %v2062_v7 = vpack.c.bf16 %v2058_v52, %v2058_v52  ;;  %v3593_v52 = vld [vmem:[#allocation10 + $0x30] sm:$0xff]  }
 0x27e   :  { %v2063_v57 = vpack.c.bf16 %v2059_v54, %v2059_v54  ;;  %3074 = vmatpush3.bf16.msra.mxu1 %v3593_v52 }
 0x27f   :  { %3075 = vmatprep.subr.bf16.mxu1 %v3594_v24 }
 0x280   :  { %2494 = vmatprep.mubr.bf16.mxu0 %v2063_v57 }
 0x281   :  { %2495 = vmatmul.mubr.bf16.vlgmr.msra.gmra.mrb[20].mxu0 %v2062_v7 }
 0x282   :  { %2504 = vmatpush1.bf16.msra.mxu0 %v3532_v58  ;;  %3076 = vmatpush3.bf16.msra.mxu1 %v3595_v15 }
 0x283   :  { %2505 = vmatprep.subr.bf16.mxu0 %v3537_v60 }
 0x286   :  { %2506 = vmatpush1.bf16.msra.mxu0 %v3535_v63 }
 0x287   :  { %2507 = vmatprep.subr.bf16.mxu0 %v3540_v1 }
 0x28a   :  { %2508 = vmatpush1.bf16.msra.mxu0 %v3538_v5 }
 0x28b   :  { %2509 = vmatprep.subr.bf16.mxu0 %v3543_v6 }
 0x28e   :  { %2510 = vmatpush1.bf16.msra.mxu0 %v3541_v10 }
 0x28f   :  { %2511 = vmatprep.subr.bf16.mxu0 %v3546_v11 }
 0x292   :  { %2512 = vmatpush1.bf16.msra.mxu0 %v3544_v13 }
 0x293   :  { %2513 = vmatprep.subr.bf16.mxu0 %v3549_v14 }
 0x296   :  { %2514 = vmatpush1.bf16.msra.mxu0 %v3547_v55 }
 0x297   :  { %2515 = vmatprep.subr.bf16.mxu0 %v3552_v20 }
 0x29a   :  { %2516 = vmatpush1.bf16.msra.mxu0 %v3550_v21 }
 0x29b   :  { %2517 = vmatprep.subr.bf16.mxu0 %v3555_v22 }
 0x29e   :  { %2518 = vmatpush1.bf16.msra.mxu0 %v3553_v35 }
 0x29f   :  { %2519 = vmatprep.subr.bf16.mxu0 %v3558_v23 }
 0x2a2   :  { %2520 = vmatpush1.bf16.msra.mxu0 %v3556_v49 }
 0x2a3   :  { %2521 = vmatprep.subr.bf16.mxu0 %v3561_v25 }
 0x2a6   :  { %2522 = vmatpush1.bf16.msra.mxu0 %v3559_v26 }
 0x2a7   :  { %2523 = vmatprep.subr.bf16.mxu0 %v3564_v28 }
 0x2aa   :  { %2524 = vmatpush1.bf16.msra.mxu0 %v3562_v29 }
 0x2ab   :  { %2525 = vmatprep.subr.bf16.mxu0 %v3567_v19 }
 0x2ae   :  { %2526 = vmatpush1.bf16.msra.mxu0 %v3565_v30 }
 0x2af   :  { %2527 = vmatprep.subr.bf16.mxu0 %v3570_v0 }
 0x2b2   :  { %2528 = vmatpush1.bf16.msra.mxu0 %v3568_v31 }
 0x2b3   :  { %2529 = vmatprep.subr.bf16.mxu0 %v3573_v32 }
 0x2b6   :  { %2530 = vmatpush1.bf16.msra.mxu0 %v3571_v33 }
 0x2b7   :  { %2531 = vmatprep.subr.bf16.mxu0 %v3576_v34 }
 0x2ba   :  { %2532 = vmatpush1.bf16.msra.mxu0 %v3574_v36 }
 0x2bb   :  { %2533 = vmatprep.subr.bf16.mxu0 %v3579_v37 }
 0x2be   :  { %2534 = vmatpush1.bf16.msra.mxu0 %v3577_v38 }
 0x2f0   :  { %v2051_v40 = vpop.f32.mrb[4].mxu1 }
 0x2f1   :  { %v3093_v41 = vadd.f32 %v2051_v40, %v601_v48  ;;  %v2053_v42 = vpop.f32.mrb[5].mxu1 }
 0x2f2   :  { %v3094_v43 = vadd.f32 %v2053_v42, %v605_v4  ;;  %v2055_v44 = vpop.f32.mrb[6].mxu1 }
 0x2f3   :  { %v2060_v45 = vmax.f32 %v3093_v41, 0.0  ;;  %v2056_v46 = vpop.f32.mrb[7].mxu1 }
 0x2f4   :  { %v2061_v47 = vmax.f32 %v3094_v43, 0.0 }
 0x2f5   :  { %v2064_v59 = vpack.c.bf16 %v2060_v45, %v2060_v45 }
 0x2f6   :  { %v2065_v50 = vpack.c.bf16 %v2061_v47, %v2061_v47 }
 0x2f8   :  { %2535 = vmatprep.mubr.bf16.mxu0 %v2065_v50 }
 0x2f9   :  { %2536 = vmatmul.mubr.bf16.vlgmr.msra.gmra.mrb[20].mxu0 %v2064_v59 }
 0x3cc   :  { %v2537_v54 = vpop.f32.mrb[20].mxu0 }
 0x3cd   :  { %v3095_v17 = vadd.f32 %v2537_v54, %v2135_v39  ;;  %v2539_v56 = vpop.f32.mrb[21].mxu0 }
 0x3ce   :  { %v3096_v57 = vadd.f32 %v2539_v56, %v2139_v53  ;;  %v2541_v58 = vpop.f32.mrb[22].mxu0 }
 0x3cf   :  { %v2544_v7 = vmax.f32 %v3095_v17, 0.0  ;;  %v2542_v60 = vpop.f32.mrb[23].mxu0 }
 0x3d0   :  { %v2545_v61 = vmax.f32 %v3096_v57, 0.0 }
 0x3d1   :  { %v2546_v63 = vpack.c.bf16 %v2544_v7, %v2544_v7 }
 0x3d2   :  { %v2547_v62 = vpack.c.bf16 %v2545_v61, %v2545_v61 }
 0x3d4   :  { %2715 = vmatprep.mubr.bf16.mxu1 %v2547_v62 }
 0x3d5   :  { %2716 = vmatmul.mubr.bf16.vlgmr.msra.gmra.mrb[8].mxu1 %v2546_v63 }
 0x4a8   :  { %v3077_v1 = vpop.f32.mrb[8].mxu1 }
 0x4a9   :  { %v3078_v16 = vpop.f32.mrb[9].mxu1 }
 0x4aa   :  { %v3079_v3 = vadd.f32 %v3078_v16, %v3077_v1  ;;  %v3080_v18 = vpop.f32.mrb[10].mxu1 }
 0x4ab   :  { %v3081_v5 = vpop.f32.mrb[11].mxu1 }
 0x4ac   :  { %v2718_v6 = vadd.f32 %v3079_v3, %v3042_v2 }
 0x4ae   :  { %3596 = vtanh.f32 %v2718_v6 }
 0x4b8   :  { %v3597_v8 = vpop.eup %3596 }
 0x4b9   :  { %v2724_v9 = vpack.c.bf16 %v3597_v8, %v3597_v8 }
 0x4bb   :  { %2725 = vst [vmem:[#allocation11] sm:$0xf] %v2724_v9 }
 0x4bc   :  { %3719 = shalt.err (!%p3716_p2)
}
 0x4bd   :  { %s3720_s14 = scalar_lea.hbm %s3986_s9, 64 }
 0x4be   :  { %p3721_p3 = scmp.ne.s32.totalorder %s3986_s9, %s3720_s14  ;;  %p3724_p4 = scmp.lt.u32.totalorder %s3720_s14, %s3986_s9 }
 0x4c0   :  { %p3726_p5 = pnand %p3724_p4, %p3721_p3 }
 0x4c2   :  { %3729 = shalt.err (!%p3726_p5)
}
 0x4c3   :  { %2735 = dma.vmem_to_hbm [thread:$0]  %s2733_s10, 64, %s3986_s9, [#allocation4]  }
 0x4c4   :  { %3736 = dma.done.wait [#allocation4], 64  }
 0x4c5   :  { %3737 = vsyncadd [#allocation4], 4294967232 }
 0x4c6   :  { %2739 = vsyncpa [#allocation3], 1 }
 0x4c7   :  { %2740 = vsyncpa [#allocation6], 1 }
 0x4c8   :  { %2741 = vsyncpa [#allocation9], 1 }
 0x4c9   :  { %2742 = vsyncpa [#allocation4], 1 }

</bundles_post_ra>
